<compile_context>
chip_gen: v7x
topology: tpu7x:2x2x1
jax: 0.10.0
libtpu: 0.0.40
codegen_flags: <defaults>
</compile_context>

<pallas_src>
import functools
import math

import jax
import jax.numpy as jnp
from jax import lax
from jax.experimental import pallas as pl
from jax.experimental.pallas import tpu as pltpu

F32 = jnp.float32
BF16 = jnp.bfloat16
_NEG = -1e9          # finite "minus infinity" for additive masks
_LN_EPS = 1e-5


# ---------------------------------------------------------------------------
# In-kernel building blocks (operate on VMEM values)
# ---------------------------------------------------------------------------
def _layernorm(x, g, b, eps=_LN_EPS):
    mu = jnp.mean(x, axis=-1, keepdims=True)
    var = jnp.mean(jnp.square(x - mu), axis=-1, keepdims=True)
    return (x - mu) * jax.lax.rsqrt(var + eps) * g + b


def _mm(a_bf16, w_bf16):
    """MXU matmul, bf16 inputs (weights pre-cast in HBM), f32 accumulation."""
    return jnp.dot(a_bf16, w_bf16, preferred_element_type=F32)


def _attn_core(q, k, v, out_w, out_b, mask, nhead):
    """q/k/v: bf16 (Sq,D)/(Sk,D)/(Sk,D), q pre-scaled. out_w: (D,D) bf16.

    Per-head accumulation into the output projection: every MXU output stays
    N=D lane-dense; only out_w rows (sublanes) are sliced per head (no concat).
    """
    Sq, D = q.shape
    Dh = D // nhead
    acc = jnp.zeros((Sq, D), F32)
    for h in range(nhead):                       # small static loop, unrolled
        sl = slice(h * Dh, (h + 1) * Dh)
        # q.kT without an explicit transpose (contract last dims)
        s = lax.dot_general(q[:, sl], k[:, sl], (((1,), (1,)), ((), ())),
                            preferred_element_type=F32)          # (Sq, Sk)
        s = s + mask                                              # combined mask, 1 add
        m = jnp.max(s, axis=-1, keepdims=True)
        p = jnp.exp(s - m)
        p = p * pl.reciprocal(jnp.sum(p, axis=-1, keepdims=True), approx=True)
        oh = jnp.dot(p.astype(BF16), v[:, sl], preferred_element_type=F32)
        acc = acc + jnp.dot(oh.astype(BF16), out_w[sl, :],
                            preferred_element_type=F32)
    return acc + out_b


def _self_attention(x, in_w, in_b, out_w, out_b, mask, nhead):
    """Packed QKV projection (single N=3D matmul) + fused attention."""
    Sq, D = x.shape
    Dh = D // nhead
    scale = 1.0 / math.sqrt(Dh)
    qkv = _mm(x.astype(BF16), in_w) + in_b               # (Sq, 3D) f32
    q = (qkv[:, :D] * scale).astype(BF16)                # scale folded into q, once
    k = qkv[:, D:2 * D].astype(BF16)
    v = qkv[:, 2 * D:].astype(BF16)
    return _attn_core(q, k, v, out_w, out_b, mask, nhead)


def _cross_attention(x_q, x_kv, q_w, q_b, kv_w, kv_b, out_w, out_b, mask, nhead):
    """q from decoder stream, packed KV (N=2D) from encoder memory."""
    Sq, D = x_q.shape
    Dh = D // nhead
    scale = 1.0 / math.sqrt(Dh)
    q = ((_mm(x_q.astype(BF16), q_w) + q_b) * scale).astype(BF16)
    kv = _mm(x_kv.astype(BF16), kv_w) + kv_b             # (Sk, 2D) f32
    k = kv[:, :D].astype(BF16)
    v = kv[:, D:].astype(BF16)
    return _attn_core(q, k, v, out_w, out_b, mask, nhead)


def _ffn(x, w1, b1, w2, b2):
    h = jnp.maximum(_mm(x.astype(BF16), w1) + b1, 0.0)
    return _mm(h.astype(BF16), w2) + b2


# ---------------------------------------------------------------------------
# Fused stack kernels: grid = (batch, layer); activation resident across layers
# ---------------------------------------------------------------------------
def _encoder_stack_kernel(x_ref, mask_ref,
                          in_w, in_b, out_w, out_b, ln1_g, ln1_b,
                          ff1_w, ff1_b, ff2_w, ff2_b, ln2_g, ln2_b,
                          fin_g, fin_b,
                          o_ref, act, *, nhead):
    l = pl.program_id(1)

    @pl.when(l == 0)
    def _():                                   # (re)load layer-0 input per batch
        act[...] = x_ref[0]

    x = act[...]                               # (S, D) f32, resident in VMEM
    a = _self_attention(x, in_w[0], in_b[0], out_w[0], out_b[0],
                        mask_ref[0], nhead)
    x = _layernorm(x + a, ln1_g[0], ln1_b[0])
    h = _ffn(x, ff1_w[0], ff1_b[0], ff2_w[0], ff2_b[0])
    x = _layernorm(x + h, ln2_g[0], ln2_b[0])
    act[...] = x

    @pl.when(l == pl.num_programs(1) - 1)
    def _():                                   # encoder final LayerNorm fused in
        o_ref[0] = _layernorm(x, fin_g[...], fin_b[...]).astype(o_ref.dtype)


def _decoder_stack_kernel(x_ref, mem_ref, tmask_ref, mmask_ref,
                          sa_in_w, sa_in_b, sa_out_w, sa_out_b, ln1_g, ln1_b,
                          ca_q_w, ca_q_b, ca_kv_w, ca_kv_b, ca_out_w, ca_out_b,
                          ln2_g, ln2_b,
                          ff1_w, ff1_b, ff2_w, ff2_b, ln3_g, ln3_b,
                          fin_g, fin_b, gen_w, gen_b,
                          o_ref, act, *, nhead):
    l = pl.program_id(1)

    @pl.when(l == 0)
    def _():
        act[...] = x_ref[0]

    x = act[...]                               # (St, D)
    mem = mem_ref[0]                           # (Ss, D), resident across layers
    a = _self_attention(x, sa_in_w[0], sa_in_b[0], sa_out_w[0], sa_out_b[0],
                        tmask_ref[0], nhead)
    x = _layernorm(x + a, ln1_g[0], ln1_b[0])
    c = _cross_attention(x, mem, ca_q_w[0], ca_q_b[0], ca_kv_w[0], ca_kv_b[0],
                         ca_out_w[0], ca_out_b[0], mmask_ref[0], nhead)
    x = _layernorm(x + c, ln2_g[0], ln2_b[0])
    h = _ffn(x, ff1_w[0], ff1_b[0], ff2_w[0], ff2_b[0])
    x = _layernorm(x + h, ln3_g[0], ln3_b[0])
    act[...] = x

    @pl.when(l == pl.num_programs(1) - 1)
    def _():                                   # final LayerNorm + generator fused in
        y = _layernorm(x, fin_g[...], fin_b[...])
        o_ref[0] = (_mm(y.astype(BF16), gen_w[...]) + gen_b[...]).astype(o_ref.dtype)


# ---------------------------------------------------------------------------
# pallas_call wrappers
# ---------------------------------------------------------------------------
_SEM = pltpu.CompilerParams(dimension_semantics=("parallel", "arbitrary"))


def _wspec(shape):
    """Stacked per-layer tensor: block over the layer (l) grid axis."""
    nz = len(shape) - 1
    return pl.BlockSpec((1,) + tuple(shape[1:]),
                        lambda b, l, _nz=nz: (l,) + (0,) * _nz)


def _bspec(shape):
    """Per-batch tensor: block over b, resident across the layer axis."""
    nz = len(shape) - 1
    return pl.BlockSpec((1,) + tuple(shape[1:]),
                        lambda b, l, _nz=nz: (b,) + (0,) * _nz)


def _rep_spec(shape):
    """Replicated tensor (same block for every grid step)."""
    n = len(shape)
    return pl.BlockSpec(tuple(shape), lambda b, l, _n=n: (0,) * _n)


def encoder_stack_pallas(x, mask, ep, fin_g, fin_b, nhead):
    B, S, D = x.shape
    L = ep["in_w"].shape[0]
    F = ep["ff1_w"].shape[2]
    kernel = functools.partial(_encoder_stack_kernel, nhead=nhead)
    return pl.pallas_call(
        kernel,
        out_shape=jax.ShapeDtypeStruct((B, S, D), F32),
        grid=(B, L),
        in_specs=[
            _bspec((B, S, D)),                 # src embeddings
            _bspec((B, S, S)),                 # attn mask + key-padding, combined
            _wspec((L, D, 3 * D)), _wspec((L, 1, 3 * D)),
            _wspec((L, D, D)), _wspec((L, 1, D)),
            _wspec((L, 1, D)), _wspec((L, 1, D)),
            _wspec((L, D, F)), _wspec((L, 1, F)),
            _wspec((L, F, D)), _wspec((L, 1, D)),
            _wspec((L, 1, D)), _wspec((L, 1, D)),
            _rep_spec((1, D)), _rep_spec((1, D)),
        ],
        out_specs=_bspec((B, S, D)),
        scratch_shapes=[pltpu.VMEM((S, D), F32)],
        compiler_params=_SEM,
    )(x, mask,
      ep["in_w"], ep["in_b"], ep["out_w"], ep["out_b"],
      ep["ln1_g"], ep["ln1_b"],
      ep["ff1_w"], ep["ff1_b"], ep["ff2_w"], ep["ff2_b"],
      ep["ln2_g"], ep["ln2_b"],
      fin_g, fin_b)


def decoder_stack_pallas(x, mem, tgt_mask, mem_kpm, dp, fin_g, fin_b,
                         gen_w, gen_b, nhead):
    B, St, D = x.shape
    Ss = mem.shape[1]
    L = dp["sa_in_w"].shape[0]
    F = dp["ff1_w"].shape[2]
    Npad = gen_w.shape[1]
    kernel = functools.partial(_decoder_stack_kernel, nhead=nhead)
    return pl.pallas_call(
        kernel,
        out_shape=jax.ShapeDtypeStruct((B, St, Npad), F32),
        grid=(B, L),
        in_specs=[
            _bspec((B, St, D)),                # tgt embeddings
            _bspec((B, Ss, D)),                # encoder memory (resident)
            _bspec((B, St, St)),               # self-attn mask + key-padding
            _bspec((B, 1, Ss)),                # memory key-padding mask
            _wspec((L, D, 3 * D)), _wspec((L, 1, 3 * D)),
            _wspec((L, D, D)), _wspec((L, 1, D)),
            _wspec((L, 1, D)), _wspec((L, 1, D)),
            _wspec((L, D, D)), _wspec((L, 1, D)),
            _wspec((L, D, 2 * D)), _wspec((L, 1, 2 * D)),
            _wspec((L, D, D)), _wspec((L, 1, D)),
            _wspec((L, 1, D)), _wspec((L, 1, D)),
            _wspec((L, D, F)), _wspec((L, 1, F)),
            _wspec((L, F, D)), _wspec((L, 1, D)),
            _wspec((L, 1, D)), _wspec((L, 1, D)),
            _rep_spec((1, D)), _rep_spec((1, D)),
            _rep_spec((D, Npad)), _rep_spec((1, Npad)),
        ],
        out_specs=_bspec((B, St, Npad)),
        scratch_shapes=[pltpu.VMEM((St, D), F32)],
        compiler_params=_SEM,
    )(x, mem, tgt_mask, mem_kpm,
      dp["sa_in_w"], dp["sa_in_b"], dp["sa_out_w"], dp["sa_out_b"],
      dp["ln1_g"], dp["ln1_b"],
      dp["ca_q_w"], dp["ca_q_b"], dp["ca_kv_w"], dp["ca_kv_b"],
      dp["ca_out_w"], dp["ca_out_b"],
      dp["ln2_g"], dp["ln2_b"],
      dp["ff1_w"], dp["ff1_b"], dp["ff2_w"], dp["ff2_b"],
      dp["ln3_g"], dp["ln3_b"],
      fin_g, fin_b, gen_w, gen_b)


# ---------------------------------------------------------------------------
# Full forward pass
# ---------------------------------------------------------------------------
@functools.partial(jax.jit, static_argnames=("nhead", "output_dim"))
def transformer_forward(params, src, tgt, src_mask, tgt_mask,
                        src_padding_mask, tgt_padding_mask,
                        memory_key_padding_mask, *, nhead, output_dim):
    pe = params["pe"]                           # (max_len, 1, D)

    src_emb = jnp.take(params["src_emb"], src, axis=0)      # (B, Ss, D)
    tgt_emb = jnp.take(params["tgt_emb"], tgt, axis=0)      # (B, St, D)
    # faithful reproduction of PositionalEncoding with batch_first inputs:
    assert src_emb.shape[0] <= pe.shape[0] and tgt_emb.shape[0] <= pe.shape[0]
    src_emb = src_emb + pe[: src_emb.shape[0]]
    tgt_emb = tgt_emb + pe[: tgt_emb.shape[0]]
    # dropout(p=0.1) -> identity (eval-mode / deterministic)

    B, Ss, _ = src_emb.shape
    St = tgt_emb.shape[1]

    # additive masks with finite -1e9 (avoids NaN on fully-masked rows);
    # attn mask + key-padding mask combined ONCE here (not per head in-kernel)
    src_mask_add = jnp.maximum(src_mask.astype(F32), _NEG)          # (Ss, Ss)
    tgt_mask_add = jnp.maximum(tgt_mask.astype(F32), _NEG)          # (St, St)
    src_kpm = jnp.where(src_padding_mask, _NEG, 0.0).astype(F32)    # (B, Ss)
    tgt_kpm = jnp.where(tgt_padding_mask, _NEG, 0.0).astype(F32)    # (B, St)
    mem_kpm = jnp.where(memory_key_padding_mask, _NEG, 0.0).astype(F32)

    src_full = src_mask_add[None] + src_kpm[:, None, :]             # (B, Ss, Ss)
    tgt_full = tgt_mask_add[None] + tgt_kpm[:, None, :]             # (B, St, St)
    mem_full = mem_kpm[:, None, :]                                  # (B, 1, Ss)

    # one pallas_call for the whole encoder (all layers + final LN)
    mem = encoder_stack_pallas(src_emb, src_full, params["encoder"],
                               params["enc_norm_g"], params["enc_norm_b"], nhead)

    # one pallas_call for the whole decoder (all layers + final LN + generator)
    logits = decoder_stack_pallas(tgt_emb, mem, tgt_full, mem_full,
                                  params["decoder"],
                                  params["dec_norm_g"], params["dec_norm_b"],
                                  params["gen_w_pad"], params["gen_b_pad"], nhead)
    return logits[..., :output_dim]


# ---------------------------------------------------------------------------
# Deterministic parameter init (synthetic; shapes follow the module's __init__).
# Per-layer weights are stacked on a leading L axis; matmul weights pre-cast to
# bf16 in HBM (halves weight DMA); biases / LN params stay f32.
# ---------------------------------------------------------------------------
def init_params(key, input_dim, output_dim, d_model, nhead,
                num_encoder_layers, num_decoder_layers, dim_feedforward,
                max_len=64):
    keys = iter(jax.random.split(key, 4096))
    D, F = d_model, dim_feedforward
    Le, Ld = num_encoder_layers, num_decoder_layers

    def nrm(shape, scale=0.02):
        return scale * jax.random.normal(next(keys), shape, F32)

    def stack_w(shape, n):
        return jnp.stack([nrm(shape) for _ in range(n)], axis=0).astype(BF16)

    encoder = dict(
        in_w=stack_w((D, 3 * D), Le), in_b=jnp.zeros((Le, 1, 3 * D), F32),
        out_w=stack_w((D, D), Le), out_b=jnp.zeros((Le, 1, D), F32),
        ln1_g=jnp.ones((Le, 1, D), F32), ln1_b=jnp.zeros((Le, 1, D), F32),
        ff1_w=stack_w((D, F), Le), ff1_b=jnp.zeros((Le, 1, F), F32),
        ff2_w=stack_w((F, D), Le), ff2_b=jnp.zeros((Le, 1, D), F32),
        ln2_g=jnp.ones((Le, 1, D), F32), ln2_b=jnp.zeros((Le, 1, D), F32),
    )

    decoder = dict(
        sa_in_w=stack_w((D, 3 * D), Ld), sa_in_b=jnp.zeros((Ld, 1, 3 * D), F32),
        sa_out_w=stack_w((D, D), Ld), sa_out_b=jnp.zeros((Ld, 1, D), F32),
        ln1_g=jnp.ones((Ld, 1, D), F32), ln1_b=jnp.zeros((Ld, 1, D), F32),
        ca_q_w=stack_w((D, D), Ld), ca_q_b=jnp.zeros((Ld, 1, D), F32),
        ca_kv_w=stack_w((D, 2 * D), Ld), ca_kv_b=jnp.zeros((Ld, 1, 2 * D), F32),
        ca_out_w=stack_w((D, D), Ld), ca_out_b=jnp.zeros((Ld, 1, D), F32),
        ln2_g=jnp.ones((Ld, 1, D), F32), ln2_b=jnp.zeros((Ld, 1, D), F32),
        ff1_w=stack_w((D, F), Ld), ff1_b=jnp.zeros((Ld, 1, F), F32),
        ff2_w=stack_w((F, D), Ld), ff2_b=jnp.zeros((Ld, 1, D), F32),
        ln3_g=jnp.ones((Ld, 1, D), F32), ln3_b=jnp.zeros((Ld, 1, D), F32),
    )

    # positional encoding table: (max_len, 1, d_model)
    position = jnp.arange(max_len, dtype=F32)[:, None]
    div_term = jnp.exp(jnp.arange(0, D, 2, dtype=F32) * (-(math.log(10000.0) / D)))
    pe = jnp.zeros((max_len, 1, D), F32)
    pe = pe.at[:, 0, 0::2].set(jnp.sin(position * div_term))
    pe = pe.at[:, 0, 1::2].set(jnp.cos(position * div_term))

    # generator padded to a 128-lane multiple -> unmasked full-lane stores
    n_pad = max(128, ((output_dim + 127) // 128) * 128)
    gen_w = nrm((D, output_dim))
    gen_w_pad = jnp.zeros((D, n_pad), F32).at[:, :output_dim].set(gen_w).astype(BF16)
    gen_b_pad = jnp.zeros((1, n_pad), F32)

    return dict(
        src_emb=nrm((input_dim, D), scale=1.0),
        tgt_emb=nrm((output_dim, D), scale=1.0),
        pe=pe,
        encoder=encoder,
        decoder=decoder,
        enc_norm_g=jnp.ones((1, D), F32), enc_norm_b=jnp.zeros((1, D), F32),
        dec_norm_g=jnp.ones((1, D), F32), dec_norm_b=jnp.zeros((1, D), F32),
        gen_w_pad=gen_w_pad, gen_b_pad=gen_b_pad,
    )


# ---------------------------------------------------------------------------
if __name__ == "__main__":
    # small-but-consistent hyperparameters
    input_dim, output_dim = 32, 32
    d_model, nhead = 128, 4
    num_encoder_layers, num_decoder_layers = 2, 2
    dim_feedforward = 256
    B, Ss, St = 2, 8, 8

    root = jax.random.PRNGKey(0)
    kp, k1, k2 = jax.random.split(root, 3)
    params = init_params(kp, input_dim, output_dim, d_model, nhead,
                         num_encoder_layers, num_decoder_layers, dim_feedforward)

    src = jax.random.randint(k1, (B, Ss), 0, input_dim, dtype=jnp.int32)
    tgt = jax.random.randint(k2, (B, St), 0, output_dim, dtype=jnp.int32)

    src_mask = jnp.zeros((Ss, Ss), jnp.float32)
    tgt_mask = jnp.where(jnp.triu(jnp.ones((St, St), bool), k=1),
                         -jnp.inf, 0.0).astype(jnp.float32)   # causal
    src_padding_mask = jnp.zeros((B, Ss), bool).at[1, Ss - 1].set(True)
    tgt_padding_mask = jnp.zeros((B, St), bool).at[1, St - 1].set(True)
    memory_key_padding_mask = src_padding_mask

    out = transformer_forward(params, src, tgt, src_mask, tgt_mask,
                              src_padding_mask, tgt_padding_mask,
                              memory_key_padding_mask,
                              nhead=nhead, output_dim=output_dim)
    out = jax.block_until_ready(out)
    assert out.shape == (B, St, output_dim)
    assert bool(jnp.all(jnp.isfinite(out)))
    # TODO(synk): dropout is identity (eval semantics); training-mode RNG dropout not implemented.
    print("KERNEL_OK")
</pallas_src>

<mosaic_0001>
module attributes {stable_mosaic.version = 11 : i64} {
  func.func @_encoder_stack_kernel(%arg0: i32, %arg1: i32, %arg2: memref<1x8x128xf32, #tpu.memory_space<vmem>>, %arg3: memref<1x8x8xf32, #tpu.memory_space<vmem>>, %arg4: memref<1x128x384xbf16, #tpu.memory_space<vmem>>, %arg5: memref<1x1x384xf32, #tpu.memory_space<vmem>>, %arg6: memref<1x128x128xbf16, #tpu.memory_space<vmem>>, %arg7: memref<1x1x128xf32, #tpu.memory_space<vmem>>, %arg8: memref<1x1x128xf32, #tpu.memory_space<vmem>>, %arg9: memref<1x1x128xf32, #tpu.memory_space<vmem>>, %arg10: memref<1x128x256xbf16, #tpu.memory_space<vmem>>, %arg11: memref<1x1x256xf32, #tpu.memory_space<vmem>>, %arg12: memref<1x256x128xbf16, #tpu.memory_space<vmem>>, %arg13: memref<1x1x128xf32, #tpu.memory_space<vmem>>, %arg14: memref<1x1x128xf32, #tpu.memory_space<vmem>>, %arg15: memref<1x1x128xf32, #tpu.memory_space<vmem>>, %arg16: memref<1x128xf32, #tpu.memory_space<vmem>>, %arg17: memref<1x128xf32, #tpu.memory_space<vmem>>, %arg18: memref<1x8x128xf32, #tpu.memory_space<vmem>>, %arg19: memref<8x128xf32, #tpu.memory_space<vmem>>) attributes {dimension_semantics = [#tpu.dimension_semantics<parallel>, #tpu.dimension_semantics<arbitrary>], iteration_bounds = array<i64: 2, 2>, scalar_prefetch = 0 : i64, scratch_operands = 1 : i64, tpu.core_type = #tpu.core_type<tc>, window_params = [{transform_indices = @transform_0, window_bounds = array<i64: 1, 8, 128>}, {transform_indices = @transform_1, window_bounds = array<i64: 1, 8, 8>}, {transform_indices = @transform_2, window_bounds = array<i64: 1, 128, 384>}, {transform_indices = @transform_3, window_bounds = array<i64: 1, 1, 384>}, {transform_indices = @transform_4, window_bounds = array<i64: 1, 128, 128>}, {transform_indices = @transform_5, window_bounds = array<i64: 1, 1, 128>}, {transform_indices = @transform_6, window_bounds = array<i64: 1, 1, 128>}, {transform_indices = @transform_7, window_bounds = array<i64: 1, 1, 128>}, {transform_indices = @transform_8, window_bounds = array<i64: 1, 128, 256>}, {transform_indices = @transform_9, window_bounds = array<i64: 1, 1, 256>}, {transform_indices = @transform_10, window_bounds = array<i64: 1, 256, 128>}, {transform_indices = @transform_11, window_bounds = array<i64: 1, 1, 128>}, {transform_indices = @transform_12, window_bounds = array<i64: 1, 1, 128>}, {transform_indices = @transform_13, window_bounds = array<i64: 1, 1, 128>}, {pipeline_mode = #tpu.pipeline_mode<synchronous>, transform_indices = @transform_14, window_bounds = array<i64: 1, 128>}, {pipeline_mode = #tpu.pipeline_mode<synchronous>, transform_indices = @transform_15, window_bounds = array<i64: 1, 128>}, {transform_indices = @transform_16, window_bounds = array<i64: 1, 8, 128>}]} {
    %c0_i32 = arith.constant 0 : i32
    %0 = arith.cmpi eq, %arg1, %c0_i32 : i32
    %1 = arith.extui %0 : i1 to i32
    %c0_i32_0 = arith.constant 0 : i32
    %2 = arith.cmpi ne, %1, %c0_i32_0 : i32
    scf.if %2 {
      %c0_79 = arith.constant 0 : index
      %c0_80 = arith.constant 0 : index
      %c0_81 = arith.constant 0 : index
      %189 = vector.load %arg2[%c0_79, %c0_80, %c0_81] : memref<1x8x128xf32, #tpu.memory_space<vmem>>, vector<1x8x128xf32>
      %190 = vector.shape_cast %189 : vector<1x8x128xf32> to vector<8x128xf32>
      %c0_82 = arith.constant 0 : index
      %c0_83 = arith.constant 0 : index
      %191 = vector.load %arg19[%c0_82, %c0_83] : memref<8x128xf32, #tpu.memory_space<vmem>>, vector<8x128xf32>
      tpu.vector_store %arg19[%c0_82, %c0_83], %190 {strides = array<i32>} : memref<8x128xf32, #tpu.memory_space<vmem>>, vector<8x128xf32>,
    } else {
    }
    %c0 = arith.constant 0 : index
    %c0_1 = arith.constant 0 : index
    %3 = vector.load %arg19[%c0, %c0_1] : memref<8x128xf32, #tpu.memory_space<vmem>>, vector<8x128xf32>
    %c0_2 = arith.constant 0 : index
    %c0_3 = arith.constant 0 : index
    %c0_4 = arith.constant 0 : index
    %4 = vector.load %arg4[%c0_2, %c0_3, %c0_4] : memref<1x128x384xbf16, #tpu.memory_space<vmem>>, vector<1x128x384xbf16>
    %5 = vector.shape_cast %4 : vector<1x128x384xbf16> to vector<128x384xbf16>
    %c0_5 = arith.constant 0 : index
    %c0_6 = arith.constant 0 : index
    %c0_7 = arith.constant 0 : index
    %6 = vector.load %arg5[%c0_5, %c0_6, %c0_7] : memref<1x1x384xf32, #tpu.memory_space<vmem>>, vector<1x1x384xf32>
    %7 = vector.shape_cast %6 : vector<1x1x384xf32> to vector<1x384xf32>
    %c0_8 = arith.constant 0 : index
    %c0_9 = arith.constant 0 : index
    %c0_10 = arith.constant 0 : index
    %8 = vector.load %arg6[%c0_8, %c0_9, %c0_10] : memref<1x128x128xbf16, #tpu.memory_space<vmem>>, vector<1x128x128xbf16>
    %9 = vector.shape_cast %8 : vector<1x128x128xbf16> to vector<128x128xbf16>
    %c0_11 = arith.constant 0 : index
    %c0_12 = arith.constant 0 : index
    %c0_13 = arith.constant 0 : index
    %10 = vector.load %arg7[%c0_11, %c0_12, %c0_13] : memref<1x1x128xf32, #tpu.memory_space<vmem>>, vector<1x1x128xf32>
    %11 = vector.shape_cast %10 : vector<1x1x128xf32> to vector<1x128xf32>
    %c0_14 = arith.constant 0 : index
    %c0_15 = arith.constant 0 : index
    %c0_16 = arith.constant 0 : index
    %12 = vector.load %arg3[%c0_14, %c0_15, %c0_16] : memref<1x8x8xf32, #tpu.memory_space<vmem>>, vector<1x8x8xf32>
    %13 = vector.shape_cast %12 : vector<1x8x8xf32> to vector<8x8xf32>
    %14 = arith.truncf %3 : vector<8x128xf32> to vector<8x128xbf16>
    %cst = arith.constant dense<0.000000e+00> : vector<8x384xf32>
    %15 = tpu.matmul %14, %5, %cst {dimension_numbers = #tpu.dot_dimension_numbers<[1], [0], [0], [1], [0, 0, 1, 1], [], []>} : vector<8x128xbf16>, vector<128x384xbf16>, vector<8x384xf32> -> vector<8x384xf32>
    %16 = vector.broadcast %7 : vector<1x384xf32> to vector<8x384xf32>
    %17 = arith.addf %15, %16 : vector<8x384xf32>
    %18 = vector.extract_strided_slice %17 {offsets = [0, 0], sizes = [8, 128], strides = [1, 1]} : vector<8x384xf32> to vector<8x128xf32>
    %cst_17 = arith.constant 0.176776692 : f32
    %19 = vector.broadcast %cst_17 : f32 to vector<8x128xf32>
    %20 = arith.mulf %18, %19 : vector<8x128xf32>
    %21 = arith.truncf %20 : vector<8x128xf32> to vector<8x128xbf16>
    %22 = vector.extract_strided_slice %17 {offsets = [0, 128], sizes = [8, 128], strides = [1, 1]} : vector<8x384xf32> to vector<8x128xf32>
    %23 = arith.truncf %22 : vector<8x128xf32> to vector<8x128xbf16>
    %24 = vector.extract_strided_slice %17 {offsets = [0, 256], sizes = [8, 128], strides = [1, 1]} : vector<8x384xf32> to vector<8x128xf32>
    %25 = arith.truncf %24 : vector<8x128xf32> to vector<8x128xbf16>
    %cst_18 = arith.constant 0.000000e+00 : f32
    %26 = vector.broadcast %cst_18 : f32 to vector<8x128xf32>
    %27 = vector.extract_strided_slice %21 {offsets = [0, 0], sizes = [8, 32], strides = [1, 1]} : vector<8x128xbf16> to vector<8x32xbf16>
    %28 = vector.extract_strided_slice %23 {offsets = [0, 0], sizes = [8, 32], strides = [1, 1]} : vector<8x128xbf16> to vector<8x32xbf16>
    %cst_19 = arith.constant dense<0.000000e+00> : vector<8x8xf32>
    %29 = tpu.matmul %27, %28, %cst_19 {dimension_numbers = #tpu.dot_dimension_numbers<[1], [1], [0], [0], [0, 0, 1, 0], [], []>} : vector<8x32xbf16>, vector<8x32xbf16>, vector<8x8xf32> -> vector<8x8xf32>
    %30 = arith.addf %29, %13 : vector<8x8xf32>
    %cst_20 = arith.constant dense<0xFF800000> : vector<8xf32>
    %31 = vector.multi_reduction <maximumf>, %30, %cst_20 [1] : vector<8x8xf32> to vector<8xf32>
    %32 = vector.shape_cast %31 : vector<8xf32> to vector<8x1xf32>
    %33 = vector.broadcast %32 : vector<8x1xf32> to vector<8x8xf32>
    %34 = arith.subf %30, %33 : vector<8x8xf32>
    %35 = math.exp %34 : vector<8x8xf32>
    %cst_21 = arith.constant dense<0.000000e+00> : vector<8xf32>
    %36 = vector.multi_reduction <add>, %35, %cst_21 [1] : vector<8x8xf32> to vector<8xf32>
    %37 = vector.shape_cast %36 : vector<8xf32> to vector<8x1xf32>
    %38 = tpu.reciprocal %37 {approx = true} : vector<8x1xf32> -> vector<8x1xf32>
    %39 = vector.broadcast %38 : vector<8x1xf32> to vector<8x8xf32>
    %40 = arith.mulf %35, %39 : vector<8x8xf32>
    %41 = arith.truncf %40 : vector<8x8xf32> to vector<8x8xbf16>
    %42 = vector.extract_strided_slice %25 {offsets = [0, 0], sizes = [8, 32], strides = [1, 1]} : vector<8x128xbf16> to vector<8x32xbf16>
    %cst_22 = arith.constant dense<0.000000e+00> : vector<8x32xf32>
    %43 = tpu.matmul %41, %42, %cst_22 {dimension_numbers = #tpu.dot_dimension_numbers<[1], [0], [0], [1], [0, 0, 1, 1], [], []>} : vector<8x8xbf16>, vector<8x32xbf16>, vector<8x32xf32> -> vector<8x32xf32>
    %44 = arith.truncf %43 : vector<8x32xf32> to vector<8x32xbf16>
    %45 = vector.extract_strided_slice %9 {offsets = [0, 0], sizes = [32, 128], strides = [1, 1]} : vector<128x128xbf16> to vector<32x128xbf16>
    %cst_23 = arith.constant dense<0.000000e+00> : vector<8x128xf32>
    %46 = tpu.matmul %44, %45, %cst_23 {dimension_numbers = #tpu.dot_dimension_numbers<[1], [0], [0], [1], [0, 0, 1, 1], [], []>} : vector<8x32xbf16>, vector<32x128xbf16>, vector<8x128xf32> -> vector<8x128xf32>
    %47 = arith.addf %26, %46 : vector<8x128xf32>
    %48 = vector.extract_strided_slice %21 {offsets = [0, 32], sizes = [8, 32], strides = [1, 1]} : vector<8x128xbf16> to vector<8x32xbf16>
    %49 = vector.extract_strided_slice %23 {offsets = [0, 32], sizes = [8, 32], strides = [1, 1]} : vector<8x128xbf16> to vector<8x32xbf16>
    %cst_24 = arith.constant dense<0.000000e+00> : vector<8x8xf32>
    %50 = tpu.matmul %48, %49, %cst_24 {dimension_numbers = #tpu.dot_dimension_numbers<[1], [1], [0], [0], [0, 0, 1, 0], [], []>} : vector<8x32xbf16>, vector<8x32xbf16>, vector<8x8xf32> -> vector<8x8xf32>
    %51 = arith.addf %50, %13 : vector<8x8xf32>
    %cst_25 = arith.constant dense<0xFF800000> : vector<8xf32>
    %52 = vector.multi_reduction <maximumf>, %51, %cst_25 [1] : vector<8x8xf32> to vector<8xf32>
    %53 = vector.shape_cast %52 : vector<8xf32> to vector<8x1xf32>
    %54 = vector.broadcast %53 : vector<8x1xf32> to vector<8x8xf32>
    %55 = arith.subf %51, %54 : vector<8x8xf32>
    %56 = math.exp %55 : vector<8x8xf32>
    %cst_26 = arith.constant dense<0.000000e+00> : vector<8xf32>
    %57 = vector.multi_reduction <add>, %56, %cst_26 [1] : vector<8x8xf32> to vector<8xf32>
    %58 = vector.shape_cast %57 : vector<8xf32> to vector<8x1xf32>
    %59 = tpu.reciprocal %58 {approx = true} : vector<8x1xf32> -> vector<8x1xf32>
    %60 = vector.broadcast %59 : vector<8x1xf32> to vector<8x8xf32>
    %61 = arith.mulf %56, %60 : vector<8x8xf32>
    %62 = arith.truncf %61 : vector<8x8xf32> to vector<8x8xbf16>
    %63 = vector.extract_strided_slice %25 {offsets = [0, 32], sizes = [8, 32], strides = [1, 1]} : vector<8x128xbf16> to vector<8x32xbf16>
    %cst_27 = arith.constant dense<0.000000e+00> : vector<8x32xf32>
    %64 = tpu.matmul %62, %63, %cst_27 {dimension_numbers = #tpu.dot_dimension_numbers<[1], [0], [0], [1], [0, 0, 1, 1], [], []>} : vector<8x8xbf16>, vector<8x32xbf16>, vector<8x32xf32> -> vector<8x32xf32>
    %65 = arith.truncf %64 : vector<8x32xf32> to vector<8x32xbf16>
    %66 = vector.extract_strided_slice %9 {offsets = [32, 0], sizes = [32, 128], strides = [1, 1]} : vector<128x128xbf16> to vector<32x128xbf16>
    %cst_28 = arith.constant dense<0.000000e+00> : vector<8x128xf32>
    %67 = tpu.matmul %65, %66, %cst_28 {dimension_numbers = #tpu.dot_dimension_numbers<[1], [0], [0], [1], [0, 0, 1, 1], [], []>} : vector<8x32xbf16>, vector<32x128xbf16>, vector<8x128xf32> -> vector<8x128xf32>
    %68 = arith.addf %47, %67 : vector<8x128xf32>
    %69 = vector.extract_strided_slice %21 {offsets = [0, 64], sizes = [8, 32], strides = [1, 1]} : vector<8x128xbf16> to vector<8x32xbf16>
    %70 = vector.extract_strided_slice %23 {offsets = [0, 64], sizes = [8, 32], strides = [1, 1]} : vector<8x128xbf16> to vector<8x32xbf16>
    %cst_29 = arith.constant dense<0.000000e+00> : vector<8x8xf32>
    %71 = tpu.matmul %69, %70, %cst_29 {dimension_numbers = #tpu.dot_dimension_numbers<[1], [1], [0], [0], [0, 0, 1, 0], [], []>} : vector<8x32xbf16>, vector<8x32xbf16>, vector<8x8xf32> -> vector<8x8xf32>
    %72 = arith.addf %71, %13 : vector<8x8xf32>
    %cst_30 = arith.constant dense<0xFF800000> : vector<8xf32>
    %73 = vector.multi_reduction <maximumf>, %72, %cst_30 [1] : vector<8x8xf32> to vector<8xf32>
    %74 = vector.shape_cast %73 : vector<8xf32> to vector<8x1xf32>
    %75 = vector.broadcast %74 : vector<8x1xf32> to vector<8x8xf32>
    %76 = arith.subf %72, %75 : vector<8x8xf32>
    %77 = math.exp %76 : vector<8x8xf32>
    %cst_31 = arith.constant dense<0.000000e+00> : vector<8xf32>
    %78 = vector.multi_reduction <add>, %77, %cst_31 [1] : vector<8x8xf32> to vector<8xf32>
    %79 = vector.shape_cast %78 : vector<8xf32> to vector<8x1xf32>
    %80 = tpu.reciprocal %79 {approx = true} : vector<8x1xf32> -> vector<8x1xf32>
    %81 = vector.broadcast %80 : vector<8x1xf32> to vector<8x8xf32>
    %82 = arith.mulf %77, %81 : vector<8x8xf32>
    %83 = arith.truncf %82 : vector<8x8xf32> to vector<8x8xbf16>
    %84 = vector.extract_strided_slice %25 {offsets = [0, 64], sizes = [8, 32], strides = [1, 1]} : vector<8x128xbf16> to vector<8x32xbf16>
    %cst_32 = arith.constant dense<0.000000e+00> : vector<8x32xf32>
    %85 = tpu.matmul %83, %84, %cst_32 {dimension_numbers = #tpu.dot_dimension_numbers<[1], [0], [0], [1], [0, 0, 1, 1], [], []>} : vector<8x8xbf16>, vector<8x32xbf16>, vector<8x32xf32> -> vector<8x32xf32>
    %86 = arith.truncf %85 : vector<8x32xf32> to vector<8x32xbf16>
    %87 = vector.extract_strided_slice %9 {offsets = [64, 0], sizes = [32, 128], strides = [1, 1]} : vector<128x128xbf16> to vector<32x128xbf16>
    %cst_33 = arith.constant dense<0.000000e+00> : vector<8x128xf32>
    %88 = tpu.matmul %86, %87, %cst_33 {dimension_numbers = #tpu.dot_dimension_numbers<[1], [0], [0], [1], [0, 0, 1, 1], [], []>} : vector<8x32xbf16>, vector<32x128xbf16>, vector<8x128xf32> -> vector<8x128xf32>
    %89 = arith.addf %68, %88 : vector<8x128xf32>
    %90 = vector.extract_strided_slice %21 {offsets = [0, 96], sizes = [8, 32], strides = [1, 1]} : vector<8x128xbf16> to vector<8x32xbf16>
    %91 = vector.extract_strided_slice %23 {offsets = [0, 96], sizes = [8, 32], strides = [1, 1]} : vector<8x128xbf16> to vector<8x32xbf16>
    %cst_34 = arith.constant dense<0.000000e+00> : vector<8x8xf32>
    %92 = tpu.matmul %90, %91, %cst_34 {dimension_numbers = #tpu.dot_dimension_numbers<[1], [1], [0], [0], [0, 0, 1, 0], [], []>} : vector<8x32xbf16>, vector<8x32xbf16>, vector<8x8xf32> -> vector<8x8xf32>
    %93 = arith.addf %92, %13 : vector<8x8xf32>
    %cst_35 = arith.constant dense<0xFF800000> : vector<8xf32>
    %94 = vector.multi_reduction <maximumf>, %93, %cst_35 [1] : vector<8x8xf32> to vector<8xf32>
    %95 = vector.shape_cast %94 : vector<8xf32> to vector<8x1xf32>
    %96 = vector.broadcast %95 : vector<8x1xf32> to vector<8x8xf32>
    %97 = arith.subf %93, %96 : vector<8x8xf32>
    %98 = math.exp %97 : vector<8x8xf32>
    %cst_36 = arith.constant dense<0.000000e+00> : vector<8xf32>
    %99 = vector.multi_reduction <add>, %98, %cst_36 [1] : vector<8x8xf32> to vector<8xf32>
    %100 = vector.shape_cast %99 : vector<8xf32> to vector<8x1xf32>
    %101 = tpu.reciprocal %100 {approx = true} : vector<8x1xf32> -> vector<8x1xf32>
    %102 = vector.broadcast %101 : vector<8x1xf32> to vector<8x8xf32>
    %103 = arith.mulf %98, %102 : vector<8x8xf32>
    %104 = arith.truncf %103 : vector<8x8xf32> to vector<8x8xbf16>
    %105 = vector.extract_strided_slice %25 {offsets = [0, 96], sizes = [8, 32], strides = [1, 1]} : vector<8x128xbf16> to vector<8x32xbf16>
    %cst_37 = arith.constant dense<0.000000e+00> : vector<8x32xf32>
    %106 = tpu.matmul %104, %105, %cst_37 {dimension_numbers = #tpu.dot_dimension_numbers<[1], [0], [0], [1], [0, 0, 1, 1], [], []>} : vector<8x8xbf16>, vector<8x32xbf16>, vector<8x32xf32> -> vector<8x32xf32>
    %107 = arith.truncf %106 : vector<8x32xf32> to vector<8x32xbf16>
    %108 = vector.extract_strided_slice %9 {offsets = [96, 0], sizes = [32, 128], strides = [1, 1]} : vector<128x128xbf16> to vector<32x128xbf16>
    %cst_38 = arith.constant dense<0.000000e+00> : vector<8x128xf32>
    %109 = tpu.matmul %107, %108, %cst_38 {dimension_numbers = #tpu.dot_dimension_numbers<[1], [0], [0], [1], [0, 0, 1, 1], [], []>} : vector<8x32xbf16>, vector<32x128xbf16>, vector<8x128xf32> -> vector<8x128xf32>
    %110 = arith.addf %89, %109 : vector<8x128xf32>
    %111 = vector.broadcast %11 : vector<1x128xf32> to vector<8x128xf32>
    %112 = arith.addf %110, %111 : vector<8x128xf32>
    %113 = arith.addf %3, %112 : vector<8x128xf32>
    %c0_39 = arith.constant 0 : index
    %c0_40 = arith.constant 0 : index
    %c0_41 = arith.constant 0 : index
    %114 = vector.load %arg8[%c0_39, %c0_40, %c0_41] : memref<1x1x128xf32, #tpu.memory_space<vmem>>, vector<1x1x128xf32>
    %115 = vector.shape_cast %114 : vector<1x1x128xf32> to vector<1x128xf32>
    %c0_42 = arith.constant 0 : index
    %c0_43 = arith.constant 0 : index
    %c0_44 = arith.constant 0 : index
    %116 = vector.load %arg9[%c0_42, %c0_43, %c0_44] : memref<1x1x128xf32, #tpu.memory_space<vmem>>, vector<1x1x128xf32>
    %117 = vector.shape_cast %116 : vector<1x1x128xf32> to vector<1x128xf32>
    %cst_45 = arith.constant dense<0.000000e+00> : vector<8xf32>
    %118 = vector.multi_reduction <add>, %113, %cst_45 [1] : vector<8x128xf32> to vector<8xf32>
    %119 = vector.shape_cast %118 : vector<8xf32> to vector<8x1xf32>
    %cst_46 = arith.constant 1.280000e+02 : f32
    %120 = vector.broadcast %cst_46 : f32 to vector<8x1xf32>
    %121 = arith.divf %119, %120 : vector<8x1xf32>
    %122 = vector.broadcast %121 : vector<8x1xf32> to vector<8x128xf32>
    %123 = arith.subf %113, %122 : vector<8x128xf32>
    %124 = arith.mulf %123, %123 : vector<8x128xf32>
    %cst_47 = arith.constant dense<0.000000e+00> : vector<8xf32>
    %125 = vector.multi_reduction <add>, %124, %cst_47 [1] : vector<8x128xf32> to vector<8xf32>
    %126 = vector.shape_cast %125 : vector<8xf32> to vector<8x1xf32>
    %cst_48 = arith.constant 1.280000e+02 : f32
    %127 = vector.broadcast %cst_48 : f32 to vector<8x1xf32>
    %128 = arith.divf %126, %127 : vector<8x1xf32>
    %129 = vector.broadcast %121 : vector<8x1xf32> to vector<8x128xf32>
    %130 = arith.subf %113, %129 : vector<8x128xf32>
    %cst_49 = arith.constant 9.99999974E-6 : f32
    %131 = vector.broadcast %cst_49 : f32 to vector<8x1xf32>
    %132 = arith.addf %128, %131 : vector<8x1xf32>
    %133 = math.rsqrt %132 : vector<8x1xf32>
    %134 = vector.broadcast %133 : vector<8x1xf32> to vector<8x128xf32>
    %135 = arith.mulf %130, %134 : vector<8x128xf32>
    %136 = vector.broadcast %115 : vector<1x128xf32> to vector<8x128xf32>
    %137 = arith.mulf %135, %136 : vector<8x128xf32>
    %138 = vector.broadcast %117 : vector<1x128xf32> to vector<8x128xf32>
    %139 = arith.addf %137, %138 : vector<8x128xf32>
    %c0_50 = arith.constant 0 : index
    %c0_51 = arith.constant 0 : index
    %c0_52 = arith.constant 0 : index
    %140 = vector.load %arg10[%c0_50, %c0_51, %c0_52] : memref<1x128x256xbf16, #tpu.memory_space<vmem>>, vector<1x128x256xbf16>
    %141 = vector.shape_cast %140 : vector<1x128x256xbf16> to vector<128x256xbf16>
    %c0_53 = arith.constant 0 : index
    %c0_54 = arith.constant 0 : index
    %c0_55 = arith.constant 0 : index
    %142 = vector.load %arg11[%c0_53, %c0_54, %c0_55] : memref<1x1x256xf32, #tpu.memory_space<vmem>>, vector<1x1x256xf32>
    %143 = vector.shape_cast %142 : vector<1x1x256xf32> to vector<1x256xf32>
    %c0_56 = arith.constant 0 : index
    %c0_57 = arith.constant 0 : index
    %c0_58 = arith.constant 0 : index
    %144 = vector.load %arg12[%c0_56, %c0_57, %c0_58] : memref<1x256x128xbf16, #tpu.memory_space<vmem>>, vector<1x256x128xbf16>
    %145 = vector.shape_cast %144 : vector<1x256x128xbf16> to vector<256x128xbf16>
    %c0_59 = arith.constant 0 : index
    %c0_60 = arith.constant 0 : index
    %c0_61 = arith.constant 0 : index
    %146 = vector.load %arg13[%c0_59, %c0_60, %c0_61] : memref<1x1x128xf32, #tpu.memory_space<vmem>>, vector<1x1x128xf32>
    %147 = vector.shape_cast %146 : vector<1x1x128xf32> to vector<1x128xf32>
    %148 = arith.truncf %139 : vector<8x128xf32> to vector<8x128xbf16>
    %cst_62 = arith.constant dense<0.000000e+00> : vector<8x256xf32>
    %149 = tpu.matmul %148, %141, %cst_62 {dimension_numbers = #tpu.dot_dimension_numbers<[1], [0], [0], [1], [0, 0, 1, 1], [], []>} : vector<8x128xbf16>, vector<128x256xbf16>, vector<8x256xf32> -> vector<8x256xf32>
    %150 = vector.broadcast %143 : vector<1x256xf32> to vector<8x256xf32>
    %151 = arith.addf %149, %150 : vector<8x256xf32>
    %cst_63 = arith.constant 0.000000e+00 : f32
    %152 = vector.broadcast %cst_63 : f32 to vector<8x256xf32>
    %153 = arith.maximumf %151, %152 : vector<8x256xf32>
    %154 = arith.truncf %153 : vector<8x256xf32> to vector<8x256xbf16>
    %cst_64 = arith.constant dense<0.000000e+00> : vector<8x128xf32>
    %155 = tpu.matmul %154, %145, %cst_64 {dimension_numbers = #tpu.dot_dimension_numbers<[1], [0], [0], [1], [0, 0, 1, 1], [], []>} : vector<8x256xbf16>, vector<256x128xbf16>, vector<8x128xf32> -> vector<8x128xf32>
    %156 = vector.broadcast %147 : vector<1x128xf32> to vector<8x128xf32>
    %157 = arith.addf %155, %156 : vector<8x128xf32>
    %158 = arith.addf %139, %157 : vector<8x128xf32>
    %c0_65 = arith.constant 0 : index
    %c0_66 = arith.constant 0 : index
    %c0_67 = arith.constant 0 : index
    %159 = vector.load %arg14[%c0_65, %c0_66, %c0_67] : memref<1x1x128xf32, #tpu.memory_space<vmem>>, vector<1x1x128xf32>
    %160 = vector.shape_cast %159 : vector<1x1x128xf32> to vector<1x128xf32>
    %c0_68 = arith.constant 0 : index
    %c0_69 = arith.constant 0 : index
    %c0_70 = arith.constant 0 : index
    %161 = vector.load %arg15[%c0_68, %c0_69, %c0_70] : memref<1x1x128xf32, #tpu.memory_space<vmem>>, vector<1x1x128xf32>
    %162 = vector.shape_cast %161 : vector<1x1x128xf32> to vector<1x128xf32>
    %cst_71 = arith.constant dense<0.000000e+00> : vector<8xf32>
    %163 = vector.multi_reduction <add>, %158, %cst_71 [1] : vector<8x128xf32> to vector<8xf32>
    %164 = vector.shape_cast %163 : vector<8xf32> to vector<8x1xf32>
    %cst_72 = arith.constant 1.280000e+02 : f32
    %165 = vector.broadcast %cst_72 : f32 to vector<8x1xf32>
    %166 = arith.divf %164, %165 : vector<8x1xf32>
    %167 = vector.broadcast %166 : vector<8x1xf32> to vector<8x128xf32>
    %168 = arith.subf %158, %167 : vector<8x128xf32>
    %169 = arith.mulf %168, %168 : vector<8x128xf32>
    %cst_73 = arith.constant dense<0.000000e+00> : vector<8xf32>
    %170 = vector.multi_reduction <add>, %169, %cst_73 [1] : vector<8x128xf32> to vector<8xf32>
    %171 = vector.shape_cast %170 : vector<8xf32> to vector<8x1xf32>
    %cst_74 = arith.constant 1.280000e+02 : f32
    %172 = vector.broadcast %cst_74 : f32 to vector<8x1xf32>
    %173 = arith.divf %171, %172 : vector<8x1xf32>
    %174 = vector.broadcast %166 : vector<8x1xf32> to vector<8x128xf32>
    %175 = arith.subf %158, %174 : vector<8x128xf32>
    %cst_75 = arith.constant 9.99999974E-6 : f32
    %176 = vector.broadcast %cst_75 : f32 to vector<8x1xf32>
    %177 = arith.addf %173, %176 : vector<8x1xf32>
    %178 = math.rsqrt %177 : vector<8x1xf32>
    %179 = vector.broadcast %178 : vector<8x1xf32> to vector<8x128xf32>
    %180 = arith.mulf %175, %179 : vector<8x128xf32>
    %181 = vector.broadcast %160 : vector<1x128xf32> to vector<8x128xf32>
    %182 = arith.mulf %180, %181 : vector<8x128xf32>
    %183 = vector.broadcast %162 : vector<1x128xf32> to vector<8x128xf32>
    %184 = arith.addf %182, %183 : vector<8x128xf32>
    %c0_76 = arith.constant 0 : index
    %c0_77 = arith.constant 0 : index
    %185 = vector.load %arg19[%c0_76, %c0_77] : memref<8x128xf32, #tpu.memory_space<vmem>>, vector<8x128xf32>
    tpu.vector_store %arg19[%c0_76, %c0_77], %184 {strides = array<i32>} : memref<8x128xf32, #tpu.memory_space<vmem>>, vector<8x128xf32>,
    %c1_i32 = arith.constant 1 : i32
    %186 = arith.cmpi eq, %arg1, %c1_i32 : i32
    %187 = arith.extui %186 : i1 to i32
    %c0_i32_78 = arith.constant 0 : i32
    %188 = arith.cmpi ne, %187, %c0_i32_78 : i32
    scf.if %188 {
      %c0_79 = arith.constant 0 : index
      %c0_80 = arith.constant 0 : index
      %189 = vector.load %arg16[%c0_79, %c0_80] : memref<1x128xf32, #tpu.memory_space<vmem>>, vector<1x128xf32>
      %c0_81 = arith.constant 0 : index
      %c0_82 = arith.constant 0 : index
      %190 = vector.load %arg17[%c0_81, %c0_82] : memref<1x128xf32, #tpu.memory_space<vmem>>, vector<1x128xf32>
      %cst_83 = arith.constant dense<0.000000e+00> : vector<8xf32>
      %191 = vector.multi_reduction <add>, %184, %cst_83 [1] : vector<8x128xf32> to vector<8xf32>
      %192 = vector.shape_cast %191 : vector<8xf32> to vector<8x1xf32>
      %cst_84 = arith.constant 1.280000e+02 : f32
      %193 = vector.broadcast %cst_84 : f32 to vector<8x1xf32>
      %194 = arith.divf %192, %193 : vector<8x1xf32>
      %195 = vector.broadcast %194 : vector<8x1xf32> to vector<8x128xf32>
      %196 = arith.subf %184, %195 : vector<8x128xf32>
      %197 = arith.mulf %196, %196 : vector<8x128xf32>
      %cst_85 = arith.constant dense<0.000000e+00> : vector<8xf32>
      %198 = vector.multi_reduction <add>, %197, %cst_85 [1] : vector<8x128xf32> to vector<8xf32>
      %199 = vector.shape_cast %198 : vector<8xf32> to vector<8x1xf32>
      %cst_86 = arith.constant 1.280000e+02 : f32
      %200 = vector.broadcast %cst_86 : f32 to vector<8x1xf32>
      %201 = arith.divf %199, %200 : vector<8x1xf32>
      %202 = vector.broadcast %194 : vector<8x1xf32> to vector<8x128xf32>
      %203 = arith.subf %184, %202 : vector<8x128xf32>
      %cst_87 = arith.constant 9.99999974E-6 : f32
      %204 = vector.broadcast %cst_87 : f32 to vector<8x1xf32>
      %205 = arith.addf %201, %204 : vector<8x1xf32>
      %206 = math.rsqrt %205 : vector<8x1xf32>
      %207 = vector.broadcast %206 : vector<8x1xf32> to vector<8x128xf32>
      %208 = arith.mulf %203, %207 : vector<8x128xf32>
      %209 = vector.broadcast %189 : vector<1x128xf32> to vector<8x128xf32>
      %210 = arith.mulf %208, %209 : vector<8x128xf32>
      %211 = vector.broadcast %190 : vector<1x128xf32> to vector<8x128xf32>
      %212 = arith.addf %210, %211 : vector<8x128xf32>
      %c0_88 = arith.constant 0 : index
      %c0_89 = arith.constant 0 : index
      %c0_90 = arith.constant 0 : index
      %213 = vector.load %arg18[%c0_88, %c0_89, %c0_90] : memref<1x8x128xf32, #tpu.memory_space<vmem>>, vector<1x8x128xf32>
      %214 = vector.shape_cast %213 : vector<1x8x128xf32> to vector<8x128xf32>
      %215 = vector.shape_cast %212 : vector<8x128xf32> to vector<1x8x128xf32>
      tpu.vector_store %arg18[%c0_88, %c0_89, %c0_90], %215 {strides = array<i32>} : memref<1x8x128xf32, #tpu.memory_space<vmem>>, vector<1x8x128xf32>,
    } else {
    }
    return
  }
  func.func @transform_0(%arg0: i32, %arg1: i32) -> (i32, i32, i32) {
    %c0_i32 = arith.constant 0 : i32
    %c0_i32_0 = arith.constant 0 : i32
    %c0_i32_1 = arith.constant 0 : i32
    return %arg0, %c0_i32, %c0_i32_0 : i32, i32, i32
  }
  func.func @transform_1(%arg0: i32, %arg1: i32) -> (i32, i32, i32) {
    %c0_i32 = arith.constant 0 : i32
    %c0_i32_0 = arith.constant 0 : i32
    %c0_i32_1 = arith.constant 0 : i32
    return %arg0, %c0_i32, %c0_i32_0 : i32, i32, i32
  }
  func.func @transform_2(%arg0: i32, %arg1: i32) -> (i32, i32, i32) {
    %c0_i32 = arith.constant 0 : i32
    %c0_i32_0 = arith.constant 0 : i32
    %c0_i32_1 = arith.constant 0 : i32
    return %arg1, %c0_i32, %c0_i32_0 : i32, i32, i32
  }
  func.func @transform_3(%arg0: i32, %arg1: i32) -> (i32, i32, i32) {
    %c0_i32 = arith.constant 0 : i32
    %c0_i32_0 = arith.constant 0 : i32
    %c0_i32_1 = arith.constant 0 : i32
    return %arg1, %c0_i32, %c0_i32_0 : i32, i32, i32
  }
  func.func @transform_4(%arg0: i32, %arg1: i32) -> (i32, i32, i32) {
    %c0_i32 = arith.constant 0 : i32
    %c0_i32_0 = arith.constant 0 : i32
    %c0_i32_1 = arith.constant 0 : i32
    return %arg1, %c0_i32, %c0_i32_0 : i32, i32, i32
  }
  func.func @transform_5(%arg0: i32, %arg1: i32) -> (i32, i32, i32) {
    %c0_i32 = arith.constant 0 : i32
    %c0_i32_0 = arith.constant 0 : i32
    %c0_i32_1 = arith.constant 0 : i32
    return %arg1, %c0_i32, %c0_i32_0 : i32, i32, i32
  }
  func.func @transform_6(%arg0: i32, %arg1: i32) -> (i32, i32, i32) {
    %c0_i32 = arith.constant 0 : i32
    %c0_i32_0 = arith.constant 0 : i32
    %c0_i32_1 = arith.constant 0 : i32
    return %arg1, %c0_i32, %c0_i32_0 : i32, i32, i32
  }
  func.func @transform_7(%arg0: i32, %arg1: i32) -> (i32, i32, i32) {
    %c0_i32 = arith.constant 0 : i32
    %c0_i32_0 = arith.constant 0 : i32
    %c0_i32_1 = arith.constant 0 : i32
    return %arg1, %c0_i32, %c0_i32_0 : i32, i32, i32
  }
  func.func @transform_8(%arg0: i32, %arg1: i32) -> (i32, i32, i32) {
    %c0_i32 = arith.constant 0 : i32
    %c0_i32_0 = arith.constant 0 : i32
    %c0_i32_1 = arith.constant 0 : i32
    return %arg1, %c0_i32, %c0_i32_0 : i32, i32, i32
  }
  func.func @transform_9(%arg0: i32, %arg1: i32) -> (i32, i32, i32) {
    %c0_i32 = arith.constant 0 : i32
    %c0_i32_0 = arith.constant 0 : i32
    %c0_i32_1 = arith.constant 0 : i32
    return %arg1, %c0_i32, %c0_i32_0 : i32, i32, i32
  }
  func.func @transform_10(%arg0: i32, %arg1: i32) -> (i32, i32, i32) {
    %c0_i32 = arith.constant 0 : i32
    %c0_i32_0 = arith.constant 0 : i32
    %c0_i32_1 = arith.constant 0 : i32
    return %arg1, %c0_i32, %c0_i32_0 : i32, i32, i32
  }
  func.func @transform_11(%arg0: i32, %arg1: i32) -> (i32, i32, i32) {
    %c0_i32 = arith.constant 0 : i32
    %c0_i32_0 = arith.constant 0 : i32
    %c0_i32_1 = arith.constant 0 : i32
    return %arg1, %c0_i32, %c0_i32_0 : i32, i32, i32
  }
  func.func @transform_12(%arg0: i32, %arg1: i32) -> (i32, i32, i32) {
    %c0_i32 = arith.constant 0 : i32
    %c0_i32_0 = arith.constant 0 : i32
    %c0_i32_1 = arith.constant 0 : i32
    return %arg1, %c0_i32, %c0_i32_0 : i32, i32, i32
  }
  func.func @transform_13(%arg0: i32, %arg1: i32) -> (i32, i32, i32) {
    %c0_i32 = arith.constant 0 : i32
    %c0_i32_0 = arith.constant 0 : i32
    %c0_i32_1 = arith.constant 0 : i32
    return %arg1, %c0_i32, %c0_i32_0 : i32, i32, i32
  }
  func.func @transform_14(%arg0: i32, %arg1: i32) -> (i32, i32) {
    %c0_i32 = arith.constant 0 : i32
    %c0_i32_0 = arith.constant 0 : i32
    %c0_i32_1 = arith.constant 0 : i32
    return %c0_i32, %c0_i32_0 : i32, i32
  }
  func.func @transform_15(%arg0: i32, %arg1: i32) -> (i32, i32) {
    %c0_i32 = arith.constant 0 : i32
    %c0_i32_0 = arith.constant 0 : i32
    %c0_i32_1 = arith.constant 0 : i32
    return %c0_i32, %c0_i32_0 : i32, i32
  }
  func.func @transform_16(%arg0: i32, %arg1: i32) -> (i32, i32, i32) {
    %c0_i32 = arith.constant 0 : i32
    %c0_i32_0 = arith.constant 0 : i32
    %c0_i32_1 = arith.constant 0 : i32
    return %arg0, %c0_i32, %c0_i32_0 : i32, i32, i32
  }
}

module attributes {stable_mosaic.version = 11 : i64} {
  func.func @_decoder_stack_kernel(%arg0: i32, %arg1: i32, %arg2: memref<1x8x128xf32, #tpu.memory_space<vmem>>, %arg3: memref<1x8x128xf32, #tpu.memory_space<vmem>>, %arg4: memref<1x8x8xf32, #tpu.memory_space<vmem>>, %arg5: memref<1x1x8xf32, #tpu.memory_space<vmem>>, %arg6: memref<1x128x384xbf16, #tpu.memory_space<vmem>>, %arg7: memref<1x1x384xf32, #tpu.memory_space<vmem>>, %arg8: memref<1x128x128xbf16, #tpu.memory_space<vmem>>, %arg9: memref<1x1x128xf32, #tpu.memory_space<vmem>>, %arg10: memref<1x1x128xf32, #tpu.memory_space<vmem>>, %arg11: memref<1x1x128xf32, #tpu.memory_space<vmem>>, %arg12: memref<1x128x128xbf16, #tpu.memory_space<vmem>>, %arg13: memref<1x1x128xf32, #tpu.memory_space<vmem>>, %arg14: memref<1x128x256xbf16, #tpu.memory_space<vmem>>, %arg15: memref<1x1x256xf32, #tpu.memory_space<vmem>>, %arg16: memref<1x128x128xbf16, #tpu.memory_space<vmem>>, %arg17: memref<1x1x128xf32, #tpu.memory_space<vmem>>, %arg18: memref<1x1x128xf32, #tpu.memory_space<vmem>>, %arg19: memref<1x1x128xf32, #tpu.memory_space<vmem>>, %arg20: memref<1x128x256xbf16, #tpu.memory_space<vmem>>, %arg21: memref<1x1x256xf32, #tpu.memory_space<vmem>>, %arg22: memref<1x256x128xbf16, #tpu.memory_space<vmem>>, %arg23: memref<1x1x128xf32, #tpu.memory_space<vmem>>, %arg24: memref<1x1x128xf32, #tpu.memory_space<vmem>>, %arg25: memref<1x1x128xf32, #tpu.memory_space<vmem>>, %arg26: memref<1x128xf32, #tpu.memory_space<vmem>>, %arg27: memref<1x128xf32, #tpu.memory_space<vmem>>, %arg28: memref<128x128xbf16, #tpu.memory_space<vmem>>, %arg29: memref<1x128xf32, #tpu.memory_space<vmem>>, %arg30: memref<1x8x128xf32, #tpu.memory_space<vmem>>, %arg31: memref<8x128xf32, #tpu.memory_space<vmem>>) attributes {dimension_semantics = [#tpu.dimension_semantics<parallel>, #tpu.dimension_semantics<arbitrary>], iteration_bounds = array<i64: 2, 2>, scalar_prefetch = 0 : i64, scratch_operands = 1 : i64, tpu.core_type = #tpu.core_type<tc>, window_params = [{transform_indices = @transform_0, window_bounds = array<i64: 1, 8, 128>}, {transform_indices = @transform_1, window_bounds = array<i64: 1, 8, 128>}, {transform_indices = @transform_2, window_bounds = array<i64: 1, 8, 8>}, {transform_indices = @transform_3, window_bounds = array<i64: 1, 1, 8>}, {transform_indices = @transform_4, window_bounds = array<i64: 1, 128, 384>}, {transform_indices = @transform_5, window_bounds = array<i64: 1, 1, 384>}, {transform_indices = @transform_6, window_bounds = array<i64: 1, 128, 128>}, {transform_indices = @transform_7, window_bounds = array<i64: 1, 1, 128>}, {transform_indices = @transform_8, window_bounds = array<i64: 1, 1, 128>}, {transform_indices = @transform_9, window_bounds = array<i64: 1, 1, 128>}, {transform_indices = @transform_10, window_bounds = array<i64: 1, 128, 128>}, {transform_indices = @transform_11, window_bounds = array<i64: 1, 1, 128>}, {transform_indices = @transform_12, window_bounds = array<i64: 1, 128, 256>}, {transform_indices = @transform_13, window_bounds = array<i64: 1, 1, 256>}, {transform_indices = @transform_14, window_bounds = array<i64: 1, 128, 128>}, {transform_indices = @transform_15, window_bounds = array<i64: 1, 1, 128>}, {transform_indices = @transform_16, window_bounds = array<i64: 1, 1, 128>}, {transform_indices = @transform_17, window_bounds = array<i64: 1, 1, 128>}, {transform_indices = @transform_18, window_bounds = array<i64: 1, 128, 256>}, {transform_indices = @transform_19, window_bounds = array<i64: 1, 1, 256>}, {transform_indices = @transform_20, window_bounds = array<i64: 1, 256, 128>}, {transform_indices = @transform_21, window_bounds = array<i64: 1, 1, 128>}, {transform_indices = @transform_22, window_bounds = array<i64: 1, 1, 128>}, {transform_indices = @transform_23, window_bounds = array<i64: 1, 1, 128>}, {pipeline_mode = #tpu.pipeline_mode<synchronous>, transform_indices = @transform_24, window_bounds = array<i64: 1, 128>}, {pipeline_mode = #tpu.pipeline_mode<synchronous>, transform_indices = @transform_25, window_bounds = array<i64: 1, 128>}, {pipeline_mode = #tpu.pipeline_mode<synchronous>, transform_indices = @transform_26, window_bounds = array<i64: 128, 128>}, {pipeline_mode = #tpu.pipeline_mode<synchronous>, transform_indices = @transform_27, window_bounds = array<i64: 1, 128>}, {transform_indices = @transform_28, window_bounds = array<i64: 1, 8, 128>}]} {
    %c0_i32 = arith.constant 0 : i32
    %0 = arith.cmpi eq, %arg1, %c0_i32 : i32
    %1 = arith.extui %0 : i1 to i32
    %c0_i32_0 = arith.constant 0 : i32
    %2 = arith.cmpi ne, %1, %c0_i32_0 : i32
    scf.if %2 {
      %c0_138 = arith.constant 0 : index
      %c0_139 = arith.constant 0 : index
      %c0_140 = arith.constant 0 : index
      %338 = vector.load %arg2[%c0_138, %c0_139, %c0_140] : memref<1x8x128xf32, #tpu.memory_space<vmem>>, vector<1x8x128xf32>
      %339 = vector.shape_cast %338 : vector<1x8x128xf32> to vector<8x128xf32>
      %c0_141 = arith.constant 0 : index
      %c0_142 = arith.constant 0 : index
      %340 = vector.load %arg31[%c0_141, %c0_142] : memref<8x128xf32, #tpu.memory_space<vmem>>, vector<8x128xf32>
      tpu.vector_store %arg31[%c0_141, %c0_142], %339 {strides = array<i32>} : memref<8x128xf32, #tpu.memory_space<vmem>>, vector<8x128xf32>,
    } else {
    }
    %c0 = arith.constant 0 : index
    %c0_1 = arith.constant 0 : index
    %3 = vector.load %arg31[%c0, %c0_1] : memref<8x128xf32, #tpu.memory_space<vmem>>, vector<8x128xf32>
    %c0_2 = arith.constant 0 : index
    %c0_3 = arith.constant 0 : index
    %c0_4 = arith.constant 0 : index
    %4 = vector.load %arg3[%c0_2, %c0_3, %c0_4] : memref<1x8x128xf32, #tpu.memory_space<vmem>>, vector<1x8x128xf32>
    %5 = vector.shape_cast %4 : vector<1x8x128xf32> to vector<8x128xf32>
    %c0_5 = arith.constant 0 : index
    %c0_6 = arith.constant 0 : index
    %c0_7 = arith.constant 0 : index
    %6 = vector.load %arg6[%c0_5, %c0_6, %c0_7] : memref<1x128x384xbf16, #tpu.memory_space<vmem>>, vector<1x128x384xbf16>
    %7 = vector.shape_cast %6 : vector<1x128x384xbf16> to vector<128x384xbf16>
    %c0_8 = arith.constant 0 : index
    %c0_9 = arith.constant 0 : index
    %c0_10 = arith.constant 0 : index
    %8 = vector.load %arg7[%c0_8, %c0_9, %c0_10] : memref<1x1x384xf32, #tpu.memory_space<vmem>>, vector<1x1x384xf32>
    %9 = vector.shape_cast %8 : vector<1x1x384xf32> to vector<1x384xf32>
    %c0_11 = arith.constant 0 : index
    %c0_12 = arith.constant 0 : index
    %c0_13 = arith.constant 0 : index
    %10 = vector.load %arg8[%c0_11, %c0_12, %c0_13] : memref<1x128x128xbf16, #tpu.memory_space<vmem>>, vector<1x128x128xbf16>
    %11 = vector.shape_cast %10 : vector<1x128x128xbf16> to vector<128x128xbf16>
    %c0_14 = arith.constant 0 : index
    %c0_15 = arith.constant 0 : index
    %c0_16 = arith.constant 0 : index
    %12 = vector.load %arg9[%c0_14, %c0_15, %c0_16] : memref<1x1x128xf32, #tpu.memory_space<vmem>>, vector<1x1x128xf32>
    %13 = vector.shape_cast %12 : vector<1x1x128xf32> to vector<1x128xf32>
    %c0_17 = arith.constant 0 : index
    %c0_18 = arith.constant 0 : index
    %c0_19 = arith.constant 0 : index
    %14 = vector.load %arg4[%c0_17, %c0_18, %c0_19] : memref<1x8x8xf32, #tpu.memory_space<vmem>>, vector<1x8x8xf32>
    %15 = vector.shape_cast %14 : vector<1x8x8xf32> to vector<8x8xf32>
    %16 = arith.truncf %3 : vector<8x128xf32> to vector<8x128xbf16>
    %cst = arith.constant dense<0.000000e+00> : vector<8x384xf32>
    %17 = tpu.matmul %16, %7, %cst {dimension_numbers = #tpu.dot_dimension_numbers<[1], [0], [0], [1], [0, 0, 1, 1], [], []>} : vector<8x128xbf16>, vector<128x384xbf16>, vector<8x384xf32> -> vector<8x384xf32>
    %18 = vector.broadcast %9 : vector<1x384xf32> to vector<8x384xf32>
    %19 = arith.addf %17, %18 : vector<8x384xf32>
    %20 = vector.extract_strided_slice %19 {offsets = [0, 0], sizes = [8, 128], strides = [1, 1]} : vector<8x384xf32> to vector<8x128xf32>
    %cst_20 = arith.constant 0.176776692 : f32
    %21 = vector.broadcast %cst_20 : f32 to vector<8x128xf32>
    %22 = arith.mulf %20, %21 : vector<8x128xf32>
    %23 = arith.truncf %22 : vector<8x128xf32> to vector<8x128xbf16>
    %24 = vector.extract_strided_slice %19 {offsets = [0, 128], sizes = [8, 128], strides = [1, 1]} : vector<8x384xf32> to vector<8x128xf32>
    %25 = arith.truncf %24 : vector<8x128xf32> to vector<8x128xbf16>
    %26 = vector.extract_strided_slice %19 {offsets = [0, 256], sizes = [8, 128], strides = [1, 1]} : vector<8x384xf32> to vector<8x128xf32>
    %27 = arith.truncf %26 : vector<8x128xf32> to vector<8x128xbf16>
    %cst_21 = arith.constant 0.000000e+00 : f32
    %28 = vector.broadcast %cst_21 : f32 to vector<8x128xf32>
    %29 = vector.extract_strided_slice %23 {offsets = [0, 0], sizes = [8, 32], strides = [1, 1]} : vector<8x128xbf16> to vector<8x32xbf16>
    %30 = vector.extract_strided_slice %25 {offsets = [0, 0], sizes = [8, 32], strides = [1, 1]} : vector<8x128xbf16> to vector<8x32xbf16>
    %cst_22 = arith.constant dense<0.000000e+00> : vector<8x8xf32>
    %31 = tpu.matmul %29, %30, %cst_22 {dimension_numbers = #tpu.dot_dimension_numbers<[1], [1], [0], [0], [0, 0, 1, 0], [], []>} : vector<8x32xbf16>, vector<8x32xbf16>, vector<8x8xf32> -> vector<8x8xf32>
    %32 = arith.addf %31, %15 : vector<8x8xf32>
    %cst_23 = arith.constant dense<0xFF800000> : vector<8xf32>
    %33 = vector.multi_reduction <maximumf>, %32, %cst_23 [1] : vector<8x8xf32> to vector<8xf32>
    %34 = vector.shape_cast %33 : vector<8xf32> to vector<8x1xf32>
    %35 = vector.broadcast %34 : vector<8x1xf32> to vector<8x8xf32>
    %36 = arith.subf %32, %35 : vector<8x8xf32>
    %37 = math.exp %36 : vector<8x8xf32>
    %cst_24 = arith.constant dense<0.000000e+00> : vector<8xf32>
    %38 = vector.multi_reduction <add>, %37, %cst_24 [1] : vector<8x8xf32> to vector<8xf32>
    %39 = vector.shape_cast %38 : vector<8xf32> to vector<8x1xf32>
    %40 = tpu.reciprocal %39 {approx = true} : vector<8x1xf32> -> vector<8x1xf32>
    %41 = vector.broadcast %40 : vector<8x1xf32> to vector<8x8xf32>
    %42 = arith.mulf %37, %41 : vector<8x8xf32>
    %43 = arith.truncf %42 : vector<8x8xf32> to vector<8x8xbf16>
    %44 = vector.extract_strided_slice %27 {offsets = [0, 0], sizes = [8, 32], strides = [1, 1]} : vector<8x128xbf16> to vector<8x32xbf16>
    %cst_25 = arith.constant dense<0.000000e+00> : vector<8x32xf32>
    %45 = tpu.matmul %43, %44, %cst_25 {dimension_numbers = #tpu.dot_dimension_numbers<[1], [0], [0], [1], [0, 0, 1, 1], [], []>} : vector<8x8xbf16>, vector<8x32xbf16>, vector<8x32xf32> -> vector<8x32xf32>
    %46 = arith.truncf %45 : vector<8x32xf32> to vector<8x32xbf16>
    %47 = vector.extract_strided_slice %11 {offsets = [0, 0], sizes = [32, 128], strides = [1, 1]} : vector<128x128xbf16> to vector<32x128xbf16>
    %cst_26 = arith.constant dense<0.000000e+00> : vector<8x128xf32>
    %48 = tpu.matmul %46, %47, %cst_26 {dimension_numbers = #tpu.dot_dimension_numbers<[1], [0], [0], [1], [0, 0, 1, 1], [], []>} : vector<8x32xbf16>, vector<32x128xbf16>, vector<8x128xf32> -> vector<8x128xf32>
    %49 = arith.addf %28, %48 : vector<8x128xf32>
    %50 = vector.extract_strided_slice %23 {offsets = [0, 32], sizes = [8, 32], strides = [1, 1]} : vector<8x128xbf16> to vector<8x32xbf16>
    %51 = vector.extract_strided_slice %25 {offsets = [0, 32], sizes = [8, 32], strides = [1, 1]} : vector<8x128xbf16> to vector<8x32xbf16>
    %cst_27 = arith.constant dense<0.000000e+00> : vector<8x8xf32>
    %52 = tpu.matmul %50, %51, %cst_27 {dimension_numbers = #tpu.dot_dimension_numbers<[1], [1], [0], [0], [0, 0, 1, 0], [], []>} : vector<8x32xbf16>, vector<8x32xbf16>, vector<8x8xf32> -> vector<8x8xf32>
    %53 = arith.addf %52, %15 : vector<8x8xf32>
    %cst_28 = arith.constant dense<0xFF800000> : vector<8xf32>
    %54 = vector.multi_reduction <maximumf>, %53, %cst_28 [1] : vector<8x8xf32> to vector<8xf32>
    %55 = vector.shape_cast %54 : vector<8xf32> to vector<8x1xf32>
    %56 = vector.broadcast %55 : vector<8x1xf32> to vector<8x8xf32>
    %57 = arith.subf %53, %56 : vector<8x8xf32>
    %58 = math.exp %57 : vector<8x8xf32>
    %cst_29 = arith.constant dense<0.000000e+00> : vector<8xf32>
    %59 = vector.multi_reduction <add>, %58, %cst_29 [1] : vector<8x8xf32> to vector<8xf32>
    %60 = vector.shape_cast %59 : vector<8xf32> to vector<8x1xf32>
    %61 = tpu.reciprocal %60 {approx = true} : vector<8x1xf32> -> vector<8x1xf32>
    %62 = vector.broadcast %61 : vector<8x1xf32> to vector<8x8xf32>
    %63 = arith.mulf %58, %62 : vector<8x8xf32>
    %64 = arith.truncf %63 : vector<8x8xf32> to vector<8x8xbf16>
    %65 = vector.extract_strided_slice %27 {offsets = [0, 32], sizes = [8, 32], strides = [1, 1]} : vector<8x128xbf16> to vector<8x32xbf16>
    %cst_30 = arith.constant dense<0.000000e+00> : vector<8x32xf32>
    %66 = tpu.matmul %64, %65, %cst_30 {dimension_numbers = #tpu.dot_dimension_numbers<[1], [0], [0], [1], [0, 0, 1, 1], [], []>} : vector<8x8xbf16>, vector<8x32xbf16>, vector<8x32xf32> -> vector<8x32xf32>
    %67 = arith.truncf %66 : vector<8x32xf32> to vector<8x32xbf16>
    %68 = vector.extract_strided_slice %11 {offsets = [32, 0], sizes = [32, 128], strides = [1, 1]} : vector<128x128xbf16> to vector<32x128xbf16>
    %cst_31 = arith.constant dense<0.000000e+00> : vector<8x128xf32>
    %69 = tpu.matmul %67, %68, %cst_31 {dimension_numbers = #tpu.dot_dimension_numbers<[1], [0], [0], [1], [0, 0, 1, 1], [], []>} : vector<8x32xbf16>, vector<32x128xbf16>, vector<8x128xf32> -> vector<8x128xf32>
    %70 = arith.addf %49, %69 : vector<8x128xf32>
    %71 = vector.extract_strided_slice %23 {offsets = [0, 64], sizes = [8, 32], strides = [1, 1]} : vector<8x128xbf16> to vector<8x32xbf16>
    %72 = vector.extract_strided_slice %25 {offsets = [0, 64], sizes = [8, 32], strides = [1, 1]} : vector<8x128xbf16> to vector<8x32xbf16>
    %cst_32 = arith.constant dense<0.000000e+00> : vector<8x8xf32>
    %73 = tpu.matmul %71, %72, %cst_32 {dimension_numbers = #tpu.dot_dimension_numbers<[1], [1], [0], [0], [0, 0, 1, 0], [], []>} : vector<8x32xbf16>, vector<8x32xbf16>, vector<8x8xf32> -> vector<8x8xf32>
    %74 = arith.addf %73, %15 : vector<8x8xf32>
    %cst_33 = arith.constant dense<0xFF800000> : vector<8xf32>
    %75 = vector.multi_reduction <maximumf>, %74, %cst_33 [1] : vector<8x8xf32> to vector<8xf32>
    %76 = vector.shape_cast %75 : vector<8xf32> to vector<8x1xf32>
    %77 = vector.broadcast %76 : vector<8x1xf32> to vector<8x8xf32>
    %78 = arith.subf %74, %77 : vector<8x8xf32>
    %79 = math.exp %78 : vector<8x8xf32>
    %cst_34 = arith.constant dense<0.000000e+00> : vector<8xf32>
    %80 = vector.multi_reduction <add>, %79, %cst_34 [1] : vector<8x8xf32> to vector<8xf32>
    %81 = vector.shape_cast %80 : vector<8xf32> to vector<8x1xf32>
    %82 = tpu.reciprocal %81 {approx = true} : vector<8x1xf32> -> vector<8x1xf32>
    %83 = vector.broadcast %82 : vector<8x1xf32> to vector<8x8xf32>
    %84 = arith.mulf %79, %83 : vector<8x8xf32>
    %85 = arith.truncf %84 : vector<8x8xf32> to vector<8x8xbf16>
    %86 = vector.extract_strided_slice %27 {offsets = [0, 64], sizes = [8, 32], strides = [1, 1]} : vector<8x128xbf16> to vector<8x32xbf16>
    %cst_35 = arith.constant dense<0.000000e+00> : vector<8x32xf32>
    %87 = tpu.matmul %85, %86, %cst_35 {dimension_numbers = #tpu.dot_dimension_numbers<[1], [0], [0], [1], [0, 0, 1, 1], [], []>} : vector<8x8xbf16>, vector<8x32xbf16>, vector<8x32xf32> -> vector<8x32xf32>
    %88 = arith.truncf %87 : vector<8x32xf32> to vector<8x32xbf16>
    %89 = vector.extract_strided_slice %11 {offsets = [64, 0], sizes = [32, 128], strides = [1, 1]} : vector<128x128xbf16> to vector<32x128xbf16>
    %cst_36 = arith.constant dense<0.000000e+00> : vector<8x128xf32>
    %90 = tpu.matmul %88, %89, %cst_36 {dimension_numbers = #tpu.dot_dimension_numbers<[1], [0], [0], [1], [0, 0, 1, 1], [], []>} : vector<8x32xbf16>, vector<32x128xbf16>, vector<8x128xf32> -> vector<8x128xf32>
    %91 = arith.addf %70, %90 : vector<8x128xf32>
    %92 = vector.extract_strided_slice %23 {offsets = [0, 96], sizes = [8, 32], strides = [1, 1]} : vector<8x128xbf16> to vector<8x32xbf16>
    %93 = vector.extract_strided_slice %25 {offsets = [0, 96], sizes = [8, 32], strides = [1, 1]} : vector<8x128xbf16> to vector<8x32xbf16>
    %cst_37 = arith.constant dense<0.000000e+00> : vector<8x8xf32>
    %94 = tpu.matmul %92, %93, %cst_37 {dimension_numbers = #tpu.dot_dimension_numbers<[1], [1], [0], [0], [0, 0, 1, 0], [], []>} : vector<8x32xbf16>, vector<8x32xbf16>, vector<8x8xf32> -> vector<8x8xf32>
    %95 = arith.addf %94, %15 : vector<8x8xf32>
    %cst_38 = arith.constant dense<0xFF800000> : vector<8xf32>
    %96 = vector.multi_reduction <maximumf>, %95, %cst_38 [1] : vector<8x8xf32> to vector<8xf32>
    %97 = vector.shape_cast %96 : vector<8xf32> to vector<8x1xf32>
    %98 = vector.broadcast %97 : vector<8x1xf32> to vector<8x8xf32>
    %99 = arith.subf %95, %98 : vector<8x8xf32>
    %100 = math.exp %99 : vector<8x8xf32>
    %cst_39 = arith.constant dense<0.000000e+00> : vector<8xf32>
    %101 = vector.multi_reduction <add>, %100, %cst_39 [1] : vector<8x8xf32> to vector<8xf32>
    %102 = vector.shape_cast %101 : vector<8xf32> to vector<8x1xf32>
    %103 = tpu.reciprocal %102 {approx = true} : vector<8x1xf32> -> vector<8x1xf32>
    %104 = vector.broadcast %103 : vector<8x1xf32> to vector<8x8xf32>
    %105 = arith.mulf %100, %104 : vector<8x8xf32>
    %106 = arith.truncf %105 : vector<8x8xf32> to vector<8x8xbf16>
    %107 = vector.extract_strided_slice %27 {offsets = [0, 96], sizes = [8, 32], strides = [1, 1]} : vector<8x128xbf16> to vector<8x32xbf16>
    %cst_40 = arith.constant dense<0.000000e+00> : vector<8x32xf32>
    %108 = tpu.matmul %106, %107, %cst_40 {dimension_numbers = #tpu.dot_dimension_numbers<[1], [0], [0], [1], [0, 0, 1, 1], [], []>} : vector<8x8xbf16>, vector<8x32xbf16>, vector<8x32xf32> -> vector<8x32xf32>
    %109 = arith.truncf %108 : vector<8x32xf32> to vector<8x32xbf16>
    %110 = vector.extract_strided_slice %11 {offsets = [96, 0], sizes = [32, 128], strides = [1, 1]} : vector<128x128xbf16> to vector<32x128xbf16>
    %cst_41 = arith.constant dense<0.000000e+00> : vector<8x128xf32>
    %111 = tpu.matmul %109, %110, %cst_41 {dimension_numbers = #tpu.dot_dimension_numbers<[1], [0], [0], [1], [0, 0, 1, 1], [], []>} : vector<8x32xbf16>, vector<32x128xbf16>, vector<8x128xf32> -> vector<8x128xf32>
    %112 = arith.addf %91, %111 : vector<8x128xf32>
    %113 = vector.broadcast %13 : vector<1x128xf32> to vector<8x128xf32>
    %114 = arith.addf %112, %113 : vector<8x128xf32>
    %115 = arith.addf %3, %114 : vector<8x128xf32>
    %c0_42 = arith.constant 0 : index
    %c0_43 = arith.constant 0 : index
    %c0_44 = arith.constant 0 : index
    %116 = vector.load %arg10[%c0_42, %c0_43, %c0_44] : memref<1x1x128xf32, #tpu.memory_space<vmem>>, vector<1x1x128xf32>
    %117 = vector.shape_cast %116 : vector<1x1x128xf32> to vector<1x128xf32>
    %c0_45 = arith.constant 0 : index
    %c0_46 = arith.constant 0 : index
    %c0_47 = arith.constant 0 : index
    %118 = vector.load %arg11[%c0_45, %c0_46, %c0_47] : memref<1x1x128xf32, #tpu.memory_space<vmem>>, vector<1x1x128xf32>
    %119 = vector.shape_cast %118 : vector<1x1x128xf32> to vector<1x128xf32>
    %cst_48 = arith.constant dense<0.000000e+00> : vector<8xf32>
    %120 = vector.multi_reduction <add>, %115, %cst_48 [1] : vector<8x128xf32> to vector<8xf32>
    %121 = vector.shape_cast %120 : vector<8xf32> to vector<8x1xf32>
    %cst_49 = arith.constant 1.280000e+02 : f32
    %122 = vector.broadcast %cst_49 : f32 to vector<8x1xf32>
    %123 = arith.divf %121, %122 : vector<8x1xf32>
    %124 = vector.broadcast %123 : vector<8x1xf32> to vector<8x128xf32>
    %125 = arith.subf %115, %124 : vector<8x128xf32>
    %126 = arith.mulf %125, %125 : vector<8x128xf32>
    %cst_50 = arith.constant dense<0.000000e+00> : vector<8xf32>
    %127 = vector.multi_reduction <add>, %126, %cst_50 [1] : vector<8x128xf32> to vector<8xf32>
    %128 = vector.shape_cast %127 : vector<8xf32> to vector<8x1xf32>
    %cst_51 = arith.constant 1.280000e+02 : f32
    %129 = vector.broadcast %cst_51 : f32 to vector<8x1xf32>
    %130 = arith.divf %128, %129 : vector<8x1xf32>
    %131 = vector.broadcast %123 : vector<8x1xf32> to vector<8x128xf32>
    %132 = arith.subf %115, %131 : vector<8x128xf32>
    %cst_52 = arith.constant 9.99999974E-6 : f32
    %133 = vector.broadcast %cst_52 : f32 to vector<8x1xf32>
    %134 = arith.addf %130, %133 : vector<8x1xf32>
    %135 = math.rsqrt %134 : vector<8x1xf32>
    %136 = vector.broadcast %135 : vector<8x1xf32> to vector<8x128xf32>
    %137 = arith.mulf %132, %136 : vector<8x128xf32>
    %138 = vector.broadcast %117 : vector<1x128xf32> to vector<8x128xf32>
    %139 = arith.mulf %137, %138 : vector<8x128xf32>
    %140 = vector.broadcast %119 : vector<1x128xf32> to vector<8x128xf32>
    %141 = arith.addf %139, %140 : vector<8x128xf32>
    %c0_53 = arith.constant 0 : index
    %c0_54 = arith.constant 0 : index
    %c0_55 = arith.constant 0 : index
    %142 = vector.load %arg12[%c0_53, %c0_54, %c0_55] : memref<1x128x128xbf16, #tpu.memory_space<vmem>>, vector<1x128x128xbf16>
    %143 = vector.shape_cast %142 : vector<1x128x128xbf16> to vector<128x128xbf16>
    %c0_56 = arith.constant 0 : index
    %c0_57 = arith.constant 0 : index
    %c0_58 = arith.constant 0 : index
    %144 = vector.load %arg13[%c0_56, %c0_57, %c0_58] : memref<1x1x128xf32, #tpu.memory_space<vmem>>, vector<1x1x128xf32>
    %145 = vector.shape_cast %144 : vector<1x1x128xf32> to vector<1x128xf32>
    %c0_59 = arith.constant 0 : index
    %c0_60 = arith.constant 0 : index
    %c0_61 = arith.constant 0 : index
    %146 = vector.load %arg14[%c0_59, %c0_60, %c0_61] : memref<1x128x256xbf16, #tpu.memory_space<vmem>>, vector<1x128x256xbf16>
    %147 = vector.shape_cast %146 : vector<1x128x256xbf16> to vector<128x256xbf16>
    %c0_62 = arith.constant 0 : index
    %c0_63 = arith.constant 0 : index
    %c0_64 = arith.constant 0 : index
    %148 = vector.load %arg15[%c0_62, %c0_63, %c0_64] : memref<1x1x256xf32, #tpu.memory_space<vmem>>, vector<1x1x256xf32>
    %149 = vector.shape_cast %148 : vector<1x1x256xf32> to vector<1x256xf32>
    %c0_65 = arith.constant 0 : index
    %c0_66 = arith.constant 0 : index
    %c0_67 = arith.constant 0 : index
    %150 = vector.load %arg16[%c0_65, %c0_66, %c0_67] : memref<1x128x128xbf16, #tpu.memory_space<vmem>>, vector<1x128x128xbf16>
    %151 = vector.shape_cast %150 : vector<1x128x128xbf16> to vector<128x128xbf16>
    %c0_68 = arith.constant 0 : index
    %c0_69 = arith.constant 0 : index
    %c0_70 = arith.constant 0 : index
    %152 = vector.load %arg17[%c0_68, %c0_69, %c0_70] : memref<1x1x128xf32, #tpu.memory_space<vmem>>, vector<1x1x128xf32>
    %153 = vector.shape_cast %152 : vector<1x1x128xf32> to vector<1x128xf32>
    %c0_71 = arith.constant 0 : index
    %c0_72 = arith.constant 0 : index
    %c0_73 = arith.constant 0 : index
    %154 = vector.load %arg5[%c0_71, %c0_72, %c0_73] : memref<1x1x8xf32, #tpu.memory_space<vmem>>, vector<1x1x8xf32>
    %155 = vector.shape_cast %154 : vector<1x1x8xf32> to vector<1x8xf32>
    %156 = arith.truncf %141 : vector<8x128xf32> to vector<8x128xbf16>
    %cst_74 = arith.constant dense<0.000000e+00> : vector<8x128xf32>
    %157 = tpu.matmul %156, %143, %cst_74 {dimension_numbers = #tpu.dot_dimension_numbers<[1], [0], [0], [1], [0, 0, 1, 1], [], []>} : vector<8x128xbf16>, vector<128x128xbf16>, vector<8x128xf32> -> vector<8x128xf32>
    %158 = vector.broadcast %145 : vector<1x128xf32> to vector<8x128xf32>
    %159 = arith.addf %157, %158 : vector<8x128xf32>
    %cst_75 = arith.constant 0.176776692 : f32
    %160 = vector.broadcast %cst_75 : f32 to vector<8x128xf32>
    %161 = arith.mulf %159, %160 : vector<8x128xf32>
    %162 = arith.truncf %161 : vector<8x128xf32> to vector<8x128xbf16>
    %163 = arith.truncf %5 : vector<8x128xf32> to vector<8x128xbf16>
    %cst_76 = arith.constant dense<0.000000e+00> : vector<8x256xf32>
    %164 = tpu.matmul %163, %147, %cst_76 {dimension_numbers = #tpu.dot_dimension_numbers<[1], [0], [0], [1], [0, 0, 1, 1], [], []>} : vector<8x128xbf16>, vector<128x256xbf16>, vector<8x256xf32> -> vector<8x256xf32>
    %165 = vector.broadcast %149 : vector<1x256xf32> to vector<8x256xf32>
    %166 = arith.addf %164, %165 : vector<8x256xf32>
    %167 = vector.extract_strided_slice %166 {offsets = [0, 0], sizes = [8, 128], strides = [1, 1]} : vector<8x256xf32> to vector<8x128xf32>
    %168 = arith.truncf %167 : vector<8x128xf32> to vector<8x128xbf16>
    %169 = vector.extract_strided_slice %166 {offsets = [0, 128], sizes = [8, 128], strides = [1, 1]} : vector<8x256xf32> to vector<8x128xf32>
    %170 = arith.truncf %169 : vector<8x128xf32> to vector<8x128xbf16>
    %cst_77 = arith.constant 0.000000e+00 : f32
    %171 = vector.broadcast %cst_77 : f32 to vector<8x128xf32>
    %172 = vector.extract_strided_slice %162 {offsets = [0, 0], sizes = [8, 32], strides = [1, 1]} : vector<8x128xbf16> to vector<8x32xbf16>
    %173 = vector.extract_strided_slice %168 {offsets = [0, 0], sizes = [8, 32], strides = [1, 1]} : vector<8x128xbf16> to vector<8x32xbf16>
    %cst_78 = arith.constant dense<0.000000e+00> : vector<8x8xf32>
    %174 = tpu.matmul %172, %173, %cst_78 {dimension_numbers = #tpu.dot_dimension_numbers<[1], [1], [0], [0], [0, 0, 1, 0], [], []>} : vector<8x32xbf16>, vector<8x32xbf16>, vector<8x8xf32> -> vector<8x8xf32>
    %175 = vector.broadcast %155 : vector<1x8xf32> to vector<8x8xf32>
    %176 = arith.addf %174, %175 : vector<8x8xf32>
    %cst_79 = arith.constant dense<0xFF800000> : vector<8xf32>
    %177 = vector.multi_reduction <maximumf>, %176, %cst_79 [1] : vector<8x8xf32> to vector<8xf32>
    %178 = vector.shape_cast %177 : vector<8xf32> to vector<8x1xf32>
    %179 = vector.broadcast %178 : vector<8x1xf32> to vector<8x8xf32>
    %180 = arith.subf %176, %179 : vector<8x8xf32>
    %181 = math.exp %180 : vector<8x8xf32>
    %cst_80 = arith.constant dense<0.000000e+00> : vector<8xf32>
    %182 = vector.multi_reduction <add>, %181, %cst_80 [1] : vector<8x8xf32> to vector<8xf32>
    %183 = vector.shape_cast %182 : vector<8xf32> to vector<8x1xf32>
    %184 = tpu.reciprocal %183 {approx = true} : vector<8x1xf32> -> vector<8x1xf32>
    %185 = vector.broadcast %184 : vector<8x1xf32> to vector<8x8xf32>
    %186 = arith.mulf %181, %185 : vector<8x8xf32>
    %187 = arith.truncf %186 : vector<8x8xf32> to vector<8x8xbf16>
    %188 = vector.extract_strided_slice %170 {offsets = [0, 0], sizes = [8, 32], strides = [1, 1]} : vector<8x128xbf16> to vector<8x32xbf16>
    %cst_81 = arith.constant dense<0.000000e+00> : vector<8x32xf32>
    %189 = tpu.matmul %187, %188, %cst_81 {dimension_numbers = #tpu.dot_dimension_numbers<[1], [0], [0], [1], [0, 0, 1, 1], [], []>} : vector<8x8xbf16>, vector<8x32xbf16>, vector<8x32xf32> -> vector<8x32xf32>
    %190 = arith.truncf %189 : vector<8x32xf32> to vector<8x32xbf16>
    %191 = vector.extract_strided_slice %151 {offsets = [0, 0], sizes = [32, 128], strides = [1, 1]} : vector<128x128xbf16> to vector<32x128xbf16>
    %cst_82 = arith.constant dense<0.000000e+00> : vector<8x128xf32>
    %192 = tpu.matmul %190, %191, %cst_82 {dimension_numbers = #tpu.dot_dimension_numbers<[1], [0], [0], [1], [0, 0, 1, 1], [], []>} : vector<8x32xbf16>, vector<32x128xbf16>, vector<8x128xf32> -> vector<8x128xf32>
    %193 = arith.addf %171, %192 : vector<8x128xf32>
    %194 = vector.extract_strided_slice %162 {offsets = [0, 32], sizes = [8, 32], strides = [1, 1]} : vector<8x128xbf16> to vector<8x32xbf16>
    %195 = vector.extract_strided_slice %168 {offsets = [0, 32], sizes = [8, 32], strides = [1, 1]} : vector<8x128xbf16> to vector<8x32xbf16>
    %cst_83 = arith.constant dense<0.000000e+00> : vector<8x8xf32>
    %196 = tpu.matmul %194, %195, %cst_83 {dimension_numbers = #tpu.dot_dimension_numbers<[1], [1], [0], [0], [0, 0, 1, 0], [], []>} : vector<8x32xbf16>, vector<8x32xbf16>, vector<8x8xf32> -> vector<8x8xf32>
    %197 = vector.broadcast %155 : vector<1x8xf32> to vector<8x8xf32>
    %198 = arith.addf %196, %197 : vector<8x8xf32>
    %cst_84 = arith.constant dense<0xFF800000> : vector<8xf32>
    %199 = vector.multi_reduction <maximumf>, %198, %cst_84 [1] : vector<8x8xf32> to vector<8xf32>
    %200 = vector.shape_cast %199 : vector<8xf32> to vector<8x1xf32>
    %201 = vector.broadcast %200 : vector<8x1xf32> to vector<8x8xf32>
    %202 = arith.subf %198, %201 : vector<8x8xf32>
    %203 = math.exp %202 : vector<8x8xf32>
    %cst_85 = arith.constant dense<0.000000e+00> : vector<8xf32>
    %204 = vector.multi_reduction <add>, %203, %cst_85 [1] : vector<8x8xf32> to vector<8xf32>
    %205 = vector.shape_cast %204 : vector<8xf32> to vector<8x1xf32>
    %206 = tpu.reciprocal %205 {approx = true} : vector<8x1xf32> -> vector<8x1xf32>
    %207 = vector.broadcast %206 : vector<8x1xf32> to vector<8x8xf32>
    %208 = arith.mulf %203, %207 : vector<8x8xf32>
    %209 = arith.truncf %208 : vector<8x8xf32> to vector<8x8xbf16>
    %210 = vector.extract_strided_slice %170 {offsets = [0, 32], sizes = [8, 32], strides = [1, 1]} : vector<8x128xbf16> to vector<8x32xbf16>
    %cst_86 = arith.constant dense<0.000000e+00> : vector<8x32xf32>
    %211 = tpu.matmul %209, %210, %cst_86 {dimension_numbers = #tpu.dot_dimension_numbers<[1], [0], [0], [1], [0, 0, 1, 1], [], []>} : vector<8x8xbf16>, vector<8x32xbf16>, vector<8x32xf32> -> vector<8x32xf32>
    %212 = arith.truncf %211 : vector<8x32xf32> to vector<8x32xbf16>
    %213 = vector.extract_strided_slice %151 {offsets = [32, 0], sizes = [32, 128], strides = [1, 1]} : vector<128x128xbf16> to vector<32x128xbf16>
    %cst_87 = arith.constant dense<0.000000e+00> : vector<8x128xf32>
    %214 = tpu.matmul %212, %213, %cst_87 {dimension_numbers = #tpu.dot_dimension_numbers<[1], [0], [0], [1], [0, 0, 1, 1], [], []>} : vector<8x32xbf16>, vector<32x128xbf16>, vector<8x128xf32> -> vector<8x128xf32>
    %215 = arith.addf %193, %214 : vector<8x128xf32>
    %216 = vector.extract_strided_slice %162 {offsets = [0, 64], sizes = [8, 32], strides = [1, 1]} : vector<8x128xbf16> to vector<8x32xbf16>
    %217 = vector.extract_strided_slice %168 {offsets = [0, 64], sizes = [8, 32], strides = [1, 1]} : vector<8x128xbf16> to vector<8x32xbf16>
    %cst_88 = arith.constant dense<0.000000e+00> : vector<8x8xf32>
    %218 = tpu.matmul %216, %217, %cst_88 {dimension_numbers = #tpu.dot_dimension_numbers<[1], [1], [0], [0], [0, 0, 1, 0], [], []>} : vector<8x32xbf16>, vector<8x32xbf16>, vector<8x8xf32> -> vector<8x8xf32>
    %219 = vector.broadcast %155 : vector<1x8xf32> to vector<8x8xf32>
    %220 = arith.addf %218, %219 : vector<8x8xf32>
    %cst_89 = arith.constant dense<0xFF800000> : vector<8xf32>
    %221 = vector.multi_reduction <maximumf>, %220, %cst_89 [1] : vector<8x8xf32> to vector<8xf32>
    %222 = vector.shape_cast %221 : vector<8xf32> to vector<8x1xf32>
    %223 = vector.broadcast %222 : vector<8x1xf32> to vector<8x8xf32>
    %224 = arith.subf %220, %223 : vector<8x8xf32>
    %225 = math.exp %224 : vector<8x8xf32>
    %cst_90 = arith.constant dense<0.000000e+00> : vector<8xf32>
    %226 = vector.multi_reduction <add>, %225, %cst_90 [1] : vector<8x8xf32> to vector<8xf32>
    %227 = vector.shape_cast %226 : vector<8xf32> to vector<8x1xf32>
    %228 = tpu.reciprocal %227 {approx = true} : vector<8x1xf32> -> vector<8x1xf32>
    %229 = vector.broadcast %228 : vector<8x1xf32> to vector<8x8xf32>
    %230 = arith.mulf %225, %229 : vector<8x8xf32>
    %231 = arith.truncf %230 : vector<8x8xf32> to vector<8x8xbf16>
    %232 = vector.extract_strided_slice %170 {offsets = [0, 64], sizes = [8, 32], strides = [1, 1]} : vector<8x128xbf16> to vector<8x32xbf16>
    %cst_91 = arith.constant dense<0.000000e+00> : vector<8x32xf32>
    %233 = tpu.matmul %231, %232, %cst_91 {dimension_numbers = #tpu.dot_dimension_numbers<[1], [0], [0], [1], [0, 0, 1, 1], [], []>} : vector<8x8xbf16>, vector<8x32xbf16>, vector<8x32xf32> -> vector<8x32xf32>
    %234 = arith.truncf %233 : vector<8x32xf32> to vector<8x32xbf16>
    %235 = vector.extract_strided_slice %151 {offsets = [64, 0], sizes = [32, 128], strides = [1, 1]} : vector<128x128xbf16> to vector<32x128xbf16>
    %cst_92 = arith.constant dense<0.000000e+00> : vector<8x128xf32>
    %236 = tpu.matmul %234, %235, %cst_92 {dimension_numbers = #tpu.dot_dimension_numbers<[1], [0], [0], [1], [0, 0, 1, 1], [], []>} : vector<8x32xbf16>, vector<32x128xbf16>, vector<8x128xf32> -> vector<8x128xf32>
    %237 = arith.addf %215, %236 : vector<8x128xf32>
    %238 = vector.extract_strided_slice %162 {offsets = [0, 96], sizes = [8, 32], strides = [1, 1]} : vector<8x128xbf16> to vector<8x32xbf16>
    %239 = vector.extract_strided_slice %168 {offsets = [0, 96], sizes = [8, 32], strides = [1, 1]} : vector<8x128xbf16> to vector<8x32xbf16>
    %cst_93 = arith.constant dense<0.000000e+00> : vector<8x8xf32>
    %240 = tpu.matmul %238, %239, %cst_93 {dimension_numbers = #tpu.dot_dimension_numbers<[1], [1], [0], [0], [0, 0, 1, 0], [], []>} : vector<8x32xbf16>, vector<8x32xbf16>, vector<8x8xf32> -> vector<8x8xf32>
    %241 = vector.broadcast %155 : vector<1x8xf32> to vector<8x8xf32>
    %242 = arith.addf %240, %241 : vector<8x8xf32>
    %cst_94 = arith.constant dense<0xFF800000> : vector<8xf32>
    %243 = vector.multi_reduction <maximumf>, %242, %cst_94 [1] : vector<8x8xf32> to vector<8xf32>
    %244 = vector.shape_cast %243 : vector<8xf32> to vector<8x1xf32>
    %245 = vector.broadcast %244 : vector<8x1xf32> to vector<8x8xf32>
    %246 = arith.subf %242, %245 : vector<8x8xf32>
    %247 = math.exp %246 : vector<8x8xf32>
    %cst_95 = arith.constant dense<0.000000e+00> : vector<8xf32>
    %248 = vector.multi_reduction <add>, %247, %cst_95 [1] : vector<8x8xf32> to vector<8xf32>
    %249 = vector.shape_cast %248 : vector<8xf32> to vector<8x1xf32>
    %250 = tpu.reciprocal %249 {approx = true} : vector<8x1xf32> -> vector<8x1xf32>
    %251 = vector.broadcast %250 : vector<8x1xf32> to vector<8x8xf32>
    %252 = arith.mulf %247, %251 : vector<8x8xf32>
    %253 = arith.truncf %252 : vector<8x8xf32> to vector<8x8xbf16>
    %254 = vector.extract_strided_slice %170 {offsets = [0, 96], sizes = [8, 32], strides = [1, 1]} : vector<8x128xbf16> to vector<8x32xbf16>
    %cst_96 = arith.constant dense<0.000000e+00> : vector<8x32xf32>
    %255 = tpu.matmul %253, %254, %cst_96 {dimension_numbers = #tpu.dot_dimension_numbers<[1], [0], [0], [1], [0, 0, 1, 1], [], []>} : vector<8x8xbf16>, vector<8x32xbf16>, vector<8x32xf32> -> vector<8x32xf32>
    %256 = arith.truncf %255 : vector<8x32xf32> to vector<8x32xbf16>
    %257 = vector.extract_strided_slice %151 {offsets = [96, 0], sizes = [32, 128], strides = [1, 1]} : vector<128x128xbf16> to vector<32x128xbf16>
    %cst_97 = arith.constant dense<0.000000e+00> : vector<8x128xf32>
    %258 = tpu.matmul %256, %257, %cst_97 {dimension_numbers = #tpu.dot_dimension_numbers<[1], [0], [0], [1], [0, 0, 1, 1], [], []>} : vector<8x32xbf16>, vector<32x128xbf16>, vector<8x128xf32> -> vector<8x128xf32>
    %259 = arith.addf %237, %258 : vector<8x128xf32>
    %260 = vector.broadcast %153 : vector<1x128xf32> to vector<8x128xf32>
    %261 = arith.addf %259, %260 : vector<8x128xf32>
    %262 = arith.addf %141, %261 : vector<8x128xf32>
    %c0_98 = arith.constant 0 : index
    %c0_99 = arith.constant 0 : index
    %c0_100 = arith.constant 0 : index
    %263 = vector.load %arg18[%c0_98, %c0_99, %c0_100] : memref<1x1x128xf32, #tpu.memory_space<vmem>>, vector<1x1x128xf32>
    %264 = vector.shape_cast %263 : vector<1x1x128xf32> to vector<1x128xf32>
    %c0_101 = arith.constant 0 : index
    %c0_102 = arith.constant 0 : index
    %c0_103 = arith.constant 0 : index
    %265 = vector.load %arg19[%c0_101, %c0_102, %c0_103] : memref<1x1x128xf32, #tpu.memory_space<vmem>>, vector<1x1x128xf32>
    %266 = vector.shape_cast %265 : vector<1x1x128xf32> to vector<1x128xf32>
    %cst_104 = arith.constant dense<0.000000e+00> : vector<8xf32>
    %267 = vector.multi_reduction <add>, %262, %cst_104 [1] : vector<8x128xf32> to vector<8xf32>
    %268 = vector.shape_cast %267 : vector<8xf32> to vector<8x1xf32>
    %cst_105 = arith.constant 1.280000e+02 : f32
    %269 = vector.broadcast %cst_105 : f32 to vector<8x1xf32>
    %270 = arith.divf %268, %269 : vector<8x1xf32>
    %271 = vector.broadcast %270 : vector<8x1xf32> to vector<8x128xf32>
    %272 = arith.subf %262, %271 : vector<8x128xf32>
    %273 = arith.mulf %272, %272 : vector<8x128xf32>
    %cst_106 = arith.constant dense<0.000000e+00> : vector<8xf32>
    %274 = vector.multi_reduction <add>, %273, %cst_106 [1] : vector<8x128xf32> to vector<8xf32>
    %275 = vector.shape_cast %274 : vector<8xf32> to vector<8x1xf32>
    %cst_107 = arith.constant 1.280000e+02 : f32
    %276 = vector.broadcast %cst_107 : f32 to vector<8x1xf32>
    %277 = arith.divf %275, %276 : vector<8x1xf32>
    %278 = vector.broadcast %270 : vector<8x1xf32> to vector<8x128xf32>
    %279 = arith.subf %262, %278 : vector<8x128xf32>
    %cst_108 = arith.constant 9.99999974E-6 : f32
    %280 = vector.broadcast %cst_108 : f32 to vector<8x1xf32>
    %281 = arith.addf %277, %280 : vector<8x1xf32>
    %282 = math.rsqrt %281 : vector<8x1xf32>
    %283 = vector.broadcast %282 : vector<8x1xf32> to vector<8x128xf32>
    %284 = arith.mulf %279, %283 : vector<8x128xf32>
    %285 = vector.broadcast %264 : vector<1x128xf32> to vector<8x128xf32>
    %286 = arith.mulf %284, %285 : vector<8x128xf32>
    %287 = vector.broadcast %266 : vector<1x128xf32> to vector<8x128xf32>
    %288 = arith.addf %286, %287 : vector<8x128xf32>
    %c0_109 = arith.constant 0 : index
    %c0_110 = arith.constant 0 : index
    %c0_111 = arith.constant 0 : index
    %289 = vector.load %arg20[%c0_109, %c0_110, %c0_111] : memref<1x128x256xbf16, #tpu.memory_space<vmem>>, vector<1x128x256xbf16>
    %290 = vector.shape_cast %289 : vector<1x128x256xbf16> to vector<128x256xbf16>
    %c0_112 = arith.constant 0 : index
    %c0_113 = arith.constant 0 : index
    %c0_114 = arith.constant 0 : index
    %291 = vector.load %arg21[%c0_112, %c0_113, %c0_114] : memref<1x1x256xf32, #tpu.memory_space<vmem>>, vector<1x1x256xf32>
    %292 = vector.shape_cast %291 : vector<1x1x256xf32> to vector<1x256xf32>
    %c0_115 = arith.constant 0 : index
    %c0_116 = arith.constant 0 : index
    %c0_117 = arith.constant 0 : index
    %293 = vector.load %arg22[%c0_115, %c0_116, %c0_117] : memref<1x256x128xbf16, #tpu.memory_space<vmem>>, vector<1x256x128xbf16>
    %294 = vector.shape_cast %293 : vector<1x256x128xbf16> to vector<256x128xbf16>
    %c0_118 = arith.constant 0 : index
    %c0_119 = arith.constant 0 : index
    %c0_120 = arith.constant 0 : index
    %295 = vector.load %arg23[%c0_118, %c0_119, %c0_120] : memref<1x1x128xf32, #tpu.memory_space<vmem>>, vector<1x1x128xf32>
    %296 = vector.shape_cast %295 : vector<1x1x128xf32> to vector<1x128xf32>
    %297 = arith.truncf %288 : vector<8x128xf32> to vector<8x128xbf16>
    %cst_121 = arith.constant dense<0.000000e+00> : vector<8x256xf32>
    %298 = tpu.matmul %297, %290, %cst_121 {dimension_numbers = #tpu.dot_dimension_numbers<[1], [0], [0], [1], [0, 0, 1, 1], [], []>} : vector<8x128xbf16>, vector<128x256xbf16>, vector<8x256xf32> -> vector<8x256xf32>
    %299 = vector.broadcast %292 : vector<1x256xf32> to vector<8x256xf32>
    %300 = arith.addf %298, %299 : vector<8x256xf32>
    %cst_122 = arith.constant 0.000000e+00 : f32
    %301 = vector.broadcast %cst_122 : f32 to vector<8x256xf32>
    %302 = arith.maximumf %300, %301 : vector<8x256xf32>
    %303 = arith.truncf %302 : vector<8x256xf32> to vector<8x256xbf16>
    %cst_123 = arith.constant dense<0.000000e+00> : vector<8x128xf32>
    %304 = tpu.matmul %303, %294, %cst_123 {dimension_numbers = #tpu.dot_dimension_numbers<[1], [0], [0], [1], [0, 0, 1, 1], [], []>} : vector<8x256xbf16>, vector<256x128xbf16>, vector<8x128xf32> -> vector<8x128xf32>
    %305 = vector.broadcast %296 : vector<1x128xf32> to vector<8x128xf32>
    %306 = arith.addf %304, %305 : vector<8x128xf32>
    %307 = arith.addf %288, %306 : vector<8x128xf32>
    %c0_124 = arith.constant 0 : index
    %c0_125 = arith.constant 0 : index
    %c0_126 = arith.constant 0 : index
    %308 = vector.load %arg24[%c0_124, %c0_125, %c0_126] : memref<1x1x128xf32, #tpu.memory_space<vmem>>, vector<1x1x128xf32>
    %309 = vector.shape_cast %308 : vector<1x1x128xf32> to vector<1x128xf32>
    %c0_127 = arith.constant 0 : index
    %c0_128 = arith.constant 0 : index
    %c0_129 = arith.constant 0 : index
    %310 = vector.load %arg25[%c0_127, %c0_128, %c0_129] : memref<1x1x128xf32, #tpu.memory_space<vmem>>, vector<1x1x128xf32>
    %311 = vector.shape_cast %310 : vector<1x1x128xf32> to vector<1x128xf32>
    %cst_130 = arith.constant dense<0.000000e+00> : vector<8xf32>
    %312 = vector.multi_reduction <add>, %307, %cst_130 [1] : vector<8x128xf32> to vector<8xf32>
    %313 = vector.shape_cast %312 : vector<8xf32> to vector<8x1xf32>
    %cst_131 = arith.constant 1.280000e+02 : f32
    %314 = vector.broadcast %cst_131 : f32 to vector<8x1xf32>
    %315 = arith.divf %313, %314 : vector<8x1xf32>
    %316 = vector.broadcast %315 : vector<8x1xf32> to vector<8x128xf32>
    %317 = arith.subf %307, %316 : vector<8x128xf32>
    %318 = arith.mulf %317, %317 : vector<8x128xf32>
    %cst_132 = arith.constant dense<0.000000e+00> : vector<8xf32>
    %319 = vector.multi_reduction <add>, %318, %cst_132 [1] : vector<8x128xf32> to vector<8xf32>
    %320 = vector.shape_cast %319 : vector<8xf32> to vector<8x1xf32>
    %cst_133 = arith.constant 1.280000e+02 : f32
    %321 = vector.broadcast %cst_133 : f32 to vector<8x1xf32>
    %322 = arith.divf %320, %321 : vector<8x1xf32>
    %323 = vector.broadcast %315 : vector<8x1xf32> to vector<8x128xf32>
    %324 = arith.subf %307, %323 : vector<8x128xf32>
    %cst_134 = arith.constant 9.99999974E-6 : f32
    %325 = vector.broadcast %cst_134 : f32 to vector<8x1xf32>
    %326 = arith.addf %322, %325 : vector<8x1xf32>
    %327 = math.rsqrt %326 : vector<8x1xf32>
    %328 = vector.broadcast %327 : vector<8x1xf32> to vector<8x128xf32>
    %329 = arith.mulf %324, %328 : vector<8x128xf32>
    %330 = vector.broadcast %309 : vector<1x128xf32> to vector<8x128xf32>
    %331 = arith.mulf %329, %330 : vector<8x128xf32>
    %332 = vector.broadcast %311 : vector<1x128xf32> to vector<8x128xf32>
    %333 = arith.addf %331, %332 : vector<8x128xf32>
    %c0_135 = arith.constant 0 : index
    %c0_136 = arith.constant 0 : index
    %334 = vector.load %arg31[%c0_135, %c0_136] : memref<8x128xf32, #tpu.memory_space<vmem>>, vector<8x128xf32>
    tpu.vector_store %arg31[%c0_135, %c0_136], %333 {strides = array<i32>} : memref<8x128xf32, #tpu.memory_space<vmem>>, vector<8x128xf32>,
    %c1_i32 = arith.constant 1 : i32
    %335 = arith.cmpi eq, %arg1, %c1_i32 : i32
    %336 = arith.extui %335 : i1 to i32
    %c0_i32_137 = arith.constant 0 : i32
    %337 = arith.cmpi ne, %336, %c0_i32_137 : i32
    scf.if %337 {
      %c0_138 = arith.constant 0 : index
      %c0_139 = arith.constant 0 : index
      %338 = vector.load %arg26[%c0_138, %c0_139] : memref<1x128xf32, #tpu.memory_space<vmem>>, vector<1x128xf32>
      %c0_140 = arith.constant 0 : index
      %c0_141 = arith.constant 0 : index
      %339 = vector.load %arg27[%c0_140, %c0_141] : memref<1x128xf32, #tpu.memory_space<vmem>>, vector<1x128xf32>
      %cst_142 = arith.constant dense<0.000000e+00> : vector<8xf32>
      %340 = vector.multi_reduction <add>, %333, %cst_142 [1] : vector<8x128xf32> to vector<8xf32>
      %341 = vector.shape_cast %340 : vector<8xf32> to vector<8x1xf32>
      %cst_143 = arith.constant 1.280000e+02 : f32
      %342 = vector.broadcast %cst_143 : f32 to vector<8x1xf32>
      %343 = arith.divf %341, %342 : vector<8x1xf32>
      %344 = vector.broadcast %343 : vector<8x1xf32> to vector<8x128xf32>
      %345 = arith.subf %333, %344 : vector<8x128xf32>
      %346 = arith.mulf %345, %345 : vector<8x128xf32>
      %cst_144 = arith.constant dense<0.000000e+00> : vector<8xf32>
      %347 = vector.multi_reduction <add>, %346, %cst_144 [1] : vector<8x128xf32> to vector<8xf32>
      %348 = vector.shape_cast %347 : vector<8xf32> to vector<8x1xf32>
      %cst_145 = arith.constant 1.280000e+02 : f32
      %349 = vector.broadcast %cst_145 : f32 to vector<8x1xf32>
      %350 = arith.divf %348, %349 : vector<8x1xf32>
      %351 = vector.broadcast %343 : vector<8x1xf32> to vector<8x128xf32>
      %352 = arith.subf %333, %351 : vector<8x128xf32>
      %cst_146 = arith.constant 9.99999974E-6 : f32
      %353 = vector.broadcast %cst_146 : f32 to vector<8x1xf32>
      %354 = arith.addf %350, %353 : vector<8x1xf32>
      %355 = math.rsqrt %354 : vector<8x1xf32>
      %356 = vector.broadcast %355 : vector<8x1xf32> to vector<8x128xf32>
      %357 = arith.mulf %352, %356 : vector<8x128xf32>
      %358 = vector.broadcast %338 : vector<1x128xf32> to vector<8x128xf32>
      %359 = arith.mulf %357, %358 : vector<8x128xf32>
      %360 = vector.broadcast %339 : vector<1x128xf32> to vector<8x128xf32>
      %361 = arith.addf %359, %360 : vector<8x128xf32>
      %362 = arith.truncf %361 : vector<8x128xf32> to vector<8x128xbf16>
      %c0_147 = arith.constant 0 : index
      %c0_148 = arith.constant 0 : index
      %363 = vector.load %arg28[%c0_147, %c0_148] : memref<128x128xbf16, #tpu.memory_space<vmem>>, vector<128x128xbf16>
      %cst_149 = arith.constant dense<0.000000e+00> : vector<8x128xf32>
      %364 = tpu.matmul %362, %363, %cst_149 {dimension_numbers = #tpu.dot_dimension_numbers<[1], [0], [0], [1], [0, 0, 1, 1], [], []>} : vector<8x128xbf16>, vector<128x128xbf16>, vector<8x128xf32> -> vector<8x128xf32>
      %c0_150 = arith.constant 0 : index
      %c0_151 = arith.constant 0 : index
      %365 = vector.load %arg29[%c0_150, %c0_151] : memref<1x128xf32, #tpu.memory_space<vmem>>, vector<1x128xf32>
      %366 = vector.broadcast %365 : vector<1x128xf32> to vector<8x128xf32>
      %367 = arith.addf %364, %366 : vector<8x128xf32>
      %c0_152 = arith.constant 0 : index
      %c0_153 = arith.constant 0 : index
      %c0_154 = arith.constant 0 : index
      %368 = vector.load %arg30[%c0_152, %c0_153, %c0_154] : memref<1x8x128xf32, #tpu.memory_space<vmem>>, vector<1x8x128xf32>
      %369 = vector.shape_cast %368 : vector<1x8x128xf32> to vector<8x128xf32>
      %370 = vector.shape_cast %367 : vector<8x128xf32> to vector<1x8x128xf32>
      tpu.vector_store %arg30[%c0_152, %c0_153, %c0_154], %370 {strides = array<i32>} : memref<1x8x128xf32, #tpu.memory_space<vmem>>, vector<1x8x128xf32>,
    } else {
    }
    return
  }
  func.func @transform_0(%arg0: i32, %arg1: i32) -> (i32, i32, i32) {
    %c0_i32 = arith.constant 0 : i32
    %c0_i32_0 = arith.constant 0 : i32
    %c0_i32_1 = arith.constant 0 : i32
    return %arg0, %c0_i32, %c0_i32_0 : i32, i32, i32
  }
  func.func @transform_1(%arg0: i32, %arg1: i32) -> (i32, i32, i32) {
    %c0_i32 = arith.constant 0 : i32
    %c0_i32_0 = arith.constant 0 : i32
    %c0_i32_1 = arith.constant 0 : i32
    return %arg0, %c0_i32, %c0_i32_0 : i32, i32, i32
  }
  func.func @transform_2(%arg0: i32, %arg1: i32) -> (i32, i32, i32) {
    %c0_i32 = arith.constant 0 : i32
    %c0_i32_0 = arith.constant 0 : i32
    %c0_i32_1 = arith.constant 0 : i32
    return %arg0, %c0_i32, %c0_i32_0 : i32, i32, i32
  }
  func.func @transform_3(%arg0: i32, %arg1: i32) -> (i32, i32, i32) {
    %c0_i32 = arith.constant 0 : i32
    %c0_i32_0 = arith.constant 0 : i32
    %c0_i32_1 = arith.constant 0 : i32
    return %arg0, %c0_i32, %c0_i32_0 : i32, i32, i32
  }
  func.func @transform_4(%arg0: i32, %arg1: i32) -> (i32, i32, i32) {
    %c0_i32 = arith.constant 0 : i32
    %c0_i32_0 = arith.constant 0 : i32
    %c0_i32_1 = arith.constant 0 : i32
    return %arg1, %c0_i32, %c0_i32_0 : i32, i32, i32
  }
  func.func @transform_5(%arg0: i32, %arg1: i32) -> (i32, i32, i32) {
    %c0_i32 = arith.constant 0 : i32
    %c0_i32_0 = arith.constant 0 : i32
    %c0_i32_1 = arith.constant 0 : i32
    return %arg1, %c0_i32, %c0_i32_0 : i32, i32, i32
  }
  func.func @transform_6(%arg0: i32, %arg1: i32) -> (i32, i32, i32) {
    %c0_i32 = arith.constant 0 : i32
    %c0_i32_0 = arith.constant 0 : i32
    %c0_i32_1 = arith.constant 0 : i32
    return %arg1, %c0_i32, %c0_i32_0 : i32, i32, i32
  }
  func.func @transform_7(%arg0: i32, %arg1: i32) -> (i32, i32, i32) {
    %c0_i32 = arith.constant 0 : i32
    %c0_i32_0 = arith.constant 0 : i32
    %c0_i32_1 = arith.constant 0 : i32
    return %arg1, %c0_i32, %c0_i32_0 : i32, i32, i32
  }
  func.func @transform_8(%arg0: i32, %arg1: i32) -> (i32, i32, i32) {
    %c0_i32 = arith.constant 0 : i32
    %c0_i32_0 = arith.constant 0 : i32
    %c0_i32_1 = arith.constant 0 : i32
    return %arg1, %c0_i32, %c0_i32_0 : i32, i32, i32
  }
  func.func @transform_9(%arg0: i32, %arg1: i32) -> (i32, i32, i32) {
    %c0_i32 = arith.constant 0 : i32
    %c0_i32_0 = arith.constant 0 : i32
    %c0_i32_1 = arith.constant 0 : i32
    return %arg1, %c0_i32, %c0_i32_0 : i32, i32, i32
  }
  func.func @transform_10(%arg0: i32, %arg1: i32) -> (i32, i32, i32) {
    %c0_i32 = arith.constant 0 : i32
    %c0_i32_0 = arith.constant 0 : i32
    %c0_i32_1 = arith.constant 0 : i32
    return %arg1, %c0_i32, %c0_i32_0 : i32, i32, i32
  }
  func.func @transform_11(%arg0: i32, %arg1: i32) -> (i32, i32, i32) {
    %c0_i32 = arith.constant 0 : i32
    %c0_i32_0 = arith.constant 0 : i32
    %c0_i32_1 = arith.constant 0 : i32
    return %arg1, %c0_i32, %c0_i32_0 : i32, i32, i32
  }
  func.func @transform_12(%arg0: i32, %arg1: i32) -> (i32, i32, i32) {
    %c0_i32 = arith.constant 0 : i32
    %c0_i32_0 = arith.constant 0 : i32
    %c0_i32_1 = arith.constant 0 : i32
    return %arg1, %c0_i32, %c0_i32_0 : i32, i32, i32
  }
  func.func @transform_13(%arg0: i32, %arg1: i32) -> (i32, i32, i32) {
    %c0_i32 = arith.constant 0 : i32
    %c0_i32_0 = arith.constant 0 : i32
    %c0_i32_1 = arith.constant 0 : i32
    return %arg1, %c0_i32, %c0_i32_0 : i32, i32, i32
  }
  func.func @transform_14(%arg0: i32, %arg1: i32) -> (i32, i32, i32) {
    %c0_i32 = arith.constant 0 : i32
    %c0_i32_0 = arith.constant 0 : i32
    %c0_i32_1 = arith.constant 0 : i32
    return %arg1, %c0_i32, %c0_i32_0 : i32, i32, i32
  }
  func.func @transform_15(%arg0: i32, %arg1: i32) -> (i32, i32, i32) {
    %c0_i32 = arith.constant 0 : i32
    %c0_i32_0 = arith.constant 0 : i32
    %c0_i32_1 = arith.constant 0 : i32
    return %arg1, %c0_i32, %c0_i32_0 : i32, i32, i32
  }
  func.func @transform_16(%arg0: i32, %arg1: i32) -> (i32, i32, i32) {
    %c0_i32 = arith.constant 0 : i32
    %c0_i32_0 = arith.constant 0 : i32
    %c0_i32_1 = arith.constant 0 : i32
    return %arg1, %c0_i32, %c0_i32_0 : i32, i32, i32
  }
  func.func @transform_17(%arg0: i32, %arg1: i32) -> (i32, i32, i32) {
    %c0_i32 = arith.constant 0 : i32
    %c0_i32_0 = arith.constant 0 : i32
    %c0_i32_1 = arith.constant 0 : i32
    return %arg1, %c0_i32, %c0_i32_0 : i32, i32, i32
  }
  func.func @transform_18(%arg0: i32, %arg1: i32) -> (i32, i32, i32) {
    %c0_i32 = arith.constant 0 : i32
    %c0_i32_0 = arith.constant 0 : i32
    %c0_i32_1 = arith.constant 0 : i32
    return %arg1, %c0_i32, %c0_i32_0 : i32, i32, i32
  }
  func.func @transform_19(%arg0: i32, %arg1: i32) -> (i32, i32, i32) {
    %c0_i32 = arith.constant 0 : i32
    %c0_i32_0 = arith.constant 0 : i32
    %c0_i32_1 = arith.constant 0 : i32
    return %arg1, %c0_i32, %c0_i32_0 : i32, i32, i32
  }
  func.func @transform_20(%arg0: i32, %arg1: i32) -> (i32, i32, i32) {
    %c0_i32 = arith.constant 0 : i32
    %c0_i32_0 = arith.constant 0 : i32
    %c0_i32_1 = arith.constant 0 : i32
    return %arg1, %c0_i32, %c0_i32_0 : i32, i32, i32
  }
  func.func @transform_21(%arg0: i32, %arg1: i32) -> (i32, i32, i32) {
    %c0_i32 = arith.constant 0 : i32
    %c0_i32_0 = arith.constant 0 : i32
    %c0_i32_1 = arith.constant 0 : i32
    return %arg1, %c0_i32, %c0_i32_0 : i32, i32, i32
  }
  func.func @transform_22(%arg0: i32, %arg1: i32) -> (i32, i32, i32) {
    %c0_i32 = arith.constant 0 : i32
    %c0_i32_0 = arith.constant 0 : i32
    %c0_i32_1 = arith.constant 0 : i32
    return %arg1, %c0_i32, %c0_i32_0 : i32, i32, i32
  }
  func.func @transform_23(%arg0: i32, %arg1: i32) -> (i32, i32, i32) {
    %c0_i32 = arith.constant 0 : i32
    %c0_i32_0 = arith.constant 0 : i32
    %c0_i32_1 = arith.constant 0 : i32
    return %arg1, %c0_i32, %c0_i32_0 : i32, i32, i32
  }
  func.func @transform_24(%arg0: i32, %arg1: i32) -> (i32, i32) {
    %c0_i32 = arith.constant 0 : i32
    %c0_i32_0 = arith.constant 0 : i32
    %c0_i32_1 = arith.constant 0 : i32
    return %c0_i32, %c0_i32_0 : i32, i32
  }
  func.func @transform_25(%arg0: i32, %arg1: i32) -> (i32, i32) {
    %c0_i32 = arith.constant 0 : i32
    %c0_i32_0 = arith.constant 0 : i32
    %c0_i32_1 = arith.constant 0 : i32
    return %c0_i32, %c0_i32_0 : i32, i32
  }
  func.func @transform_26(%arg0: i32, %arg1: i32) -> (i32, i32) {
    %c0_i32 = arith.constant 0 : i32
    %c0_i32_0 = arith.constant 0 : i32
    %c0_i32_1 = arith.constant 0 : i32
    return %c0_i32, %c0_i32_0 : i32, i32
  }
  func.func @transform_27(%arg0: i32, %arg1: i32) -> (i32, i32) {
    %c0_i32 = arith.constant 0 : i32
    %c0_i32_0 = arith.constant 0 : i32
    %c0_i32_1 = arith.constant 0 : i32
    return %c0_i32, %c0_i32_0 : i32, i32
  }
  func.func @transform_28(%arg0: i32, %arg1: i32) -> (i32, i32, i32) {
    %c0_i32 = arith.constant 0 : i32
    %c0_i32_0 = arith.constant 0 : i32
    %c0_i32_1 = arith.constant 0 : i32
    return %arg0, %c0_i32, %c0_i32_0 : i32, i32, i32
  }
}

</mosaic_0001>

<bundles_post_ra>
// kernel: transformer_forward.2
= control target key start
LH: loop header
LB: loop body
LE: loop exit
PB: predicated region body
PF: predicated region fallthrough
CT: control target
= control target key end

     0   :  { %s3677_s0 = inlined_call_operand.vmem [shape: f32[2,8,128], index: 0, kind: input, shape index: {}]   ;;  %s3678_s1 = inlined_call_operand.vmem [shape: f32[2,8,8], index: 1, kind: input, shape index: {}]   ;;  %s3679_s2 = inlined_call_operand.vmem [shape: bf16[2,128,384], index: 2, kind: input, shape index: {}]   ;;  %s3680_s3 = inlined_call_operand.vmem [shape: f32[2,1,384], index: 3, kind: input, shape index: {}]   ;;  %s3681_s4 = inlined_call_operand.vmem [shape: bf16[2,128,128], index: 4, kind: input, shape index: {}]   ;;  %s3682_s5 = inlined_call_operand.vmem [shape: f32[2,1,128], index: 5, kind: input, shape index: {}]   ;;  %s3683_s6 = inlined_call_operand.vmem [shape: f32[2,1,128], index: 6, kind: input, shape index: {}]   ;;  %s3684_s7 = inlined_call_operand.vmem [shape: f32[2,1,128], index: 7, kind: input, shape index: {}]   ;;  %s3685_s8 = inlined_call_operand.hbm [shape: bf16[2,128,256], index: 8, kind: input, shape index: {}]   ;;  %s3686_s9 = inlined_call_operand.vmem [shape: f32[2,1,256], index: 9, kind: input, shape index: {}]   ;;  %s3687_s10 = inlined_call_operand.hbm [shape: bf16[2,256,128], index: 10, kind: input, shape index: {}]   ;;  %s3688_s11 = inlined_call_operand.vmem [shape: f32[2,1,128], index: 11, kind: input, shape index: {}]   ;;  %s3689_s12 = inlined_call_operand.hbm [shape: f32[2,1,128], index: 12, kind: input, shape index: {}]   ;;  %s3690_s13 = inlined_call_operand.vmem [shape: f32[2,1,128], index: 13, kind: input, shape index: {}]   ;;  %s3691_s14 = inlined_call_operand.vmem [shape: f32[1,128], index: 14, kind: input, shape index: {}]   ;;  %s3692_s15 = inlined_call_operand.vmem [shape: f32[1,128], index: 15, kind: input, shape index: {}]   ;;  %s3693_s16 = inlined_call_operand.vmem [shape: f32[2,8,128], index: 16, kind: output, shape index: {}]  }
   0x1   :  { %3706 = sst [smem:[#allocation19_spill]] %s3677_s0 }
   0x2   :  { %3707 = sst [smem:[#allocation20_spill]] %s3679_s2 }
   0x3   :  { %3708 = sst [smem:[#allocation21_spill]] %s3680_s3 }
   0x4   :  { %3709 = sst [smem:[#allocation22_spill]] %s3681_s4 }
   0x5   :  { %3710 = sst [smem:[#allocation23_spill]] %s3682_s5 }
   0x6   :  { %3711 = sst [smem:[#allocation24_spill]] %s3683_s6 }
   0x7   :  { %3712 = sst [smem:[#allocation25_spill]] %s3684_s7 }
   0x8   :  { %3713 = sst [smem:[#allocation26_spill]] %s3685_s8 }
   0x9   :  { %3714 = sst [smem:[#allocation27_spill]] %s3686_s9 }
   0xa   :  { %3715 = sst [smem:[#allocation28_spill]] %s3687_s10 }
   0xb   :  { %3716 = sst [smem:[#allocation29_spill]] %s3688_s11 }
   0xc   :  { %3717 = sst [smem:[#allocation30_spill]] %s3689_s12 }
   0xd   :  { %3718 = sst [smem:[#allocation31_spill]] %s3690_s13 }
   0xe   :  { %3719 = sst [smem:[#allocation32_spill]] %s3691_s14 }
   0xf   :  { %3720 = sst [smem:[#allocation33_spill]] %s3692_s15 }
  0x10   :  { %3721 = sst [smem:[#allocation34_spill]] %s3693_s16 }
  0x11   :  { %21 = vsyncpa [#allocation4], 0 }
  0x12   :  { %23 = vsyncpa [#allocation4 + $0x1], 0 }
  0x13   :  { %24 = vsyncpa [#allocation6], 0 }
  0x14   :  { %26 = vsyncpa [#allocation6 + $0x1], 0  ;;  %s3141_s21 = smov 0   ;;  %s3143_s22 = smov 0  }
  0x15   :  { %s3145_s23 = smov 0   ;;  %s3147_s24 = smov 0  }
  0x16   :  { %s3149_s25 = smov 0   ;;  %s3151_s26 = smov 0  }
  0x17   :  { %s3153_s27 = smov 0   ;;  %s3155_s28 = smov 0  }
  0x18 LB: > { %3722 = sst [smem:[#allocation10_spill]] %s3017_s22  ;;  %s3696_s29 = sadd.s32 4294967295, %s3041_s28   ;;  %s3041_s28 = sphi %s3155_s28, %s32_s28   ;;  %s3037_s27 = sphi %s3153_s27, %s3775_s27   ;;  %s3033_s26 = sphi %s3151_s26, %s3774_s26   ;;  %s3029_s25 = sphi %s3149_s25, %s3773_s25   ;;  %s3025_s24 = sphi %s3147_s24, %s3772_s24   ;;  %s3021_s23 = sphi %s3145_s23, %s3771_s23   ;;  %s3017_s22 = sphi %s3143_s22, %s3770_s22   ;;  %s3013_s21 = sphi %s3141_s21, %s3769_s21  }
  0x19   : > { %3723 = sst [smem:[#allocation11_spill]] %s3021_s23  ;;  %s41_s30 = sadd.s32 1, %s3033_s26 }
  0x1a   : > { %3724 = sst [smem:[#allocation12_spill]] %s3033_s26  ;;  %p42_p0 = scmp.ge.s32.totalorder %s41_s30, 2 }
  0x1b   : > { %3725 = sst [smem:[#allocation13_spill]] %s3037_s27  ;;  %s44_s0 = sadd.s32 1, %s3037_s27 }
  0x1c   : > { %3726 = sst [smem:[#allocation14_spill]] %s3041_s28  ;;  %s259_s17 = sadd.s32 1, %s3021_s23 }
  0x1d   : > { %p266_p1 = scmp.ne.s32.totalorder %s3021_s23, %s3017_s22  ;;  %s3777_s30 = smov (%p42_p0, %s41_s30), 0 }
  0x1e   : > { %3727 = sst [smem:[#allocation15_spill]] %s3777_s30  ;;  %s3779_s0 = smov (!%p42_p0, %s44_s0), %s3037_s27 }
  0x1f   : > { %s256_s18 = ssub.s32 %s3033_s26, %s3777_s30  ;;  %p267_p2 = scmp.eq.s32.totalorder %s3041_s28, 0 }
  0x20   : > { %p46_p3 = scmp.ge.s32.totalorder %s3779_s0, 2  ;;  %p257_p4 = scmp.eq.s32.totalorder %s256_s18, 0 }
  0x21   : > { %p268_p5 = por %p267_p2, %p266_p1  ;;  %p272_p6 = scmp.ne.s32.totalorder %s3017_s22, %s3013_s21 }
  0x22   : > { %s3781_s0 = smov (%p46_p3, %s3779_s0), 0  ;;  %p273_p7 = scmp.eq.s32.totalorder %s3696_s29, 0 }
  0x23   : > { %3728 = sst [smem:[#allocation16_spill]] %s3781_s0  ;;  %p2704_p8 = scmp.lt.s32.totalorder %s3041_s28, 4 }
  0x24   : > { %s3195_s19 = scalar_select %p257_p4, %s3021_s23, %s259_s17  }
  0x25   : > { %s3201_s20 = sand.u32 1, %s3021_s23   ;;  %p3203_p9 = por %p273_p7, %p272_p6 }
  0x26   : > { %3729 = sst [smem:[#allocation17_spill]] %s3195_s19  ;;  %s3698_s27 = sshll.u32 %s3201_s20, 7 }
  0x27   : > { %s3730_s30 = scalar_select %p3203_p9, 1, 0 }
  0x28   : > { %s3699_s18 = sshll.u32 %s3033_s26, 11  ;;  %p3209_p10 = pnand %p2704_p8, %p268_p5 }
  0x29   : > { %s583_s21 = sand.u32 1, %s3041_s28   ;;  %s3732_s10 = sld [smem:[#allocation28_spill]] }
  0x2a   : > { %s3731_s15 = scalar_select %p3209_p10, 1, 0 }
  0x2b   : > { %s587_s19 = scalar_lea.vmem [#allocation5], %s3698_s27  ;;  %s3226_s14 = scalar_lea.sflag [#allocation6], %s583_s21 }
  0x2c   : > { %s594_s23 = sshll.u32 %s587_s19, 4  ;;  %p3232_p13 = pneg %p3209_p10  ;;  %s3223_s23 = int_to_ptr.vmem [resolvable:$true] %s594_s23 }
  0x2f   : > { %s3219_s0 = scalar_lea.hbm %s3732_s10, %s3699_s18  ;;  %s2886_s19 = scalar_lea.hbm %s3732_s10, 4096 }
  0x30   : > { %s2881_s16 = scalar_lea.hbm %s3219_s0, 2048  ;;  %p2887_p2 = scmp.lt.u32.totalorder %s3219_s0, %s3732_s10 }
  0x31   : > { %p2882_p12 = scmp.ne.s32.totalorder %s3219_s0, %s2881_s16  ;;  %p2888_p3 = scmp.lt.u32.totalorder %s2886_s19, %s2881_s16 }
  0x32   : > { %p2890_p5 = scmp.lt.u32.totalorder %s2881_s16, %s3219_s0 }
  0x33   : > { %p2884_p0 = pnand %p3232_p13, %p2882_p12  ;;  %p2889_p4 = por %p2888_p3, %p2887_p2 }
  0x35   : > { %p2885_p1 = pneg %p2884_p0  ;;  %p2891_p6 = por %p2890_p5, %p2889_p4 }
  0x37   : > { %p2892_p7 = pnand %p2891_p6, %p2885_p1 }
  0x39   : > { %2895 = shalt.err (!%p2892_p7)
}
  0x3a   : > { %s2896_s21 = scalar_lea.vmem %s3223_s23, 2048  ;;  %s3043_s29 = smov [#allocation5]  }
  0x3b   : > { %p2897_p8 = scmp.ne.s32.totalorder %s3223_s23, %s2896_s21  ;;  %s2901_s17 = sshll.u32 %s3043_s29, 4  ;;  %s2902_s17 = int_to_ptr.vmem [resolvable:$false] %s2901_s17 }
  0x3c   : > { %s2903_s27 = scalar_lea.vmem %s2902_s17, 4096  ;;  %p2904_p11 = scmp.lt.s32.totalorder %s3223_s23, %s2902_s17 }
  0x3d   : > { %p2899_p12 = pnand %p2897_p8, %p3232_p13  ;;  %p2905_p9 = scmp.lt.s32.totalorder %s2903_s27, %s2896_s21 }
  0x3f   : > { %p2900_p0 = pneg %p2899_p12  ;;  %p2906_p2 = por %p2905_p9, %p2904_p11 }
  0x41   : > { %p2907_p3 = pnand %p2906_p2, %p2900_p0 }
  0x43   : > { %2910 = shalt.err (!%p2907_p3)
}
  0x44   : > { %s3044_s16 = smov 64   ;;  %s3045_s18 = smov 4  }
  0x45   : > { %2700 = dma.hbm_to_vmem [thread:$0]  (!%p3209_p10), %s3219_s0, 2048, %s3223_s23, %s3226_s14, %s3044_s16, %s3044_s16, %s3045_s18  }
  0x46   : > { %p631_p1 = scmp.lt.s32.totalorder %s3041_s28, 5  ;;  %p3734_p4 = scmp.ge.s32.totalorder %s3041_s28, 1 }
  0x47   : > { %s3736_s21 = sshll.u32 %s3033_s26, 11  ;;  %s3737_s8 = sld [smem:[#allocation26_spill]] }
  0x48   : > { %p3259_p5 = pnand %p3734_p4, %p631_p1  ;;  %s3738_s10 = sshll.u32 %s3201_s20, 7 }
  0x49   : > { %s559_s11 = scalar_lea.vmem [#allocation3], %s3738_s10  ;;  %s556_s23 = scalar_lea.sflag [#allocation4], %s3201_s20 }
  0x4a   : > { %s3735_s19 = scalar_select %p3259_p5, 1, 0 }
  0x4b   : > { %s566_s9 = sshll.u32 %s559_s11, 4  ;;  %s3272_s9 = int_to_ptr.vmem [resolvable:$true] %s566_s9 }
  0x4d   : > { %s3268_s27 = scalar_lea.hbm %s3737_s8, %s3736_s21  ;;  %s2916_s21 = scalar_lea.hbm %s3737_s8, 4096 }
  0x4e   : > { %s2911_s0 = scalar_lea.hbm %s3268_s27, 2048  ;;  %p2917_p7 = scmp.lt.u32.totalorder %s3268_s27, %s3737_s8 }
  0x4f   : > { %p2912_p9 = scmp.ne.s32.totalorder %s3268_s27, %s2911_s0  ;;  %p2918_p8 = scmp.lt.u32.totalorder %s2916_s21, %s2911_s0 }
  0x50   : > { %p2920_p0 = scmp.lt.u32.totalorder %s2911_s0, %s3268_s27 }
  0x51   : > { %p2914_p11 = pnand %p2912_p9, %p3232_p13  ;;  %p2919_p12 = por %p2918_p8, %p2917_p7 }
  0x53   : > { %p2915_p6 = pneg %p2914_p11  ;;  %p2921_p2 = por %p2920_p0, %p2919_p12 }
  0x55   : > { %p2922_p3 = pnand %p2921_p2, %p2915_p6 }
  0x57   : > { %2925 = shalt.err (!%p2922_p3)
}
  0x58   : > { %s2926_s10 = scalar_lea.vmem %s3272_s9, 2048  ;;  %s3046_s11 = smov [#allocation3]  }
  0x59   : > { %p2927_p1 = scmp.ne.s32.totalorder %s3272_s9, %s2926_s10  ;;  %s2931_s16 = sshll.u32 %s3046_s11, 4  ;;  %s2932_s16 = int_to_ptr.vmem [resolvable:$false] %s2931_s16 }
  0x5a   : > { %s2933_s18 = scalar_lea.vmem %s2932_s16, 4096  ;;  %p2934_p11 = scmp.lt.s32.totalorder %s3272_s9, %s2932_s16 }
  0x5b   : > { %p2929_p4 = pnand %p2927_p1, %p3232_p13  ;;  %p2935_p5 = scmp.lt.s32.totalorder %s2933_s18, %s2926_s10 }
  0x5d   : > { %p2930_p9 = pneg %p2929_p4  ;;  %p2936_p7 = por %p2935_p5, %p2934_p11 }
  0x5f   : > { %p2937_p8 = pnand %p2936_p7, %p2930_p9 }
  0x61   : > { %2940 = shalt.err (!%p2937_p8)
}
  0x62   : > { %s3047_s0 = smov 128   ;;  %s3048_s21 = smov 8  }
  0x63   : > { %2697 = dma.hbm_to_vmem [thread:$0]  (!%p3209_p10), %s3268_s27, 2048, %s3272_s9, %s556_s23, %s3047_s0, %s3047_s0, %s3048_s21  }
  0x64   : > { %s2425_s29 = sshll.u32 %s3033_s26, 4  ;;  %s613_s17 = scalar_lea.vmem [#allocation7], %s3201_s20 }
  0x65   : > { %s620_s11 = sshll.u32 %s613_s17, 4  ;;  %s3739_s12 = sld [smem:[#allocation30_spill]]  ;;  %s621_s11 = int_to_ptr.vmem [resolvable:$true] %s620_s11 }
  0x6b   : > { %s618_s18 = scalar_lea.hbm %s3739_s12, %s2425_s29  ;;  %s2946_s3 = scalar_lea.hbm %s3739_s12, 32 }
  0x6c   : > { %s2941_s8 = scalar_lea.hbm %s618_s18, 16  ;;  %p2947_p0 = scmp.lt.u32.totalorder %s618_s18, %s3739_s12 }
  0x6d   : > { %p2942_p5 = scmp.ne.s32.totalorder %s618_s18, %s2941_s8  ;;  %p2948_p2 = scmp.lt.u32.totalorder %s2946_s3, %s2941_s8 }
  0x6e   : > { %p2950_p1 = scmp.lt.u32.totalorder %s2941_s8, %s618_s18 }
  0x6f   : > { %p2944_p6 = pnand %p2942_p5, %p3232_p13  ;;  %p2949_p3 = por %p2948_p2, %p2947_p0 }
  0x71   : > { %p2945_p12 = pneg %p2944_p6  ;;  %p2951_p4 = por %p2950_p1, %p2949_p3 }
  0x73   : > { %p2952_p9 = pnand %p2951_p4, %p2945_p12 }
  0x75   : > { %2955 = shalt.err (!%p2952_p9)
}
  0x76   : > { %s2956_s9 = scalar_lea.vmem %s621_s11, 16  ;;  %s3049_s20 = smov [#allocation7]  }
  0x77   : > { %p2957_p11 = scmp.ne.s32.totalorder %s621_s11, %s2956_s9  ;;  %s2961_s27 = sshll.u32 %s3049_s20, 4  ;;  %s2962_s27 = int_to_ptr.vmem [resolvable:$false] %s2961_s27 }
  0x78   : > { %s2963_s6 = scalar_lea.vmem %s2962_s27, 32  ;;  %p2964_p5 = scmp.lt.s32.totalorder %s621_s11, %s2962_s27 }
  0x79   : > { %p2959_p7 = pnand %p2957_p11, %p3232_p13  ;;  %p2965_p6 = scmp.lt.s32.totalorder %s2963_s6, %s2956_s9 }
  0x7b   : > { %p2960_p8 = pneg %p2959_p7  ;;  %p2966_p10 = por %p2965_p6, %p2964_p5 }
  0x7d   : > { %p2967_p0 = pnand %p2966_p10, %p2960_p8 }
  0x7f   : > { %2970 = shalt.err (!%p2967_p0)
}
  0x80   : > { %p3740_p2 = scmp.ne.s32.totalorder %s3731_s15, 0  ;;  %p3741_p12 = scmp.ne.s32.totalorder %s3735_s19, 0 }
  0x82   : > { %2703 = dma.hbm_to_vmem [thread:$0]  (!%p3740_p2), %s618_s18, 16, %s621_s11, %s3226_s14  }
  0x83   : > { %635 = sbr.rel (%p3741_p12) target bundleno = 4167 (0x1047), region = 84 }
  0x8a   : > { %s3319_s2 = sand.u32 1, %s3017_s22   ;;  %p3742_p13 = scmp.ne.s32.totalorder %s3730_s30, 0 }
  0x8b   : > { %s2427_s3 = sshll.u32 %s3319_s2, 7  ;;  %s638_s5 = scalar_lea.sflag [#allocation4], %s3319_s2 }
  0x8c   : > { %s3323_s7 = scalar_lea.vmem [#allocation3], %s2427_s3 }
  0x8d   : > { %3004 = dma.done.wait (%p3742_p13), %s638_s5, 2048  }
  0x8e   : > { %3006 = vsyncadd (%p3742_p13), %s638_s5, 4294965248  ;;  %s3743_s8 = sadd.s32 4294967295, %s3041_s28   ;;  %s3331_s15 = scalar_lea.vmem [#allocation5], %s2427_s3 }
  0x8f   : > { %s646_s13 = sand.u32 1, %s3743_s8   ;;  %3744 = sst [smem:[#allocation18_spill]] %s3331_s15 }
  0x90   : > { %s647_s14 = scalar_lea.sflag [#allocation6], %s646_s13 }
  0x91   : > { %3008 = dma.done.wait (%p3742_p13), %s647_s14, 2064  }
  0x92   : > { %3010 = vsyncadd (%p3742_p13), %s647_s14, 4294965232  ;;  %p756_p10 = scmp.lt.s32.totalorder %s3029_s25, 1  ;;  %p764_p3 = scmp.lt.s32.totalorder %s3025_s24, 1 }
  0x93   : > { %s3745_s21 = sld [smem:[#allocation19_spill]]  ;;  %s3746_s4 = sld [smem:[#allocation22_spill]] }
  0x94   : > { %s3783_s25 = smov (!%p756_p10, %s3029_s25), 1  ;;  %s3747_s5 = sld [smem:[#allocation20_spill]] }
  0x95   : > { %s3341_s19 = scalar_select %p764_p3, %s3025_s24, 1 }
  0x96   : > { %s3343_s30 = sshll.u32 %s3783_s25, 3  ;;  %s3749_s11 = sld [smem:[#allocation21_spill]] }
  0x97   : > { %s2686_s10 = smul.u32 192, %s3341_s19  ;;  %s2526_s18 = sshll.u32 %s3341_s19, 6 }
  0x98   : > { %s2687_s9 = smul.u32 3, %s3341_s19  ;;  %s2434_s6 = sshll.u32 %s3341_s19, 1 }
  0x99   : > { %s759_s29 = scalar_lea.vmem %s3745_s21, %s3343_s30  ;;  %s3359_s25 = scalar_lea.vmem %s3746_s4, %s2526_s18 }
  0x9a   : > { %s3364_s8 = scalar_lea.vmem %s3747_s5, %s2686_s10  ;;  %s3751_s4 = sld [smem:[#allocation25_spill]] }
  0x9b   : > { %s3752_s5 = sld [smem:[#allocation27_spill]]  ;;  %s3753_s23 = sld [smem:[#allocation29_spill]] }
  0x9c   : > { %s3373_s16 = scalar_lea.vmem %s3749_s11, %s2687_s9  ;;  %s3754_s11 = sld [smem:[#allocation31_spill]] }
  0x9d   : > { %s3755_s26 = sld [smem:[#allocation34_spill]]  ;;  %s658_s18 = scalar_lea.vmem [#allocation7], %s3319_s2 }
  0x9e   : > { %p2436_p1 = scmp.ne.s32.totalorder %s3025_s24, 0 }
  0x9f   : > { %v806_v0 = vld [vmem:[%s759_s29] sm:$0xff] (!%p2436_p1) }
  0xa0   : > { %s786_s28 = scalar_lea.vmem %s3751_s4, %s3341_s19  ;;  %805 = sbr.rel (%p2436_p1) target bundleno = 167 (0xa7), region = 100  ;;  %807 = vst [vmem:[#allocation2] sm:$0xff] (!%p2436_p1), %v806_v0 }
  0xa1   : > { %s3387_s15 = scalar_lea.vmem %s3752_s5, %s2434_s6  ;;  %s793_s21 = scalar_lea.vmem %s3753_s23, %s3341_s19 }
  0xa2   : > { %s796_s0 = scalar_lea.vmem %s3754_s11, %s3341_s19 }
  0xa3   : > { %s800_s20 = scalar_lea.vmem %s3755_s26, %s3343_s30 }
  0xa7 PF: > { %v2779_v1 = vld [vmem:[%s3364_s8 + $0x4] ss:$12 sps:$4 sm:$0xff]   ;;  %v2781_v2 = vld [vmem:[%s3364_s8] ss:$12 sps:$4 sm:$0xff]   ;;  %v3050_v3 = vmov 0   ;;  %v3051_v20 = vmov 0.0   ;;  %v862_v21 = vlaneseq }
  0xa8   : > { %1037 = vmatprep.mubr.bf16.mxu0 %v3050_v3  ;;  %1005 = vmatprep.subr.bf16.mxu0 %v2779_v1  ;;  %v2782_v4 = vld [vmem:[%s3364_s8 + $0x1c] ss:$12 sps:$4 sm:$0xff]   ;;  %v2784_v5 = vld [vmem:[%s3364_s8 + $0x18] ss:$12 sps:$4 sm:$0xff]   ;;  %v2785_v6 = vld [vmem:[%s3364_s8 + $0x34] ss:$12 sps:$4 sm:$0xff]  }
  0xa9   : > { %1006 = vmatpush1.bf16.msra.mxu0 %v2781_v2  ;;  %v2787_v7 = vld [vmem:[%s3364_s8 + $0x30] ss:$12 sps:$4 sm:$0xff]   ;;  %v2788_v8 = vld [vmem:[%s3364_s8 + $0x4c] ss:$12 sps:$4 sm:$0xff]   ;;  %v2790_v9 = vld [vmem:[%s3364_s8 + $0x48] ss:$12 sps:$4 sm:$0xff]   ;;  %2586 = vmatprep.subr.bf16.mxu1 %v3051_v20 }
  0xaa   : > { %1007 = vmatprep.subr.bf16.mxu0 %v2782_v4  ;;  %v2791_v10 = vld [vmem:[%s3364_s8 + $0x64] ss:$12 sps:$4 sm:$0xff]   ;;  %v2793_v11 = vld [vmem:[%s3364_s8 + $0x60] ss:$12 sps:$4 sm:$0xff]   ;;  %v2794_v12 = vld [vmem:[%s3364_s8 + $0x7c] ss:$12 sps:$4 sm:$0xff]  }
  0xab   : > { %v2796_v13 = vld [vmem:[%s3364_s8 + $0x78] ss:$12 sps:$4 sm:$0xff]   ;;  %v2797_v14 = vld [vmem:[%s3364_s8 + $0x94] ss:$12 sps:$4 sm:$0xff]   ;;  %v2799_v15 = vld [vmem:[%s3364_s8 + $0x90] ss:$12 sps:$4 sm:$0xff]  }
  0xac   : > { %v2800_v16 = vld [vmem:[%s3364_s8 + $0xac] ss:$12 sps:$4 sm:$0xff]   ;;  %v2802_v17 = vld [vmem:[%s3364_s8 + $0xa8] ss:$12 sps:$4 sm:$0xff]   ;;  %v3420_v18 = vld [vmem:[#allocation2] sm:$0xff]  ;;  %vm3052_vm0 = vmmov 0  }
  0xad   : > { %1008 = vmatpush1.bf16.msra.mxu0 %v2784_v5  ;;  %v3424_v19 = vpack.c.bf16 %v3420_v18, %v3420_v18  ;;  %2602 = vmatprep.mubr.msk.bf16.mxu1 %vm3052_vm0, %v3051_v20  ;;  %v3433_v22 = vshrl.u32 %v862_v21, 7  ;;  %v3437_v24 = vld [vmem:[%s3373_s16] sm:$0x7]  ;;  %vm1090_vm1 = vcmask 261120   ;;  %s3053_s4 = smov 96   ;;  %vm1137_vm2 = vcmask 64512  }
  0xae   : > { %1009 = vmatprep.subr.bf16.mxu0 %v2785_v6  ;;  %v2803_v38 = vld [vmem:[%s3364_s8 + $0x8] ss:$12 sps:$4 sm:$0xff]   ;;  %v2804_v39 = vld [vmem:[%s3364_s8 + $0x20] ss:$12 sps:$4 sm:$0xff]   ;;  %v2805_v40 = vld [vmem:[%s3364_s8 + $0x38] ss:$12 sps:$4 sm:$0xff]  }
  0xaf   : > { %v864_v23 = vsub.s32 0, %v3433_v22  ;;  %v868_v25 = vsub.s32 1, %v3433_v22  ;;  %2587 = vmatpush3.bf16.msra.mxu1 %v2803_v38  ;;  %v2806_v41 = vld [vmem:[%s3364_s8 + $0x50] ss:$12 sps:$4 sm:$0xff]   ;;  %v2807_v42 = vld [vmem:[%s3364_s8 + $0x68] ss:$12 sps:$4 sm:$0xff]  }
  0xb0   : > { %2588 = vmatprep.subr.bf16.mxu1 %v3051_v20  ;;  %v2808_v43 = vld [vmem:[%s3364_s8 + $0x80] ss:$12 sps:$4 sm:$0xff]   ;;  %v2809_v46 = vld [vmem:[%s3364_s8 + $0x98] ss:$12 sps:$4 sm:$0xff]   ;;  %v2810_v47 = vld [vmem:[%s3364_s8 + $0xb0] ss:$12 sps:$4 sm:$0xff]   ;;  %s3756_s8 = scalar_lea.vmem %s3678_s1, %s3343_s30 }
  0xb1   : > { %1010 = vmatpush1.bf16.msra.mxu0 %v2787_v7  ;;  %v865_v26 = vrot.slane %v3437_v24, %v864_v23  ;;  %v869_v27 = vrot.slane %v3437_v24, %v868_v25  ;;  %v3490_v49 = vld [vmem:[%s3756_s8] sm:$0xff]  ;;  %s3054_s27 = smov 64   ;;  %vm1153_vm3 = vcmask 1043456   ;;  %v2812_v38 = vld [vmem:[%s3359_s25 + $0x8] sm:$0xff]   ;;  %s3055_s6 = smov 32  }
  0xb2   : > { %1011 = vmatprep.subr.bf16.mxu0 %v2788_v8  ;;  %v872_v8 = vsub.s32 2, %v3433_v22  ;;  %s3757_s5 = sld [smem:[#allocation23_spill]]  ;;  %s3760_s23 = sld [smem:[#allocation24_spill]] }
  0xb3   : > { %2589 = vmatpush3.bf16.msra.mxu1 %v2804_v39  ;;  %p2519_p4 = scmp.ne.s32.totalorder %s3025_s24, 1 }
  0xb4   : > { %2590 = vmatprep.subr.bf16.mxu1 %v3051_v20  ;;  %s3766_s29 = sld [smem:[#allocation33_spill]] (!%p2519_p4) }
  0xb5   : > { %1012 = vmatpush1.bf16.msra.mxu0 %v2790_v9  ;;  %v873_v9 = vrot.slane %v3437_v24, %v872_v8 }
  0xb6   : > { %1013 = vmatprep.subr.bf16.mxu0 %v2791_v10 }
  0xb7   : > { %2591 = vmatpush3.bf16.msra.mxu1 %v2805_v40 }
  0xb8   : > { %2592 = vmatprep.subr.bf16.mxu1 %v3051_v20  ;;  %s3758_s13 = scalar_lea.vmem %s3757_s5, %s3341_s19  ;;  %s3761_s9 = scalar_lea.vmem %s3760_s23, %s3341_s19 }
  0xb9   : > { %1014 = vmatpush1.bf16.msra.mxu0 %v2793_v11 }
  0xba   : > { %1015 = vmatprep.subr.bf16.mxu0 %v2794_v12 }
  0xbb   : > { %2593 = vmatpush3.bf16.msra.mxu1 %v2806_v41 }
  0xbc   : > { %2594 = vmatprep.subr.bf16.mxu1 %v3051_v20 }
  0xbd   : > { %1016 = vmatpush1.bf16.msra.mxu0 %v2796_v13 }
  0xbe   : > { %1017 = vmatprep.subr.bf16.mxu0 %v2797_v14 }
  0xbf   : > { %2595 = vmatpush3.bf16.msra.mxu1 %v2807_v42 }
  0xc0   : > { %2596 = vmatprep.subr.bf16.mxu1 %v3051_v20 }
  0xc1   : > { %1018 = vmatpush1.bf16.msra.mxu0 %v2799_v15 }
  0xc2   : > { %1019 = vmatprep.subr.bf16.mxu0 %v2800_v16 }
  0xc3   : > { %2597 = vmatpush3.bf16.msra.mxu1 %v2808_v43 }
  0xc4   : > { %2598 = vmatprep.subr.bf16.mxu1 %v3051_v20 }
  0xc5   : > { %1020 = vmatpush1.bf16.msra.mxu0 %v2802_v17 }
  0xc6   : > { %2606 = vmatprep.subr.bf16.mxu0 %v3051_v20 }
  0xc7   : > { %2599 = vmatpush3.bf16.msra.mxu1 %v2809_v46 }
  0xc8   : > { %1038 = vmatmul.mubr.bf16.vlgmr.msra.gmra.mrb[0].mxu0 %v3424_v19  ;;  %2600 = vmatprep.subr.bf16.mxu1 %v3051_v20 }
  0xc9   : > { %2608 = vmatprep.mubr.msk.bf16.mxu0 %vm3052_vm0, %v3051_v20 }
  0xcb   : > { %2601 = vmatpush3.bf16.msra.mxu1 %v2810_v47 }
  0xcc   : > { %2612 = vmatprep.subr.bf16.mxu1 %v3051_v20 }
  0xce   : > { %2603 = vmatmul.mubr.bf16.vlgmr.msra.gmra.mrb[0].mxu1 %v3424_v19 }
  0xcf   : > { %2614 = vmatprep.mubr.msk.bf16.mxu1 %vm3052_vm0, %v3051_v20 }
 0x19b   : > { %v1039_v28 = vpop.f32.mrb[0].mxu0 }
 0x19c   : > { %v1040_v29 = vadd.f32 %v1039_v28, %v865_v26  ;;  %v1041_v30 = vpop.f32.mrb[1].mxu0  ;;  %v2814_v28 = vld [vmem:[%s3359_s25 + $0x18] sm:$0xff]  }
 0x19d   : > { %v1042_v31 = vadd.f32 %v1041_v30, %v869_v27  ;;  %v1043_v32 = vpop.f32.mrb[2].mxu0  ;;  %v2813_v27 = vld [vmem:[%s3359_s25 + $0x10] sm:$0xff]  }
 0x19e   : > { %v1044_v33 = vpop.f32.mrb[3].mxu0  ;;  %v1086_v34 = vmul.f32 0.17677669, %v1040_v29 }
 0x19f   : > { %v3446_v35 = vpack.c.bf16 %v1042_v31, %v1042_v31 }
 0x1a0   : > { %v3452_v37 = vpack.c.bf16 %v1086_v34, %v1086_v34  ;;  %v2811_v34 = vld [vmem:[%s3359_s25] sm:$0xff]  }
 0x1a1   : > { %1202 = vrot.lane.b32.xlu0 %v3446_v35, %s3053_s4  ;;  %v1095_v36 = vsel %vm1090_vm1, %v3446_v35, 0  ;;  %v1080_v1 = vpop.f32.mrb[0].mxu1 }
 0x1a2   : > { %2607 = vmatpush3.bf16.xpose.msra.mxu0 %v1095_v36  ;;  %v2604_v2 = vpop.f32.mrb[1].mxu1  ;;  %v1081_v10 = vadd.f32 %v1080_v1, %v873_v9 }
 0x1a3   : > { %2618 = vmatprep.subr.bf16.mxu0 %v3051_v20  ;;  %v1083_v4 = vpop.f32.mrb[2].mxu1 }
 0x1a4   : > { %v2605_v5 = vpop.f32.mrb[3].mxu1  ;;  %v3499_v11 = vpack.c.bf16 %v1081_v10, %v1081_v10 }
 0x1a5   : > { %1199 = vrot.lane.b32.xlu0 %v3452_v37, %s3053_s4 }
 0x1a6   : > { %v1155_v12 = vsel %vm1153_vm3, %v3499_v11, 0 }
 0x1a7   : > { %2613 = vmatpush3.bf16.msra.mxu1 %v1155_v12 }
 0x1a8   : > { %2624 = vmatprep.subr.bf16.mxu1 %v3051_v20 }
 0x1a9   : > { %2609 = vmatmul.mubr.msk.bf16.vlgmr.msra.gmra.mrb[4].mxu0 %vm1090_vm1, %v3452_v37 }
 0x1aa   : > { %2620 = vmatprep.mubr.msk.bf16.mxu0 %vm3052_vm0, %v3051_v20 }
 0x213   : > { %v1203_v44 = vpop.permute.xlu0 %1202 }
 0x214   : > { %v1208_v45 = vsel %vm1090_vm1, %v1203_v44, 0 }
 0x215   : > { %2619 = vmatpush3.bf16.xpose.msra.mxu0 %v1208_v45 }
 0x216   : > { %2630 = vmatprep.subr.bf16.mxu0 %v3051_v20 }
 0x217   : > { %v1200_v48 = vpop.permute.xlu0 %1199 }
 0x21c   : > { %2621 = vmatmul.mubr.msk.bf16.vlgmr.msra.gmra.mrb[8].mxu0 %vm1090_vm1, %v1200_v48 }
 0x21d   : > { %2634 = vmatprep.mubr.msk.bf16.mxu0 %vm3052_vm0, %v3051_v20  ;;  %2631 = vmatpush3.bf16.msra.mxu0 %v2813_v27 }
 0x21e   : > { %2632 = vmatprep.subr.bf16.mxu0 %v3051_v20 }
 0x221   : > { %2633 = vmatpush3.bf16.msra.mxu0 %v2814_v28 }
 0x222   : > { %2646 = vmatprep.subr.bf16.mxu0 %v3051_v20 }
 0x27c   : > { %v1131_v50 = vpop.f32.mrb[4].mxu0 }
 0x27d   : > { %v1132_v51 = vadd.f32 %v1131_v50, %v3490_v49  ;;  %v2610_v52 = vpop.f32.mrb[5].mxu0 }
 0x27e   : > { %v1134_v53 = vpop.f32.mrb[6].mxu0 }
 0x27f   : > { %v2611_v54 = vpop.f32.mrb[7].mxu0  ;;  %v1138_v55 = vsel %vm1137_vm2, %v1132_v51, -inf }
 0x280   : > { %1139 = vmax.xlane.f32.xlu1 %v1138_v55 }
 0x2ef   : > { %v1244_v56 = vpop.f32.mrb[8].mxu0 }
 0x2f0   : > { %v1245_v57 = vadd.f32 %v1244_v56, %v3490_v49  ;;  %v2622_v58 = vpop.f32.mrb[9].mxu0 }
 0x2f1   : > { %v1247_v59 = vpop.f32.mrb[10].mxu0 }
 0x2f2   : > { %v2623_v60 = vpop.f32.mrb[11].mxu0  ;;  %v1250_v61 = vsel %vm1137_vm2, %v1245_v57, -inf }
 0x2f3   : > { %1251 = vmax.xlane.f32.xlu1 %v1250_v61 }
 0x30d   : > { %v1140_v62 = vpop.xlane.xlu1 %1139 }
 0x30e   : > { %v1141_v63 = vsub.f32 %v1132_v51, %v1140_v62 }
 0x310   : > { %v1142_v0 = vmul.f32 1.442695, %v1141_v63 }
 0x312   : > { %2859 = vpow2.f32 %v1142_v0 }
 0x31c   : > { %v2860_v6 = vpop.eup %2859 }
 0x31d   : > { %v1144_v7 = vsel %vm1137_vm2, %v2860_v6, 0.0 }
 0x31e   : > { %1145 = vadd.xlane.f32.xlu0 %v1144_v7 }
 0x334   : > { %1484 = vrot.lane.b32.xlu0 %v3499_v11, %s3054_s27 }
 0x380   : > { %v1252_v13 = vpop.xlane.xlu1 %1251 }
 0x381   : > { %v1253_v14 = vsub.f32 %v1245_v57, %v1252_v13  ;;  %v2815_v13 = vld [vmem:[%s3359_s25 + $0x20] sm:$0xff]  }
 0x383   : > { %v1254_v15 = vmul.f32 1.442695, %v1253_v14 }
 0x385   : > { %2861 = vpow2.f32 %v1254_v15 }
 0x38f   : > { %v2862_v16 = vpop.eup %2861 }
 0x390   : > { %v1256_v17 = vsel %vm1137_vm2, %v2862_v16, 0.0 }
 0x391   : > { %1257 = vadd.xlane.f32.xlu1 %v1256_v17 }
 0x3a2   : > { %1263 = vrot.lane.b32.xlu1 %v3499_v11, %s3053_s4 }
 0x3a6   : > { %1424 = vrot.lane.b32.xlu1 %v3446_v35, %s3054_s27 }
 0x3aa   : > { %1422 = vrot.lane.b32.xlu1 %v3452_v37, %s3054_s27 }
 0x3ab   : > { %v1146_v19 = vpop.xlane.xlu0 %1145 }
 0x3ac   : > { %2863 = vrcp.f32 %v1146_v19 }
 0x3af   : > { %v1485_v39 = vpop.permute.xlu0 %1484 }
 0x3b0   : > { %v1490_v44 = vsel %vm1153_vm3, %v1485_v39, 0 }
 0x3b6   : > { %v2864_v21 = vpop.eup %2863 }
 0x3b7   : > { %v1148_v24 = vmul.f32 %v2864_v21, %v2860_v6 }
 0x3b9   : > { %v1149_v26 = vpack.c.bf16 %v1148_v24, %v1148_v24 }
 0x3bb   : > { %2615 = vmatmul.mubr.msk.bf16.vlgmr.msra.gmra.mrb[4].mxu1 %vm1137_vm2, %v1149_v26 }
 0x3bc   : > { %2626 = vmatprep.mubr.msk.bf16.mxu1 %vm3052_vm0, %v3051_v20 }
 0x41e   : > { %v1258_v29 = vpop.xlane.xlu1 %1257 }
 0x41f   : > { %2865 = vrcp.f32 %v1258_v29 }
 0x422   : > { %v1264_v30 = vpop.permute.xlu1 %1263 }
 0x423   : > { %v1269_v31 = vsel %vm1153_vm3, %v1264_v30, 0 }
 0x424   : > { %2625 = vmatpush3.bf16.msra.mxu1 %v1269_v31 }
 0x425   : > { %2638 = vmatprep.subr.bf16.mxu1 %v3051_v20 }
 0x426   : > { %v1425_v46 = vpop.permute.xlu1 %1424 }
 0x427   : > { %v1430_v52 = vsel %vm1090_vm1, %v1425_v46, 0 }
 0x429   : > { %v2866_v32 = vpop.eup %2865 }
 0x42a   : > { %v1260_v33 = vmul.f32 %v2866_v32, %v2862_v16  ;;  %v1423_v54 = vpop.permute.xlu1 %1422 }
 0x42c   : > { %v1261_v36 = vpack.c.bf16 %v1260_v33, %v1260_v33 }
 0x42e   : > { %2627 = vmatmul.mubr.msk.bf16.vlgmr.msra.gmra.mrb[8].mxu1 %vm1137_vm2, %v1261_v36 }
 0x42f   : > { %2639 = vmatpush3.bf16.msra.mxu1 %v2811_v34  ;;  %2642 = vmatprep.mubr.msk.bf16.mxu1 %vm3052_vm0, %v3051_v20 }
 0x430   : > { %2640 = vmatprep.subr.bf16.mxu1 %v3051_v20 }
 0x433   : > { %2641 = vmatpush3.bf16.msra.mxu1 %v2812_v38 }
 0x434   : > { %2652 = vmatprep.subr.bf16.mxu1 %v3051_v20 }
 0x48e   : > { %v1191_v40 = vpop.f32.mrb[4].mxu1 }
 0x48f   : > { %v1197_v41 = vpack.c.bf16 %v1191_v40, %v1191_v40  ;;  %v2616_v42 = vpop.f32.mrb[5].mxu1 }
 0x490   : > { %v1194_v43 = vpop.f32.mrb[6].mxu1 }
 0x491   : > { %v2617_v45 = vpop.f32.mrb[7].mxu1  ;;  %2643 = vmatmul.mubr.msk.bf16.vlgmr.msra.gmra.mrb[12].mxu1 %vm1090_vm1, %v1197_v41  ;;  %v2817_v43 = vld [vmem:[%s3359_s25 + $0x30] sm:$0xff]  }
 0x492   : > { %2653 = vmatpush3.bf16.msra.mxu1 %v1490_v44  ;;  %2654 = vmatprep.mubr.msk.bf16.mxu1 %vm3052_vm0, %v3051_v20 }
 0x493   : > { %2666 = vmatprep.subr.bf16.mxu1 %v3051_v20 }
 0x501   : > { %v1305_v47 = vpop.f32.mrb[8].mxu1 }
 0x502   : > { %v1311_v48 = vpack.c.bf16 %v1305_v47, %v1305_v47  ;;  %v2628_v50 = vpop.f32.mrb[9].mxu1 }
 0x503   : > { %v1308_v51 = vpop.f32.mrb[10].mxu1 }
 0x504   : > { %v2629_v53 = vpop.f32.mrb[11].mxu1  ;;  %2635 = vmatmul.mubr.msk.bf16.vlgmr.msra.gmra.mrb[12].mxu0 %vm1090_vm1, %v1311_v48 }
 0x505   : > { %2647 = vmatpush3.bf16.xpose.msra.mxu0 %v1430_v52  ;;  %2648 = vmatprep.mubr.msk.bf16.mxu0 %vm3052_vm0, %v3051_v20 }
 0x506   : > { %2658 = vmatprep.subr.bf16.mxu0 %v3051_v20 }
 0x50c   : > { %2649 = vmatmul.mubr.msk.bf16.vlgmr.msra.gmra.mrb[16].mxu0 %vm1090_vm1, %v1423_v54 }
 0x50d   : > { %2662 = vmatprep.mubr.msk.bf16.mxu0 %vm3052_vm0, %v3051_v20  ;;  %2659 = vmatpush3.bf16.msra.mxu0 %v2815_v13  ;;  %v2830_v13 = vld [vmem:[%s3323_s7 + $0x34] ss:$8 sps:$4 sm:$0xff]  }
 0x50e   : > { %2660 = vmatprep.subr.bf16.mxu0 %v3051_v20 }
 0x564   : > { %v1416_v55 = vpop.f32.mrb[12].mxu1 }
 0x565   : > { %v2644_v56 = vpop.f32.mrb[13].mxu1 }
 0x566   : > { %v1419_v57 = vpop.f32.mrb[14].mxu1 }
 0x567   : > { %v2645_v58 = vpop.f32.mrb[15].mxu1 }
 0x5d7   : > { %v1361_v59 = vpop.f32.mrb[12].mxu0 }
 0x5d8   : > { %v3539_v60 = vadd.f32 %v1416_v55, %v1361_v59  ;;  %v2636_v61 = vpop.f32.mrb[13].mxu0  ;;  %v2481_v59 = vld [vmem:[%s3758_s13] ss:$0 sm:$0xff] }
 0x5d9   : > { %v1364_v62 = vpop.f32.mrb[14].mxu0 }
 0x5da   : > { %v2637_v63 = vpop.f32.mrb[15].mxu0 }
 0x5df   : > { %v1466_v0 = vpop.f32.mrb[16].mxu0 }
 0x5e0   : > { %v1467_v1 = vadd.f32 %v1466_v0, %v3490_v49  ;;  %v2650_v2 = vpop.f32.mrb[17].mxu0 }
 0x5e1   : > { %v1469_v4 = vpop.f32.mrb[18].mxu0  ;;  %v2819_v2 = vld [vmem:[%s3323_s7] ss:$8 sps:$4 sm:$0xff]  }
 0x5e2   : > { %v2651_v5 = vpop.f32.mrb[19].mxu0  ;;  %v1472_v6 = vsel %vm1137_vm2, %v1467_v1, -inf  ;;  %v2821_v4 = vld [vmem:[%s3323_s7 + $0x4] ss:$8 sps:$4 sm:$0xff]  }
 0x5e3   : > { %1473 = vmax.xlane.f32.xlu1 %v1472_v6  ;;  %v2824_v5 = vld [vmem:[%s3323_s7 + $0x14] ss:$8 sps:$4 sm:$0xff]   ;;  %v2822_v6 = vld [vmem:[%s3323_s7 + $0x10] ss:$8 sps:$4 sm:$0xff]  }
 0x670   : > { %v1474_v7 = vpop.xlane.xlu1 %1473 }
 0x671   : > { %v1475_v8 = vsub.f32 %v1467_v1, %v1474_v7  ;;  %v2827_v7 = vld [vmem:[%s3323_s7 + $0x24] ss:$8 sps:$4 sm:$0xff]  }
 0x673   : > { %v1476_v9 = vmul.f32 1.442695, %v1475_v8  ;;  %v2825_v8 = vld [vmem:[%s3323_s7 + $0x20] ss:$8 sps:$4 sm:$0xff]  }
 0x675   : > { %2867 = vpow2.f32 %v1476_v9 }
 0x67f   : > { %v2868_v10 = vpop.eup %2867 }
 0x680   : > { %v1478_v12 = vsel %vm1137_vm2, %v2868_v10, 0.0 }
 0x681   : > { %1479 = vadd.xlane.f32.xlu0 %v1478_v12 }
 0x697   : > { %1591 = vrot.lane.b32.xlu0 %v3446_v35, %s3055_s6 }
 0x69b   : > { %1589 = vrot.lane.b32.xlu0 %v3452_v37, %s3055_s6  ;;  %v2816_v37 = vld [vmem:[%s3359_s25 + $0x28] sm:$0xff]  }
 0x69c   : > { %2661 = vmatpush3.bf16.msra.mxu0 %v2816_v37  ;;  %v2842_v37 = vld [vmem:[%s3323_s7 + $0x74] ss:$8 sps:$4 sm:$0xff]  }
 0x69d   : > { %2672 = vmatprep.subr.bf16.mxu0 %v3051_v20 }
 0x70e   : > { %v1480_v14 = vpop.xlane.xlu0 %1479 }
 0x70f   : > { %2869 = vrcp.f32 %v1480_v14  ;;  %v2828_v14 = vld [vmem:[%s3323_s7 + $0x30] ss:$8 sps:$4 sm:$0xff]  }
 0x712   : > { %v1592_v17 = vpop.permute.xlu0 %1591 }
 0x713   : > { %v1597_v21 = vsel %vm1090_vm1, %v1592_v17, 0  ;;  %v2836_v17 = vld [vmem:[%s3323_s7 + $0x54] ss:$8 sps:$4 sm:$0xff]  }
 0x716   : > { %v1590_v35 = vpop.permute.xlu0 %1589 }
 0x719   : > { %v2870_v15 = vpop.eup %2869 }
 0x71a   : > { %v1482_v16 = vmul.f32 %v2870_v15, %v2868_v10  ;;  %v2833_v15 = vld [vmem:[%s3323_s7 + $0x44] ss:$8 sps:$4 sm:$0xff]  }
 0x71c   : > { %v1483_v19 = vpack.c.bf16 %v1482_v16, %v1482_v16  ;;  %v2831_v16 = vld [vmem:[%s3323_s7 + $0x40] ss:$8 sps:$4 sm:$0xff]  }
 0x71e   : > { %2655 = vmatmul.mubr.msk.bf16.vlgmr.msra.gmra.mrb[16].mxu1 %vm1137_vm2, %v1483_v19  ;;  %v2834_v19 = vld [vmem:[%s3323_s7 + $0x50] ss:$8 sps:$4 sm:$0xff]  }
 0x71f   : > { %2667 = vmatpush3.bf16.xpose.msra.mxu1 %v1597_v21  ;;  %2668 = vmatprep.mubr.msk.bf16.mxu1 %vm3052_vm0, %v3051_v20  ;;  %v2839_v21 = vld [vmem:[%s3323_s7 + $0x64] ss:$8 sps:$4 sm:$0xff]  }
 0x720   : > { %2678 = vmatprep.subr.bf16.mxu1 %v3051_v20 }
 0x726   : > { %2669 = vmatmul.mubr.msk.bf16.vlgmr.msra.gmra.mrb[20].mxu1 %vm1090_vm1, %v1590_v35  ;;  %v2837_v35 = vld [vmem:[%s3323_s7 + $0x60] ss:$8 sps:$4 sm:$0xff]  }
 0x727   : > { %2682 = vmatprep.mubr.msk.bf16.mxu1 %vm3052_vm0, %v3051_v20  ;;  %2679 = vmatpush3.bf16.msra.mxu1 %v2817_v43 }
 0x728   : > { %2680 = vmatprep.subr.bf16.mxu1 %v3051_v20 }
 0x7f1   : > { %v1526_v24 = vpop.f32.mrb[16].mxu1 }
 0x7f2   : > { %v1532_v26 = vpack.c.bf16 %v1526_v24, %v1526_v24  ;;  %v2656_v27 = vpop.f32.mrb[17].mxu1  ;;  %v2840_v24 = vld [vmem:[%s3323_s7 + $0x70] ss:$8 sps:$4 sm:$0xff]  }
 0x7f3   : > { %v1529_v28 = vpop.f32.mrb[18].mxu1 }
 0x7f4   : > { %v2657_v29 = vpop.f32.mrb[19].mxu1  ;;  %2663 = vmatmul.mubr.msk.bf16.vlgmr.msra.gmra.mrb[20].mxu0 %vm1090_vm1, %v1532_v26 }
 0x7f5   : > { %2674 = vmatprep.mubr.msk.bf16.mxu0 %vm3052_vm0, %v3051_v20  ;;  %v2818_v20 = vld [vmem:[%s3359_s25 + $0x38] sm:$0xff]   ;;  %s3759_s25 = sld [smem:[#allocation18_spill]] }
 0x7f6   : > { %2681 = vmatpush3.bf16.msra.mxu1 %v2818_v20 }
 0x7f9   : > { %v1633_v30 = vpop.f32.mrb[20].mxu1 }
 0x7fa   : > { %v1634_v31 = vadd.f32 %v1633_v30, %v3490_v49  ;;  %v2670_v32 = vpop.f32.mrb[21].mxu1 }
 0x7fb   : > { %v1636_v33 = vpop.f32.mrb[22].mxu1  ;;  %v2843_v26 = vld [vmem:[%s3759_s25 + $0x40] sm:$0xff]   ;;  %v2845_v28 = vld [vmem:[%s3759_s25 + $0x48] sm:$0xff]   ;;  %v2847_v30 = vld [vmem:[%s3759_s25 + $0x50] sm:$0xff]  }
 0x7fc   : > { %v2671_v34 = vpop.f32.mrb[23].mxu1  ;;  %v1639_v36 = vsel %vm1137_vm2, %v1634_v31, -inf  ;;  %v2844_v27 = vld [vmem:[%s3759_s25] sm:$0xff]   ;;  %2564 = vmatprep.subr.bf16.mxu1 %v2843_v26  ;;  %v2846_v29 = vld [vmem:[%s3759_s25 + $0x8] sm:$0xff]   ;;  %v2849_v32 = vld [vmem:[%s3759_s25 + $0x58] sm:$0xff]  }
 0x7fd   : > { %1640 = vmax.xlane.f32.xlu0 %v1639_v36  ;;  %v2850_v33 = vld [vmem:[%s3759_s25 + $0x18] sm:$0xff]   ;;  %v2851_v34 = vld [vmem:[%s3759_s25 + $0x60] sm:$0xff]  }
 0x7fe   : > { %v2852_v36 = vld [vmem:[%s3759_s25 + $0x20] sm:$0xff]  }
 0x88a   : > { %v1641_v38 = vpop.xlane.xlu0 %1640 }
 0x88b   : > { %v1642_v39 = vsub.f32 %v1634_v31, %v1641_v38  ;;  %v2848_v31 = vld [vmem:[%s3759_s25 + $0x10] sm:$0xff]   ;;  %v2853_v38 = vld [vmem:[%s3759_s25 + $0x68] sm:$0xff]  }
 0x88d   : > { %v1643_v40 = vmul.f32 1.442695, %v1642_v39  ;;  %v2854_v39 = vld [vmem:[%s3759_s25 + $0x28] sm:$0xff]  }
 0x88f   : > { %2871 = vpow2.f32 %v1643_v40 }
 0x899   : > { %v2872_v41 = vpop.eup %2871 }
 0x89a   : > { %v1645_v42 = vsel %vm1137_vm2, %v2872_v41, 0.0 }
 0x89b   : > { %1646 = vadd.xlane.f32.xlu1 %v1645_v42 }
 0x8ac   : > { %1651 = vrot.lane.b32.xlu1 %v3499_v11, %s3055_s6 }
 0x8c7   : > { %v1582_v49 = vpop.f32.mrb[20].mxu0 }
 0x8c8   : > { %v1588_v44 = vadd.f32 %v1582_v49, %v3539_v60  ;;  %v2664_v45 = vpop.f32.mrb[21].mxu0  ;;  %v2482_v49 = vld [vmem:[%s3761_s9] ss:$0 sm:$0xff] }
 0x8c9   : > { %v1585_v46 = vpop.f32.mrb[22].mxu0  ;;  %v2483_v45 = vld [vmem:[%s786_s28] ss:$0 sm:$0xff] }
 0x8ca   : > { %v2665_v47 = vpop.f32.mrb[23].mxu0 }
 0x928   : > { %v1647_v48 = vpop.xlane.xlu1 %1646 }
 0x929   : > { %2873 = vrcp.f32 %v1647_v48 }
 0x92c   : > { %v1652_v50 = vpop.permute.xlu1 %1651 }
 0x92d   : > { %v1657_v51 = vsel %vm1153_vm3, %v1652_v50, 0  ;;  %v2855_v50 = vld [vmem:[%s3759_s25 + $0x70] sm:$0xff]  }
 0x92e   : > { %2673 = vmatpush3.bf16.msra.mxu0 %v1657_v51  ;;  %v2856_v51 = vld [vmem:[%s3759_s25 + $0x30] sm:$0xff]  }
 0x92f   : > { %1934 = vmatprep.subr.bf16.mxu0 %v2821_v4 }
 0x933   : > { %v2874_v52 = vpop.eup %2873 }
 0x934   : > { %v1649_v11 = vmul.f32 %v2874_v52, %v2872_v41  ;;  %v2857_v52 = vld [vmem:[%s3759_s25 + $0x78] sm:$0xff]  }
 0x936   : > { %v1650_v53 = vpack.c.bf16 %v1649_v11, %v1649_v11  ;;  %v2858_v11 = vld [vmem:[%s3759_s25 + $0x38] sm:$0xff]  }
 0x938   : > { %2675 = vmatmul.mubr.msk.bf16.vlgmr.msra.gmra.mrb[24].mxu0 %vm1137_vm2, %v1650_v53  ;;  %v1808_v53 = vld [vmem:[%s3387_s15] sm:$0x3] }
 0x939   : > { %1966 = vmatprep.mubr.bf16.mxu0 %v3050_v3  ;;  %1935 = vmatpush1.bf16.msra.mxu0 %v2819_v2  ;;  %v1847_v20 = vrot.slane %v1808_v53, %v864_v23  ;;  %v2500_v23 = vld [vmem:[%s793_s21] ss:$0 sm:$0xff] }
 0x93a   : > { %1936 = vmatprep.subr.bf16.mxu0 %v2824_v5 }
 0x93d   : > { %1937 = vmatpush1.bf16.msra.mxu0 %v2822_v6 }
 0x93e   : > { %1938 = vmatprep.subr.bf16.mxu0 %v2827_v7 }
 0x941   : > { %1939 = vmatpush1.bf16.msra.mxu0 %v2825_v8 }
 0x942   : > { %1940 = vmatprep.subr.bf16.mxu0 %v2830_v13 }
 0x945   : > { %1941 = vmatpush1.bf16.msra.mxu0 %v2828_v14  ;;  %v2517_v14 = vld [vmem:[%s658_s18] ss:$0 sm:$0xff] }
 0x946   : > { %1942 = vmatprep.subr.bf16.mxu0 %v2833_v15 }
 0x949   : > { %1943 = vmatpush1.bf16.msra.mxu0 %v2831_v16  ;;  %v2518_v16 = vld [vmem:[%s796_s0] ss:$0 sm:$0xff]  ;;  %s3765_s0 = sld [smem:[#allocation32_spill]] (!%p2519_p4) }
 0x94a   : > { %1944 = vmatprep.subr.bf16.mxu0 %v2836_v17 }
 0x94d   : > { %1945 = vmatpush1.bf16.msra.mxu0 %v2834_v19 }
 0x94e   : > { %1946 = vmatprep.subr.bf16.mxu0 %v2839_v21 }
 0x951   : > { %1947 = vmatpush1.bf16.msra.mxu0 %v2837_v35 }
 0x952   : > { %1948 = vmatprep.subr.bf16.mxu0 %v2842_v37 }
 0x955   : > { %1949 = vmatpush1.bf16.msra.mxu0 %v2840_v24 }
 0xa0b   : > { %v1693_v54 = vpop.f32.mrb[24].mxu0 }
 0xa0c   : > { %v1699_v55 = vpack.c.bf16 %v1693_v54, %v1693_v54  ;;  %v2676_v56 = vpop.f32.mrb[25].mxu0  ;;  %v1851_v54 = vrot.slane %v1808_v53, %v868_v25 }
 0xa0d   : > { %v1696_v57 = vpop.f32.mrb[26].mxu0 }
 0xa0e   : > { %v2677_v58 = vpop.f32.mrb[27].mxu0  ;;  %2683 = vmatmul.mubr.msk.bf16.vlgmr.msra.gmra.mrb[24].mxu1 %vm1090_vm1, %v1699_v55 }
 0xa0f   : > { %2565 = vmatpush3.bf16.msra.mxu1 %v2844_v27 }
 0xa10   : > { %2566 = vmatprep.subr.bf16.mxu1 %v2845_v28 }
 0xa13   : > { %2567 = vmatpush3.bf16.msra.mxu1 %v2846_v29 }
 0xa14   : > { %2568 = vmatprep.subr.bf16.mxu1 %v2847_v30  ;;  %v2520_v30 = vld [vmem:[%s3765_s0] ss:$0 sm:$0xff] (!%p2519_p4) }
 0xa17   : > { %2569 = vmatpush3.bf16.msra.mxu1 %v2848_v31 }
 0xa18   : > { %2570 = vmatprep.subr.bf16.mxu1 %v2849_v32  ;;  %v2521_v32 = vld [vmem:[%s3766_s29] ss:$0 sm:$0xff] (!%p2519_p4) }
 0xa1b   : > { %2571 = vmatpush3.bf16.msra.mxu1 %v2850_v33 }
 0xa1c   : > { %2572 = vmatprep.subr.bf16.mxu1 %v2851_v34 }
 0xa1f   : > { %2573 = vmatpush3.bf16.msra.mxu1 %v2852_v36 }
 0xa20   : > { %2574 = vmatprep.subr.bf16.mxu1 %v2853_v38 }
 0xa23   : > { %2575 = vmatpush3.bf16.msra.mxu1 %v2854_v39 }
 0xa24   : > { %2576 = vmatprep.subr.bf16.mxu1 %v2855_v50 }
 0xa27   : > { %2577 = vmatpush3.bf16.msra.mxu1 %v2856_v51 }
 0xa28   : > { %2578 = vmatprep.subr.bf16.mxu1 %v2857_v52 }
 0xa2b   : > { %2579 = vmatpush3.bf16.msra.mxu1 %v2858_v11 }
 0xae1   : > { %v1749_v3 = vpop.f32.mrb[24].mxu1 }
 0xae2   : > { %v1755_v60 = vadd.f32 %v1749_v3, %v1588_v44  ;;  %v2684_v61 = vpop.f32.mrb[25].mxu1 }
 0xae3   : > { %v1752_v62 = vpop.f32.mrb[26].mxu1 }
 0xae4   : > { %v1762_v63 = vadd.f32 %v2481_v59, %v1755_v60  ;;  %v2685_v0 = vpop.f32.mrb[27].mxu1 }
 0xae6   : > { %v1763_v1 = vadd.f32 %v1762_v63, %v3420_v18 }
 0xae8   : > { %1766 = vadd.xlane.f32.xlu1 %v1763_v1 }
 0xb75   : > { %v1767_v18 = vpop.xlane.xlu1 %1766 }
 0xb76   : > { %v1769_v9 = vmul.f32 0.0078125, %v1767_v18 }
 0xb78   : > { %v1770_v10 = vsub.f32 %v1763_v1, %v1769_v9 }
 0xb7a   : > { %v1771_v12 = vmul.f32 %v1770_v10, %v1770_v10 }
 0xb7c   : > { %1772 = vadd.xlane.f32.xlu0 %v1771_v12 }
 0xc09   : > { %v1773_v40 = vpop.xlane.xlu0 %1772 }
 0xc0a   : > { %v1774_v41 = vmul.f32 0.0078125, %v1773_v40 }
 0xc0c   : > { %v1775_v42 = vadd.f32 1e-05, %v1774_v41 }
 0xc0e   : > { %2875 = vrsqrt.f32 %v1775_v42 }
 0xc18   : > { %v2876_v43 = vpop.eup %2875 }
 0xc19   : > { %v1777_v44 = vmul.f32 %v2876_v43, %v1770_v10 }
 0xc1b   : > { %v1784_v46 = vmul.f32 %v2482_v49, %v1777_v44 }
 0xc1d   : > { %v1791_v47 = vadd.f32 %v2483_v45, %v1784_v46 }
 0xc1f   : > { %v1842_v48 = vpack.c.bf16 %v1791_v47, %v1791_v47 }
 0xc21   : > { %1967 = vmatmul.mubr.bf16.vlgmr.msra.gmra.mrb[28].mxu0 %v1842_v48 }
 0xcf4   : > { %v1968_v55 = vpop.f32.mrb[28].mxu0 }
 0xcf5   : > { %v1969_v56 = vadd.f32 %v1968_v55, %v1847_v20  ;;  %v1970_v57 = vpop.f32.mrb[29].mxu0 }
 0xcf6   : > { %v1971_v58 = vadd.f32 %v1970_v57, %v1851_v54  ;;  %v1972_v59 = vpop.f32.mrb[30].mxu0 }
 0xcf7   : > { %v1975_v3 = vmax.f32 %v1969_v56, 0.0  ;;  %v1973_v60 = vpop.f32.mrb[31].mxu0 }
 0xcf8   : > { %v1976_v61 = vmax.f32 %v1971_v58, 0.0 }
 0xcf9   : > { %v1977_v63 = vpack.c.bf16 %v1975_v3, %v1975_v3 }
 0xcfa   : > { %v1978_v62 = vpack.c.bf16 %v1976_v61, %v1976_v61 }
 0xcfc   : > { %2113 = vmatprep.mubr.bf16.mxu1 %v1978_v62 }
 0xcfd   : > { %2114 = vmatmul.mubr.bf16.vlgmr.msra.gmra.mrb[28].mxu1 %v1977_v63 }
 0xdd0   : > { %v2580_v0 = vpop.f32.mrb[28].mxu1 }
 0xdd1   : > { %v2581_v22 = vpop.f32.mrb[29].mxu1 }
 0xdd2   : > { %v2582_v25 = vadd.f32 %v2581_v22, %v2580_v0  ;;  %v2583_v1 = vpop.f32.mrb[30].mxu1 }
 0xdd3   : > { %v2584_v2 = vpop.f32.mrb[31].mxu1 }
 0xdd4   : > { %v2116_v4 = vadd.f32 %v2582_v25, %v2500_v23 }
 0xdd6   : > { %v2121_v5 = vadd.f32 %v2116_v4, %v1791_v47 }
 0xdd8   : > { %2124 = vadd.xlane.f32.xlu0 %v2121_v5 }
 0xe65   : > { %v2125_v6 = vpop.xlane.xlu0 %2124 }
 0xe66   : > { %v2126_v7 = vmul.f32 0.0078125, %v2125_v6 }
 0xe68   : > { %v2127_v8 = vsub.f32 %v2121_v5, %v2126_v7 }
 0xe6a   : > { %v2128_v18 = vmul.f32 %v2127_v8, %v2127_v8 }
 0xe6c   : > { %2129 = vadd.xlane.f32.xlu0 %v2128_v18 }
 0xef9   : > { %v2130_v9 = vpop.xlane.xlu0 %2129 }
 0xefa   : > { %v2131_v10 = vmul.f32 0.0078125, %v2130_v9 }
 0xefc   : > { %v2132_v12 = vadd.f32 1e-05, %v2131_v10 }
 0xefe   : > { %2877 = vrsqrt.f32 %v2132_v12 }
 0xf08   : > { %v2878_v13 = vpop.eup %2877 }
 0xf09   : > { %v2134_v15 = vmul.f32 %v2878_v13, %v2127_v8  ;;  %2153 = sbr.rel (%p2519_p4) target bundleno = 4167 (0x1047), region = 104 }
 0xf0b   : > { %v2141_v17 = vmul.f32 %v2517_v14, %v2134_v15 }
 0xf0d   : > { %v2148_v19 = vadd.f32 %v2518_v16, %v2141_v17 }
 0xf0f   : > { %2149 = vst [vmem:[#allocation2] sm:$0xff] %v2148_v19  ;;  %2156 = vadd.xlane.f32.xlu0 (!%p2519_p4), %v2148_v19 }
 0xf9c   : > { %v2157_v21 = vpop.xlane.xlu0 %2156 }
 0xf9d   : > { %v2158_v35 = vmul.f32 0.0078125, %v2157_v21 }
 0xf9f   : > { %v2159_v37 = vsub.f32 %v2148_v19, %v2158_v35 }
 0xfa1   : > { %v2160_v24 = vmul.f32 %v2159_v37, %v2159_v37 }
 0xfa3   : > { %2161 = vadd.xlane.f32.xlu0 %v2160_v24 }
0x1030   : > { %v2162_v26 = vpop.xlane.xlu0 %2161 }
0x1031   : > { %v2163_v27 = vmul.f32 0.0078125, %v2162_v26 }
0x1033   : > { %v2164_v28 = vadd.f32 1e-05, %v2163_v27 }
0x1035   : > { %2879 = vrsqrt.f32 %v2164_v28 }
0x103f   : > { %v2880_v29 = vpop.eup %2879 }
0x1040   : > { %v2166_v31 = vmul.f32 %v2880_v29, %v2159_v37 }
0x1042   : > { %v2173_v33 = vmul.f32 %v2520_v30, %v2166_v31 }
0x1044   : > { %v2180_v34 = vadd.f32 %v2521_v32, %v2173_v33 }
0x1046   : > { %2181 = vst [vmem:[%s800_s20] sm:$0xff] %v2180_v34 }
0x1047 PF: > { %s3768_s6 = sld [smem:[#allocation14_spill]]  ;;  %s3769_s21 = sld [smem:[#allocation10_spill]] }
0x1048   : > { %s3770_s22 = sld [smem:[#allocation11_spill]]  ;;  %s3771_s23 = sld [smem:[#allocation17_spill]] }
0x1049   : > { %s3772_s24 = sld [smem:[#allocation12_spill]]  ;;  %s3773_s25 = sld [smem:[#allocation13_spill]] }
0x104a   : > { %s3774_s26 = sld [smem:[#allocation15_spill]]  ;;  %s3775_s27 = sld [smem:[#allocation16_spill]] }
0x104d   : > { %s32_s28 = sadd.s32 1, %s3768_s6  }
0x104e   : > { %p29_p9 = scmp.ge.s32.totalorder %s32_s28, 6  }
0x1050   :  { %31 = sbr.rel (!%p29_p9) target bundleno = 24 (0x18), region = 189 }
0x1057   :  { %2201 = vsyncpa [#allocation4], 1 }
0x1058   :  { %2203 = vsyncpa [#allocation4 + $0x1], 1 }
0x1059   :  { %2204 = vsyncpa [#allocation6], 1 }
0x105a   :  { %2206 = vsyncpa [#allocation6 + $0x1], 1 }

// kernel: transformer_forward.3
= control target key start
LH: loop header
LB: loop body
LE: loop exit
PB: predicated region body
PF: predicated region fallthrough
CT: control target
= control target key end

     0   :  { %s7577_s0 = inlined_call_operand.vmem [shape: f32[2,8,128], index: 0, kind: input, shape index: {}]   ;;  %s7578_s1 = inlined_call_operand.vmem [shape: f32[2,8,128], index: 1, kind: input, shape index: {}]   ;;  %s7579_s2 = inlined_call_operand.vmem [shape: f32[2,8,8], index: 2, kind: input, shape index: {}]   ;;  %s7580_s3 = inlined_call_operand.vmem [shape: f32[2,1,8], index: 3, kind: input, shape index: {}]   ;;  %s7581_s4 = inlined_call_operand.vmem [shape: bf16[2,128,384], index: 4, kind: input, shape index: {}]   ;;  %s7582_s5 = inlined_call_operand.hbm [shape: f32[2,1,384], index: 5, kind: input, shape index: {}]   ;;  %s7583_s6 = inlined_call_operand.hbm [shape: bf16[2,128,128], index: 6, kind: input, shape index: {}]   ;;  %s7584_s7 = inlined_call_operand.hbm [shape: f32[2,1,128], index: 7, kind: input, shape index: {}]   ;;  %s7585_s8 = inlined_call_operand.hbm [shape: f32[2,1,128], index: 8, kind: input, shape index: {}]   ;;  %s7586_s9 = inlined_call_operand.hbm [shape: f32[2,1,128], index: 9, kind: input, shape index: {}]   ;;  %s7587_s10 = inlined_call_operand.hbm [shape: bf16[2,128,128], index: 10, kind: input, shape index: {}]   ;;  %s7588_s11 = inlined_call_operand.hbm [shape: f32[2,1,128], index: 11, kind: input, shape index: {}]   ;;  %s7589_s12 = inlined_call_operand.vmem [shape: bf16[2,128,256], index: 12, kind: input, shape index: {}]   ;;  %s7590_s13 = inlined_call_operand.hbm [shape: f32[2,1,256], index: 13, kind: input, shape index: {}]   ;;  %s7591_s14 = inlined_call_operand.hbm [shape: bf16[2,128,128], index: 14, kind: input, shape index: {}]   ;;  %s7592_s15 = inlined_call_operand.hbm [shape: f32[2,1,128], index: 15, kind: input, shape index: {}]   ;;  %s7593_s16 = inlined_call_operand.hbm [shape: f32[2,1,128], index: 16, kind: input, shape index: {}]   ;;  %s7594_s17 = inlined_call_operand.hbm [shape: f32[2,1,128], index: 17, kind: input, shape index: {}]   ;;  %s7595_s18 = inlined_call_operand.vmem [shape: bf16[2,128,256], index: 18, kind: input, shape index: {}]   ;;  %s7596_s19 = inlined_call_operand.hbm [shape: f32[2,1,256], index: 19, kind: input, shape index: {}]   ;;  %s7597_s20 = inlined_call_operand.vmem [shape: bf16[2,256,128], index: 20, kind: input, shape index: {}]   ;;  %s7598_s21 = inlined_call_operand.hbm [shape: f32[2,1,128], index: 21, kind: input, shape index: {}]   ;;  %s7599_s22 = inlined_call_operand.hbm [shape: f32[2,1,128], index: 22, kind: input, shape index: {}]   ;;  %s7600_s23 = inlined_call_operand.hbm [shape: f32[2,1,128], index: 23, kind: input, shape index: {}]   ;;  %s7601_s24 = inlined_call_operand.vmem [shape: f32[1,128], index: 24, kind: input, shape index: {}]   ;;  %s7602_s25 = inlined_call_operand.hbm [shape: f32[1,128], index: 25, kind: input, shape index: {}]   ;;  %s7603_s26 = inlined_call_operand.hbm [shape: bf16[128,128], index: 26, kind: input, shape index: {}]   ;;  %s7604_s27 = inlined_call_operand.hbm [shape: f32[1,128], index: 27, kind: input, shape index: {}]   ;;  %s7605_s28 = inlined_call_operand.hbm [shape: f32[2,8,128], index: 28, kind: output, shape index: {}]  }
   0x1   :  { %7662 = sst [smem:[#allocation67_spill]] %s7577_s0 }
   0x2   :  { %7663 = sst [smem:[#allocation68_spill]] %s7578_s1 }
   0x3   :  { %7664 = sst [smem:[#allocation69_spill]] %s7579_s2 }
   0x4   :  { %7665 = sst [smem:[#allocation70_spill]] %s7580_s3 }
   0x5   :  { %7666 = sst [smem:[#allocation71_spill]] %s7581_s4 }
   0x6   :  { %7667 = sst [smem:[#allocation72_spill]] %s7582_s5 }
   0x7   :  { %7668 = sst [smem:[#allocation73_spill]] %s7583_s6 }
   0x8   :  { %7669 = sst [smem:[#allocation74_spill]] %s7584_s7 }
   0x9   :  { %7670 = sst [smem:[#allocation75_spill]] %s7585_s8 }
   0xa   :  { %7671 = sst [smem:[#allocation76_spill]] %s7586_s9 }
   0xb   :  { %7672 = sst [smem:[#allocation77_spill]] %s7587_s10 }
   0xc   :  { %7673 = sst [smem:[#allocation78_spill]] %s7588_s11 }
   0xd   :  { %7674 = sst [smem:[#allocation79_spill]] %s7589_s12 }
   0xe   :  { %7675 = sst [smem:[#allocation80_spill]] %s7590_s13 }
   0xf   :  { %7676 = sst [smem:[#allocation81_spill]] %s7591_s14 }
  0x10   :  { %7677 = sst [smem:[#allocation82_spill]] %s7592_s15 }
  0x11   :  { %7678 = sst [smem:[#allocation83_spill]] %s7593_s16 }
  0x12   :  { %7679 = sst [smem:[#allocation84_spill]] %s7594_s17 }
  0x13   :  { %7680 = sst [smem:[#allocation85_spill]] %s7595_s18 }
  0x14   :  { %7681 = sst [smem:[#allocation86_spill]] %s7596_s19 }
  0x15   :  { %7682 = sst [smem:[#allocation87_spill]] %s7597_s20 }
  0x16   :  { %7683 = sst [smem:[#allocation88_spill]] %s7598_s21 }
  0x17   :  { %7684 = sst [smem:[#allocation89_spill]] %s7599_s22 }
  0x18   :  { %7685 = sst [smem:[#allocation90_spill]] %s7600_s23 }
  0x19   :  { %7686 = sst [smem:[#allocation91_spill]] %s7601_s24 }
  0x1a   :  { %7687 = sst [smem:[#allocation92_spill]] %s7602_s25 }
  0x1b   :  { %7688 = sst [smem:[#allocation93_spill]] %s7603_s26 }
  0x1c   :  { %7689 = sst [smem:[#allocation94_spill]] %s7604_s27 }
  0x1d   :  { %7690 = sst [smem:[#allocation95_spill]] %s7605_s28 }
  0x1e   :  { %33 = vsyncpa [#allocation4], 0 }
  0x1f   :  { %35 = vsyncpa [#allocation4 + $0x1], 0 }
  0x20   :  { %36 = vsyncpa [#allocation7], 0 }
  0x21   :  { %38 = vsyncpa [#allocation7 + $0x1], 0 }
  0x22   :  { %39 = vsyncpa [#allocation10], 0 }
  0x23   :  { %41 = vsyncpa [#allocation10 + $0x1], 0 }
  0x24   :  { %42 = vsyncpa [#allocation13], 0 }
  0x25   :  { %44 = vsyncpa [#allocation13 + $0x1], 0 }
  0x26   :  { %45 = vsyncpa [#allocation16], 0 }
  0x27   :  { %47 = vsyncpa [#allocation16 + $0x1], 0 }
  0x28   :  { %48 = vsyncpa [#allocation19], 0 }
  0x29   :  { %50 = vsyncpa [#allocation19 + $0x1], 0 }
  0x2a   :  { %51 = vsyncpa [#allocation22], 0 }
  0x2b   :  { %53 = vsyncpa [#allocation22 + $0x1], 0 }
  0x2c   :  { %54 = vsyncpa [#allocation25], 0 }
  0x2d   :  { %56 = vsyncpa [#allocation25 + $0x1], 0 }
  0x2e   :  { %57 = vsyncpa [#allocation28], 0 }
  0x2f   :  { %59 = vsyncpa [#allocation28 + $0x1], 0 }
  0x30   :  { %60 = vsyncpa [#allocation31], 0 }
  0x31   :  { %61 = vsyncpa [#allocation5], 0 }
  0x32   :  { %63 = vsyncpa [#allocation5 + $0x1], 0  ;;  %s6314_s8 = smov 0   ;;  %s6316_s5 = smov 0  }
  0x33   :  { %s6318_s9 = smov 0   ;;  %s6320_s30 = smov 0  }
  0x34   :  { %s6322_s3 = smov 0   ;;  %s6324_s6 = smov 0  }
  0x35   :  { %s6326_s10 = smov 0   ;;  %s6328_s0 = smov 0  }
  0x36   :  { %s6330_s11 = smov 0   ;;  %s6332_s29 = smov 0  }
  0x37   :  { %s6334_s2 = smov 0  }
  0x38 LB: > { %7691 = sst [smem:[#allocation46_spill]] %s6095_s8  ;;  %s6368_s7 = sadd.s32 4294967295, %s6135_s2   ;;  %s6135_s2 = sphi %s6334_s2, %s69_s2   ;;  %s6131_s29 = sphi %s6332_s29, %s7812_s29   ;;  %s6127_s11 = sphi %s6330_s11, %s7811_s11   ;;  %s6123_s0 = sphi %s6328_s0, %s7810_s0   ;;  %s6119_s10 = sphi %s6326_s10, %s7809_s10   ;;  %s6115_s6 = sphi %s6324_s6, %s7808_s6   ;;  %s6111_s3 = sphi %s6322_s3, %s7807_s3   ;;  %s6107_s30 = sphi %s6320_s30, %s7806_s30   ;;  %s6103_s9 = sphi %s6318_s9, %s7805_s9   ;;  %s6099_s5 = sphi %s6316_s5, %s7804_s5   ;;  %s6095_s8 = sphi %s6314_s8, %s7803_s8  }
  0x39   : > { %7692 = sst [smem:[#allocation47_spill]] %s6099_s5  ;;  %s4566_s12 = sadd.s32 4294967294, %s6135_s2  }
  0x3a   : > { %7693 = sst [smem:[#allocation48_spill]] %s6103_s9  ;;  %s78_s1 = sadd.s32 1, %s6127_s11 }
  0x3b   : > { %7694 = sst [smem:[#allocation49_spill]] %s6111_s3  ;;  %s81_s4 = sadd.s32 1, %s6131_s29 }
  0x3c   : > { %7695 = sst [smem:[#allocation50_spill]] %s6115_s6  ;;  %p79_p0 = scmp.ge.s32.totalorder %s78_s1, 2 }
  0x3d   : > { %7696 = sst [smem:[#allocation51_spill]] %s6119_s10  ;;  %s218_s28 = sadd.s32 1, %s6115_s6 }
  0x3e   : > { %7697 = sst [smem:[#allocation52_spill]] %s6123_s0  ;;  %p225_p1 = scmp.ne.s32.totalorder %s6115_s6, %s6111_s3 }
  0x3f   : > { %7698 = sst [smem:[#allocation53_spill]] %s6127_s11  ;;  %p226_p2 = scmp.eq.s32.totalorder %s6135_s2, 0 }
  0x40   : > { %7699 = sst [smem:[#allocation54_spill]] %s6131_s29  ;;  %s7814_s1 = smov (%p79_p0, %s78_s1), 0 }
  0x41   : > { %7700 = sst [smem:[#allocation55_spill]] %s6135_s2  ;;  %s7816_s4 = smov (!%p79_p0, %s81_s4), %s6131_s29 }
  0x42   : > { %7701 = sst [smem:[#allocation56_spill]] %s6368_s7  ;;  %s215_s24 = ssub.s32 %s6127_s11, %s7814_s1 }
  0x43   : > { %7702 = sst [smem:[#allocation57_spill]] %s7814_s1  ;;  %p6382_p3 = por %p226_p2, %p225_p1 }
  0x44   : > { %p83_p4 = scmp.ge.s32.totalorder %s7816_s4, 2  ;;  %p216_p5 = scmp.eq.s32.totalorder %s215_s24, 0 }
  0x45   : > { %s7703_s20 = scalar_select %p6382_p3, 1, 0 }
  0x46   : > { %p231_p6 = scmp.ne.s32.totalorder %s6111_s3, %s6107_s30  ;;  %p7628_p7 = scmp.eq.s32.totalorder %s6368_s7, 0 }
  0x47   : > { %s7818_s4 = smov (%p83_p4, %s7816_s4), 0  ;;  %s796_s0 = sadd.s32 1, %s6103_s9 }
  0x48   : > { %7704 = sst [smem:[#allocation58_spill]] %s7818_s4  ;;  %p6395_p8 = por %p7628_p7, %p231_p6 }
  0x49   : > { %s6391_s18 = scalar_select %p216_p5, %s6115_s6, %s218_s28  }
  0x4a   : > { %s7706_s1 = scalar_select %p6395_p8, 1, 0 }
  0x4b   : > { %7705 = sst [smem:[#allocation59_spill]] %s6391_s18  ;;  %s793_s10 = ssub.s32 %s6131_s29, %s7818_s4 }
  0x4c   : > { %7707 = sst [smem:[#allocation60_spill]] %s7706_s1  ;;  %p794_p9 = scmp.eq.s32.totalorder %s793_s10, 0 }
  0x4d   : > { %p806_p10 = scmp.ne.s32.totalorder %s6103_s9, %s6099_s5  ;;  %p807_p11 = scmp.eq.s32.totalorder %s6368_s7, 3 }
  0x4e   : > { %s6406_s24 = scalar_select %p794_p9, %s6103_s9, %s796_s0  }
  0x4f   : > { %p6408_p12 = por %p807_p11, %p806_p10  ;;  %p812_p13 = scmp.ne.s32.totalorder %s6099_s5, %s6095_s8 }
  0x50   : > { %7708 = sst [smem:[#allocation61_spill]] %s6406_s24  ;;  %p813_p0 = scmp.eq.s32.totalorder %s4566_s12, 3 }
  0x51   : > { %s7709_s30 = scalar_select %p6408_p12, 1, 0 }
  0x52   : > { %p4567_p1 = scmp.ge.s32.totalorder %s6135_s2, 1  ;;  %p820_p2 = scmp.lt.s32.totalorder %s6135_s2, 5 }
  0x53   : > { %7710 = sst [smem:[#allocation62_spill]] %s7709_s30  ;;  %p6416_p4 = por %p813_p0, %p812_p13 }
  0x54   : > { %p6420_p5 = pnand %p4567_p1, %p820_p2  ;;  %s6137_s4 = smov [#allocation30]  }
  0x55   : > { %s7711_s28 = scalar_select %p6416_p4, 1, 0 }
  0x56   : > { %s7713_s10 = scalar_select %p6420_p5, 1, 0 }
  0x57   : > { %7712 = sst [smem:[#allocation63_spill]] %s7711_s28  ;;  %s846_s0 = sshll.u32 %s6137_s4, 4  ;;  %s847_s0 = int_to_ptr.vmem [resolvable:$true] %s846_s0 }
  0x58   : > { %7714 = sst [smem:[#allocation64_spill]] %s7713_s10  ;;  %p5149_p6 = pneg %p6420_p5 }
  0x59   : > { %s6138_s12 = smov [#allocation29]   ;;  %s7716_s26 = sld [smem:[#allocation93_spill]] }
  0x5a   : > { %p6428_p9 = pnand %p5149_p6, %p7628_p7  ;;  %s836_s18 = sshll.u32 %s6138_s12, 4  ;;  %s837_s18 = int_to_ptr.vmem [resolvable:$true] %s836_s18 }
  0x5c   : > { %p6440_p11 = pneg %p6428_p9 }
  0x5f   : > { %s5441_s28 = scalar_lea.hbm %s7716_s26, 1024 }
  0x60   : > { %p5442_p10 = scmp.ne.s32.totalorder %s7716_s26, %s5441_s28  ;;  %p5448_p1 = scmp.lt.u32.totalorder %s5441_s28, %s7716_s26 }
  0x62   : > { %p5444_p13 = pnand %p6440_p11, %p5442_p10 }
  0x64   : > { %p5445_p0 = pneg %p5444_p13 }
  0x66   : > { %p5450_p2 = pnand %p5448_p1, %p5445_p0 }
  0x68   : > { %5453 = shalt.err (!%p5450_p2)
}
  0x69   : > { %s5454_s9 = scalar_lea.vmem %s847_s0, 1024  ;;  %p5462_p12 = scmp.lt.s32.totalorder %s847_s0, %s847_s0 }
  0x6a   : > { %p5455_p6 = scmp.ne.s32.totalorder %s847_s0, %s5454_s9  ;;  %p5463_p8 = scmp.lt.s32.totalorder %s5454_s9, %s5454_s9 }
  0x6c   : > { %p5457_p7 = pnand %p5455_p6, %p6440_p11  ;;  %p5464_p5 = por %p5463_p8, %p5462_p12 }
  0x6e   : > { %p5458_p4 = pneg %p5457_p7 }
  0x70   : > { %p5465_p3 = pnand %p5464_p5, %p5458_p4 }
  0x72   : > { %5468 = shalt.err (!%p5465_p3)
}
  0x73   : > { %s6139_s8 = smov 64   ;;  %s6140_s24 = smov 4  }
  0x74   : > { %5155 = dma.hbm_to_vmem [thread:$0]  (!%p6428_p9), %s7716_s26, 1024, %s847_s0, [#allocation31], %s6139_s8, %s6139_s8, %s6140_s24  }
  0x75   : > { %s7718_s25 = sld [smem:[#allocation92_spill]] }
  0x7b   : > { %s5469_s12 = scalar_lea.hbm %s7718_s25, 16 }
  0x7c   : > { %p5470_p7 = scmp.ne.s32.totalorder %s7718_s25, %s5469_s12  ;;  %p5476_p12 = scmp.lt.u32.totalorder %s5469_s12, %s7718_s25 }
  0x7e   : > { %p5472_p3 = pnand %p5470_p7, %p6440_p11 }
  0x80   : > { %p5473_p8 = pneg %p5472_p3 }
  0x82   : > { %p5478_p4 = pnand %p5476_p12, %p5473_p8 }
  0x84   : > { %5481 = shalt.err (!%p5478_p4)
}
  0x85   : > { %s5482_s5 = scalar_lea.vmem %s837_s18, 16  ;;  %s5489_s0 = scalar_lea.vmem %s837_s18, 32 }
  0x86   : > { %p5483_p5 = scmp.ne.s32.totalorder %s837_s18, %s5482_s5  ;;  %p5490_p0 = scmp.lt.s32.totalorder %s837_s18, %s837_s18 }
  0x87   : > { %p5491_p1 = scmp.lt.s32.totalorder %s5489_s0, %s5482_s5 }
  0x88   : > { %p5485_p10 = pnand %p5483_p5, %p6440_p11 }
  0x89   : > { %p5492_p2 = por %p5491_p1, %p5490_p0 }
  0x8a   : > { %p5486_p13 = pneg %p5485_p10 }
  0x8c   : > { %p5493_p6 = pnand %p5492_p2, %p5486_p13 }
  0x8e   : > { %5496 = shalt.err (!%p5493_p6)
}
  0x8f   : > { %5152 = dma.hbm_to_vmem [thread:$0]  (!%p6428_p9), %s7718_s25, 16, %s837_s18, [#allocation28]  }
  0x90   : > { %s6141_s10 = smov [#allocation32]   ;;  %s7719_s27 = sld [smem:[#allocation94_spill]] }
  0x91   : > { %s860_s8 = sshll.u32 %s6141_s10, 4  ;;  %s861_s8 = int_to_ptr.vmem [resolvable:$true] %s860_s8 }
  0x96   : > { %s5497_s30 = scalar_lea.hbm %s7719_s27, 16 }
  0x97   : > { %p5498_p7 = scmp.ne.s32.totalorder %s7719_s27, %s5497_s30  ;;  %p5504_p12 = scmp.lt.u32.totalorder %s5497_s30, %s7719_s27 }
  0x99   : > { %p5500_p3 = pnand %p5498_p7, %p6440_p11 }
  0x9b   : > { %p5501_p8 = pneg %p5500_p3 }
  0x9d   : > { %p5506_p4 = pnand %p5504_p12, %p5501_p8 }
  0x9f   : > { %5509 = shalt.err (!%p5506_p4)
}
  0xa0   : > { %s5510_s18 = scalar_lea.vmem %s861_s8, 16  ;;  %s5517_s0 = scalar_lea.vmem %s861_s8, 32 }
  0xa1   : > { %p5511_p5 = scmp.ne.s32.totalorder %s861_s8, %s5510_s18  ;;  %p5518_p0 = scmp.lt.s32.totalorder %s861_s8, %s861_s8 }
  0xa2   : > { %p5519_p1 = scmp.lt.s32.totalorder %s5517_s0, %s5510_s18 }
  0xa3   : > { %p5513_p10 = pnand %p5511_p5, %p6440_p11 }
  0xa4   : > { %p5520_p2 = por %p5519_p1, %p5518_p0 }
  0xa5   : > { %p5514_p13 = pneg %p5513_p10 }
  0xa7   : > { %p5521_p6 = pnand %p5520_p2, %p5514_p13 }
  0xa9   : > { %5524 = shalt.err (!%p5521_p6)
}
  0xaa   : > { %5158 = dma.hbm_to_vmem [thread:$0]  (!%p6428_p9), %s7719_s27, 16, %s861_s8, [#allocation31]  }
  0xab   : > { %p4571_p7 = scmp.ge.s32.totalorder %s6135_s2, 4 }
  0xac   : > { %s6494_s4 = sand.u32 (!%p4571_p7), 1, %s6115_s6   ;;  %s6497_s10 = sand.u32 (!%p4571_p7), 1, %s6135_s2  }
  0xad   : > { %867 = sbr.rel (%p4571_p7) target bundleno = 625 (0x271), region = 32  ;;  %s6500_s24 = sshll.u32 (!%p4571_p7), %s6494_s4, 6 }
  0xae   : > { %s6503_s29 = sshll.u32 (!%p4571_p7), %s6127_s11, 10  ;;  %s7720_s30 = sld [smem:[#allocation73_spill]] (!%p4571_p7) }
  0xaf   : > { %s929_s9 = scalar_lea.vmem (!%p4571_p7), [#allocation6], %s6500_s24  ;;  %s6515_s18 = sshll.u32 (!%p4571_p7), %s6127_s11, 4 }
  0xb0   : > { %s936_s5 = sshll.u32 (!%p4571_p7), %s929_s9, 4  ;;  %s7639_s0 = scalar_lea.sflag (!%p4571_p7), [#allocation7], %s6497_s10  ;;  %s6512_s5 = int_to_ptr.vmem [resolvable:$true] %s936_s5 }
  0xb1   : > { %p7722_p11 = scmp.ne.s32.totalorder (!%p4571_p7), %s7703_s20, 0 }
  0xb4   : > { %s7721_s28 = smov %s7720_s30  ;;  %s6509_s12 = scalar_lea.hbm %s7720_s30, %s6503_s29 }
  0xb5   : > { %s5525_s3 = scalar_lea.hbm %s6509_s12, 1024  ;;  %s5529_s7 = scalar_lea.hbm %s7721_s28, 2048 }
  0xb6   : > { %p5526_p9 = scmp.ne.s32.totalorder %s6509_s12, %s5525_s3  ;;  %p5530_p12 = scmp.lt.u32.totalorder %s6509_s12, %s7721_s28 }
  0xb7   : > { %p5531_p4 = scmp.lt.u32.totalorder %s5529_s7, %s5525_s3  ;;  %p5533_p10 = scmp.lt.u32.totalorder %s5525_s3, %s6509_s12 }
  0xb8   : > { %p5527_p3 = pnand %p5526_p9, %p7722_p11 }
  0xb9   : > { %p5532_p5 = por %p5531_p4, %p5530_p12 }
  0xba   : > { %p5528_p8 = pneg %p5527_p3 }
  0xbb   : > { %p5534_p13 = por %p5533_p10, %p5532_p5 }
  0xbd   : > { %p5535_p0 = pnand %p5534_p13, %p5528_p8 }
  0xbf   : > { %5538 = shalt.err (!%p5535_p0)
}
  0xc0   : > { %s5539_s9 = scalar_lea.vmem %s6512_s5, 1024  ;;  %s6142_s1 = smov [#allocation6]  }
  0xc1   : > { %p5540_p1 = scmp.ne.s32.totalorder %s6512_s5, %s5539_s9  ;;  %s5543_s8 = sshll.u32 %s6142_s1, 4  ;;  %s5544_s8 = int_to_ptr.vmem [resolvable:$false] %s5543_s8 }
  0xc2   : > { %s5545_s25 = scalar_lea.vmem %s5544_s8, 2048  ;;  %p5546_p7 = scmp.lt.s32.totalorder %s6512_s5, %s5544_s8 }
  0xc3   : > { %p5541_p2 = pnand %p5540_p1, %p7722_p11  ;;  %p5547_p9 = scmp.lt.s32.totalorder %s5545_s25, %s5539_s9 }
  0xc5   : > { %p5542_p6 = pneg %p5541_p2  ;;  %p5548_p3 = por %p5547_p9, %p5546_p7 }
  0xc7   : > { %p5549_p12 = pnand %p5548_p3, %p5542_p6 }
  0xc9   : > { %5552 = shalt.err (!%p5549_p12)
}
  0xca   : > { %s7640_s3 = smov 64   ;;  %s7647_s7 = smov 4  }
  0xcb   : > { %5110 = dma.hbm_to_vmem [thread:$0]  (%p7722_p11), %s6509_s12, 1024, %s6512_s5, %s7639_s0, %s7640_s3, %s7640_s3, %s7647_s7  }
  0xcc   : > { %s7723_s1 = sld [smem:[#allocation75_spill]]  ;;  %s966_s25 = scalar_lea.vmem [#allocation9], %s6494_s4 }
  0xcd   : > { %s973_s26 = sshll.u32 %s966_s25, 4  ;;  %s7642_s27 = scalar_lea.sflag [#allocation10], %s6497_s10  ;;  %s974_s26 = int_to_ptr.vmem [resolvable:$true] %s973_s26 }
  0xd2   : > { %s6548_s8 = scalar_lea.hbm %s7723_s1, %s6515_s18  ;;  %s5557_s5 = scalar_lea.hbm %s7723_s1, 32 }
  0xd3   : > { %s5553_s28 = scalar_lea.hbm %s6548_s8, 16  ;;  %p5558_p10 = scmp.lt.u32.totalorder %s6548_s8, %s7723_s1 }
  0xd4   : > { %p5554_p8 = scmp.ne.s32.totalorder %s6548_s8, %s5553_s28  ;;  %p5559_p13 = scmp.lt.u32.totalorder %s5557_s5, %s5553_s28 }
  0xd5   : > { %p5561_p1 = scmp.lt.u32.totalorder %s5553_s28, %s6548_s8 }
  0xd6   : > { %p5555_p4 = pnand %p5554_p8, %p7722_p11  ;;  %p5560_p0 = por %p5559_p13, %p5558_p10 }
  0xd8   : > { %p5556_p5 = pneg %p5555_p4  ;;  %p5562_p2 = por %p5561_p1, %p5560_p0 }
  0xda   : > { %p5563_p6 = pnand %p5562_p2, %p5556_p5 }
  0xdc   : > { %5566 = shalt.err (!%p5563_p6)
}
  0xdd   : > { %s5567_s25 = scalar_lea.vmem %s974_s26, 16  ;;  %s6145_s0 = smov [#allocation9]  }
  0xde   : > { %p5568_p7 = scmp.ne.s32.totalorder %s974_s26, %s5567_s25  ;;  %s5571_s3 = sshll.u32 %s6145_s0, 4  ;;  %s5572_s3 = int_to_ptr.vmem [resolvable:$false] %s5571_s3 }
  0xdf   : > { %s5573_s6 = scalar_lea.vmem %s5572_s3, 32  ;;  %p5574_p12 = scmp.lt.s32.totalorder %s974_s26, %s5572_s3 }
  0xe0   : > { %p5569_p9 = pnand %p5568_p7, %p7722_p11  ;;  %p5575_p8 = scmp.lt.s32.totalorder %s5573_s6, %s5567_s25 }
  0xe2   : > { %p5570_p3 = pneg %p5569_p9  ;;  %p5576_p4 = por %p5575_p8, %p5574_p12 }
  0xe4   : > { %p5577_p10 = pnand %p5576_p4, %p5570_p3 }
  0xe6   : > { %5580 = shalt.err (!%p5577_p10)
}
  0xe7   : > { %5112 = dma.hbm_to_vmem [thread:$0]  (%p7722_p11), %s6548_s8, 16, %s974_s26, %s7642_s27  }
  0xe8   : > { %s7724_s12 = sld [smem:[#allocation77_spill]]  ;;  %s1001_s3 = scalar_lea.vmem [#allocation12], %s6500_s24 }
  0xe9   : > { %s1008_s30 = sshll.u32 %s1001_s3, 4  ;;  %s7646_s9 = sshll.u32 %s6494_s4, 1  ;;  %s6578_s30 = int_to_ptr.vmem [resolvable:$true] %s1008_s30 }
  0xea   : > { %s7651_s25 = scalar_lea.sflag [#allocation13], %s6497_s10 }
  0xee   : > { %s6575_s5 = scalar_lea.hbm %s7724_s12, %s6503_s29  ;;  %s5585_s28 = scalar_lea.hbm %s7724_s12, 2048 }
  0xef   : > { %s5581_s6 = scalar_lea.hbm %s6575_s5, 1024  ;;  %p5586_p1 = scmp.lt.u32.totalorder %s6575_s5, %s7724_s12 }
  0xf0   : > { %p5582_p5 = scmp.ne.s32.totalorder %s6575_s5, %s5581_s6  ;;  %p5587_p2 = scmp.lt.u32.totalorder %s5585_s28, %s5581_s6 }
  0xf1   : > { %p5589_p7 = scmp.lt.u32.totalorder %s5581_s6, %s6575_s5 }
  0xf2   : > { %p5583_p13 = pnand %p5582_p5, %p7722_p11  ;;  %p5588_p6 = por %p5587_p2, %p5586_p1 }
  0xf4   : > { %p5584_p0 = pneg %p5583_p13  ;;  %p5590_p9 = por %p5589_p7, %p5588_p6 }
  0xf6   : > { %p5591_p3 = pnand %p5590_p9, %p5584_p0 }
  0xf8   : > { %5594 = shalt.err (!%p5591_p3)
}
  0xf9   : > { %s5595_s3 = scalar_lea.vmem %s6578_s30, 1024  ;;  %s6146_s26 = smov [#allocation12]  }
  0xfa   : > { %p5596_p12 = scmp.ne.s32.totalorder %s6578_s30, %s5595_s3  ;;  %s5599_s8 = sshll.u32 %s6146_s26, 4  ;;  %s5600_s8 = int_to_ptr.vmem [resolvable:$false] %s5599_s8 }
  0xfb   : > { %s5601_s27 = scalar_lea.vmem %s5600_s8, 2048  ;;  %p5602_p10 = scmp.lt.s32.totalorder %s6578_s30, %s5600_s8 }
  0xfc   : > { %p5597_p8 = pnand %p5596_p12, %p7722_p11  ;;  %p5603_p5 = scmp.lt.s32.totalorder %s5601_s27, %s5595_s3 }
  0xfe   : > { %p5598_p4 = pneg %p5597_p8  ;;  %p5604_p13 = por %p5603_p5, %p5602_p10 }
 0x100   : > { %p5605_p1 = pnand %p5604_p13, %p5598_p4 }
 0x102   : > { %5608 = shalt.err (!%p5605_p1)
}
 0x103   : > { %s7725_s6 = smov 64   ;;  %s7645_s28 = sshll.u32 %s6127_s11, 5 }
 0x104   : > { %5114 = dma.hbm_to_vmem [thread:$0]  (%p7722_p11), %s6575_s5, 1024, %s6578_s30, %s7651_s25, %s7725_s6, %s7725_s6, %s7647_s7  }
 0x105   : > { %s7726_s13 = sld [smem:[#allocation80_spill]]  ;;  %s1047_s8 = scalar_lea.vmem [#allocation15], %s7646_s9 }
 0x106   : > { %s1055_s27 = sshll.u32 %s1047_s8, 4  ;;  %s7648_s1 = scalar_lea.sflag [#allocation16], %s6497_s10  ;;  %s1056_s27 = int_to_ptr.vmem [resolvable:$true] %s1055_s27 }
 0x10b   : > { %s6614_s26 = scalar_lea.hbm %s7726_s13, %s7645_s28  ;;  %s5613_s0 = scalar_lea.hbm %s7726_s13, 64 }
 0x10c   : > { %s5609_s12 = scalar_lea.hbm %s6614_s26, 32  ;;  %p5614_p7 = scmp.lt.u32.totalorder %s6614_s26, %s7726_s13 }
 0x10d   : > { %p5610_p0 = scmp.ne.s32.totalorder %s6614_s26, %s5609_s12  ;;  %p5615_p9 = scmp.lt.u32.totalorder %s5613_s0, %s5609_s12 }
 0x10e   : > { %p5617_p12 = scmp.lt.u32.totalorder %s5609_s12, %s6614_s26 }
 0x10f   : > { %p5611_p2 = pnand %p5610_p0, %p7722_p11  ;;  %p5616_p3 = por %p5615_p9, %p5614_p7 }
 0x111   : > { %p5612_p6 = pneg %p5611_p2  ;;  %p5618_p8 = por %p5617_p12, %p5616_p3 }
 0x113   : > { %p5619_p4 = pnand %p5618_p8, %p5612_p6 }
 0x115   : > { %5622 = shalt.err (!%p5619_p4)
}
 0x116   : > { %s5623_s8 = scalar_lea.vmem %s1056_s27, 32  ;;  %s6147_s9 = smov [#allocation15]  }
 0x117   : > { %p5624_p10 = scmp.ne.s32.totalorder %s1056_s27, %s5623_s8  ;;  %s5627_s7 = sshll.u32 %s6147_s9, 4  ;;  %s5628_s7 = int_to_ptr.vmem [resolvable:$false] %s5627_s7 }
 0x118   : > { %s5629_s5 = scalar_lea.vmem %s5628_s7, 64  ;;  %p5630_p1 = scmp.lt.s32.totalorder %s1056_s27, %s5628_s7 }
 0x119   : > { %p5625_p5 = pnand %p5624_p10, %p7722_p11  ;;  %p5631_p0 = scmp.lt.s32.totalorder %s5629_s5, %s5623_s8 }
 0x11b   : > { %p5626_p13 = pneg %p5625_p5  ;;  %p5632_p2 = por %p5631_p0, %p5630_p1 }
 0x11d   : > { %p5633_p7 = pnand %p5632_p2, %p5626_p13 }
 0x11f   : > { %5636 = shalt.err (!%p5633_p7)
}
 0x120   : > { %5116 = dma.hbm_to_vmem [thread:$0]  (%p7722_p11), %s6614_s26, 32, %s1056_s27, %s7648_s1  }
 0x121   : > { %s7727_s15 = sld [smem:[#allocation82_spill]]  ;;  %s1086_s7 = scalar_lea.vmem [#allocation18], %s6494_s4 }
 0x122   : > { %s1093_s30 = sshll.u32 %s1086_s7, 4  ;;  %s7649_s0 = scalar_lea.sflag [#allocation19], %s6497_s10  ;;  %s1094_s30 = int_to_ptr.vmem [resolvable:$true] %s1093_s30 }
 0x127   : > { %s6642_s9 = scalar_lea.hbm %s7727_s15, %s6515_s18  ;;  %s5641_s27 = scalar_lea.hbm %s7727_s15, 32 }
 0x128   : > { %s5637_s3 = scalar_lea.hbm %s6642_s9, 16  ;;  %p5642_p12 = scmp.lt.u32.totalorder %s6642_s9, %s7727_s15 }
 0x129   : > { %p5638_p6 = scmp.ne.s32.totalorder %s6642_s9, %s5637_s3  ;;  %p5643_p8 = scmp.lt.u32.totalorder %s5641_s27, %s5637_s3 }
 0x12a   : > { %p5645_p10 = scmp.lt.u32.totalorder %s5637_s3, %s6642_s9 }
 0x12b   : > { %p5639_p9 = pnand %p5638_p6, %p7722_p11  ;;  %p5644_p4 = por %p5643_p8, %p5642_p12 }
 0x12d   : > { %p5640_p3 = pneg %p5639_p9  ;;  %p5646_p5 = por %p5645_p10, %p5644_p4 }
 0x12f   : > { %p5647_p13 = pnand %p5646_p5, %p5640_p3 }
 0x131   : > { %5650 = shalt.err (!%p5647_p13)
}
 0x132   : > { %s5651_s28 = scalar_lea.vmem %s1094_s30, 16  ;;  %s6148_s7 = smov [#allocation18]  }
 0x133   : > { %p5652_p1 = scmp.ne.s32.totalorder %s1094_s30, %s5651_s28  ;;  %s5655_s1 = sshll.u32 %s6148_s7, 4  ;;  %s5656_s1 = int_to_ptr.vmem [resolvable:$false] %s5655_s1 }
 0x134   : > { %s5657_s8 = scalar_lea.vmem %s5656_s1, 32  ;;  %p5658_p7 = scmp.lt.s32.totalorder %s1094_s30, %s5656_s1 }
 0x135   : > { %p5653_p0 = pnand %p5652_p1, %p7722_p11  ;;  %p5659_p6 = scmp.lt.s32.totalorder %s5657_s8, %s5651_s28 }
 0x137   : > { %p5654_p2 = pneg %p5653_p0  ;;  %p5660_p9 = por %p5659_p6, %p5658_p7 }
 0x139   : > { %p5661_p8 = pnand %p5660_p9, %p5654_p2 }
 0x13b   : > { %5664 = shalt.err (!%p5661_p8)
}
 0x13c   : > { %5118 = dma.hbm_to_vmem [thread:$0]  (%p7722_p11), %s6642_s9, 16, %s1094_s30, %s7649_s0  }
 0x13d   : > { %s7728_s17 = sld [smem:[#allocation84_spill]]  ;;  %s1120_s1 = scalar_lea.vmem [#allocation21], %s6494_s4 }
 0x13e   : > { %s1127_s5 = sshll.u32 %s1120_s1, 4  ;;  %s7650_s12 = scalar_lea.sflag [#allocation22], %s6497_s10  ;;  %s1128_s5 = int_to_ptr.vmem [resolvable:$true] %s1127_s5 }
 0x143   : > { %s6669_s27 = scalar_lea.hbm %s7728_s17, %s6515_s18  ;;  %s5669_s30 = scalar_lea.hbm %s7728_s17, 32 }
 0x144   : > { %s5665_s28 = scalar_lea.hbm %s6669_s27, 16  ;;  %p5670_p10 = scmp.lt.u32.totalorder %s6669_s27, %s7728_s17 }
 0x145   : > { %p5666_p3 = scmp.ne.s32.totalorder %s6669_s27, %s5665_s28  ;;  %p5671_p5 = scmp.lt.u32.totalorder %s5669_s30, %s5665_s28 }
 0x146   : > { %p5673_p1 = scmp.lt.u32.totalorder %s5665_s28, %s6669_s27 }
 0x147   : > { %p5667_p12 = pnand %p5666_p3, %p7722_p11  ;;  %p5672_p13 = por %p5671_p5, %p5670_p10 }
 0x149   : > { %p5668_p4 = pneg %p5667_p12  ;;  %p5674_p0 = por %p5673_p1, %p5672_p13 }
 0x14b   : > { %p5675_p2 = pnand %p5674_p0, %p5668_p4 }
 0x14d   : > { %5678 = shalt.err (!%p5675_p2)
}
 0x14e   : > { %s5679_s26 = scalar_lea.vmem %s1128_s5, 16  ;;  %s6149_s1 = smov [#allocation21]  }
 0x14f   : > { %p5680_p7 = scmp.ne.s32.totalorder %s1128_s5, %s5679_s26  ;;  %s5683_s0 = sshll.u32 %s6149_s1, 4  ;;  %s5684_s0 = int_to_ptr.vmem [resolvable:$false] %s5683_s0 }
 0x150   : > { %s5685_s7 = scalar_lea.vmem %s5684_s0, 32  ;;  %p5686_p8 = scmp.lt.s32.totalorder %s1128_s5, %s5684_s0 }
 0x151   : > { %p5681_p6 = pnand %p5680_p7, %p7722_p11  ;;  %p5687_p3 = scmp.lt.s32.totalorder %s5685_s7, %s5679_s26 }
 0x153   : > { %p5682_p9 = pneg %p5681_p6  ;;  %p5688_p12 = por %p5687_p3, %p5686_p8 }
 0x155   : > { %p5689_p5 = pnand %p5688_p12, %p5682_p9 }
 0x157   : > { %5692 = shalt.err (!%p5689_p5)
}
 0x158   : > { %5120 = dma.hbm_to_vmem [thread:$0]  (%p7722_p11), %s6669_s27, 16, %s1128_s5, %s7650_s12  }
 0x159   : > { %s7729_s21 = sld [smem:[#allocation88_spill]]  ;;  %s1172_s0 = scalar_lea.vmem [#allocation24], %s6494_s4 }
 0x15a   : > { %s1179_s8 = sshll.u32 %s1172_s0, 4  ;;  %s5099_s3 = smul.u32 3, %s6494_s4  ;;  %s6699_s8 = int_to_ptr.vmem [resolvable:$true] %s1179_s8 }
 0x15b   : > { %s7652_s26 = scalar_lea.sflag [#allocation25], %s6497_s10 }
 0x15f   : > { %s6696_s30 = scalar_lea.hbm %s7729_s21, %s6515_s18  ;;  %s5697_s7 = scalar_lea.hbm %s7729_s21, 32 }
 0x160   : > { %s5693_s1 = scalar_lea.hbm %s6696_s30, 16  ;;  %p5698_p1 = scmp.lt.u32.totalorder %s6696_s30, %s7729_s21 }
 0x161   : > { %p5694_p4 = scmp.ne.s32.totalorder %s6696_s30, %s5693_s1  ;;  %p5699_p0 = scmp.lt.u32.totalorder %s5697_s7, %s5693_s1 }
 0x162   : > { %p5701_p7 = scmp.lt.u32.totalorder %s5693_s1, %s6696_s30 }
 0x163   : > { %p5695_p10 = pnand %p5694_p4, %p7722_p11  ;;  %p5700_p2 = por %p5699_p0, %p5698_p1 }
 0x165   : > { %p5696_p13 = pneg %p5695_p10  ;;  %p5702_p6 = por %p5701_p7, %p5700_p2 }
 0x167   : > { %p5703_p9 = pnand %p5702_p6, %p5696_p13 }
 0x169   : > { %5706 = shalt.err (!%p5703_p9)
}
 0x16a   : > { %s5707_s0 = scalar_lea.vmem %s6699_s8, 16  ;;  %s6150_s27 = smov [#allocation24]  }
 0x16b   : > { %p5708_p8 = scmp.ne.s32.totalorder %s6699_s8, %s5707_s0  ;;  %s5711_s5 = sshll.u32 %s6150_s27, 4  ;;  %s5712_s5 = int_to_ptr.vmem [resolvable:$false] %s5711_s5 }
 0x16c   : > { %s5713_s28 = scalar_lea.vmem %s5712_s5, 32  ;;  %p5714_p5 = scmp.lt.s32.totalorder %s6699_s8, %s5712_s5 }
 0x16d   : > { %p5709_p3 = pnand %p5708_p8, %p7722_p11  ;;  %p5715_p4 = scmp.lt.s32.totalorder %s5713_s28, %s5707_s0 }
 0x16f   : > { %p5710_p12 = pneg %p5709_p3  ;;  %p5716_p10 = por %p5715_p4, %p5714_p5 }
 0x171   : > { %p5717_p1 = pnand %p5716_p10, %p5710_p12 }
 0x173   : > { %5720 = shalt.err (!%p5717_p1)
}
 0x174   : > { %5122 = dma.hbm_to_vmem [thread:$0]  (%p7722_p11), %s6696_s30, 16, %s6699_s8, %s7652_s26  }
 0x175   : > { %s5100_s1 = smul.u32 48, %s6127_s11  ;;  %s910_s7 = scalar_lea.vmem [#allocation3], %s5099_s3 }
 0x176   : > { %s918_s9 = sshll.u32 %s910_s7, 4  ;;  %s7730_s5 = sld [smem:[#allocation72_spill]]  ;;  %s919_s9 = int_to_ptr.vmem [resolvable:$true] %s918_s9 }
 0x177   : > { %s907_s25 = scalar_lea.sflag [#allocation4], %s6494_s4 }
 0x17c   : > { %s7731_s28 = smov %s7730_s5  ;;  %s6732_s12 = scalar_lea.hbm %s7730_s5, %s5100_s1 }
 0x17d   : > { %s5721_s13 = scalar_lea.hbm %s6732_s12, 48  ;;  %s5725_s3 = scalar_lea.hbm %s7731_s28, 96 }
 0x17e   : > { %p5722_p13 = scmp.ne.s32.totalorder %s6732_s12, %s5721_s13  ;;  %p5726_p7 = scmp.lt.u32.totalorder %s6732_s12, %s7731_s28 }
 0x17f   : > { %p5727_p6 = scmp.lt.u32.totalorder %s5725_s3, %s5721_s13  ;;  %p5729_p8 = scmp.lt.u32.totalorder %s5721_s13, %s6732_s12 }
 0x180   : > { %p5723_p0 = pnand %p5722_p13, %p7722_p11 }
 0x181   : > { %p5728_p9 = por %p5727_p6, %p5726_p7 }
 0x182   : > { %p5724_p2 = pneg %p5723_p0 }
 0x183   : > { %p5730_p3 = por %p5729_p8, %p5728_p9 }
 0x185   : > { %p5731_p12 = pnand %p5730_p3, %p5724_p2 }
 0x187   : > { %5734 = shalt.err (!%p5731_p12)
}
 0x188   : > { %s5735_s1 = scalar_lea.vmem %s919_s9, 48  ;;  %s6151_s27 = smov [#allocation3]  }
 0x189   : > { %p5736_p5 = scmp.ne.s32.totalorder %s919_s9, %s5735_s1  ;;  %s5739_s0 = sshll.u32 %s6151_s27, 4  ;;  %s5740_s0 = int_to_ptr.vmem [resolvable:$false] %s5739_s0 }
 0x18a   : > { %s5741_s5 = scalar_lea.vmem %s5740_s0, 96  ;;  %p5742_p1 = scmp.lt.s32.totalorder %s919_s9, %s5740_s0 }
 0x18b   : > { %p5737_p4 = pnand %p5736_p5, %p7722_p11  ;;  %p5743_p13 = scmp.lt.s32.totalorder %s5741_s5, %s5735_s1 }
 0x18d   : > { %p5738_p10 = pneg %p5737_p4  ;;  %p5744_p0 = por %p5743_p13, %p5742_p1 }
 0x18f   : > { %p5745_p6 = pnand %p5744_p0, %p5738_p10 }
 0x191   : > { %5748 = shalt.err (!%p5745_p6)
}
 0x192   : > { %5109 = dma.hbm_to_vmem [thread:$0]  (%p7722_p11), %s6732_s12, 48, %s919_s9, %s907_s25  }
 0x193   : > { %s7732_s30 = sld [smem:[#allocation74_spill]]  ;;  %s949_s3 = scalar_lea.vmem [#allocation8], %s6494_s4 }
 0x194   : > { %s956_s1 = sshll.u32 %s949_s3, 4  ;;  %s957_s1 = int_to_ptr.vmem [resolvable:$true] %s956_s1 }
 0x199   : > { %s7733_s7 = smov %s7732_s30  ;;  %s6756_s8 = scalar_lea.hbm %s7732_s30, %s6515_s18 }
 0x19a   : > { %s5749_s27 = scalar_lea.hbm %s6756_s8, 16  ;;  %s5753_s25 = scalar_lea.hbm %s7733_s7, 32 }
 0x19b   : > { %p5750_p2 = scmp.ne.s32.totalorder %s6756_s8, %s5749_s27  ;;  %p5754_p8 = scmp.lt.u32.totalorder %s6756_s8, %s7733_s7 }
 0x19c   : > { %p5755_p3 = scmp.lt.u32.totalorder %s5753_s25, %s5749_s27  ;;  %p5757_p5 = scmp.lt.u32.totalorder %s5749_s27, %s6756_s8 }
 0x19d   : > { %p5751_p7 = pnand %p5750_p2, %p7722_p11 }
 0x19e   : > { %p5756_p12 = por %p5755_p3, %p5754_p8 }
 0x19f   : > { %p5752_p9 = pneg %p5751_p7 }
 0x1a0   : > { %p5758_p4 = por %p5757_p5, %p5756_p12 }
 0x1a2   : > { %p5759_p10 = pnand %p5758_p4, %p5752_p9 }
 0x1a4   : > { %5762 = shalt.err (!%p5759_p10)
}
 0x1a5   : > { %s5763_s13 = scalar_lea.vmem %s957_s1, 16  ;;  %s6152_s26 = smov [#allocation8]  }
 0x1a6   : > { %p5764_p1 = scmp.ne.s32.totalorder %s957_s1, %s5763_s13  ;;  %s5767_s30 = sshll.u32 %s6152_s26, 4  ;;  %s5768_s30 = int_to_ptr.vmem [resolvable:$false] %s5767_s30 }
 0x1a7   : > { %s5769_s3 = scalar_lea.vmem %s5768_s30, 32  ;;  %p5770_p6 = scmp.lt.s32.totalorder %s957_s1, %s5768_s30 }
 0x1a8   : > { %p5765_p13 = pnand %p5764_p1, %p7722_p11  ;;  %p5771_p2 = scmp.lt.s32.totalorder %s5769_s3, %s5763_s13 }
 0x1aa   : > { %p5766_p0 = pneg %p5765_p13  ;;  %p5772_p7 = por %p5771_p2, %p5770_p6 }
 0x1ac   : > { %p5773_p3 = pnand %p5772_p7, %p5766_p0 }
 0x1ae   : > { %5776 = shalt.err (!%p5773_p3)
}
 0x1af   : > { %s7734_s27 = scalar_lea.sflag [#allocation7], %s6497_s10  ;;  %s7735_s25 = sld [smem:[#allocation76_spill]] }
 0x1b0   : > { %5111 = dma.hbm_to_vmem [thread:$0]  (%p7722_p11), %s6756_s8, 16, %s957_s1, %s7734_s27  }
 0x1b1   : > { %s983_s9 = scalar_lea.vmem [#allocation11], %s6494_s4 }
 0x1b2   : > { %s990_s13 = sshll.u32 %s983_s9, 4  ;;  %s991_s13 = int_to_ptr.vmem [resolvable:$true] %s990_s13 }
 0x1b5   : > { %s6782_s12 = scalar_lea.hbm %s7735_s25, %s6515_s18  ;;  %s5781_s8 = scalar_lea.hbm %s7735_s25, 32 }
 0x1b6   : > { %s5777_s26 = scalar_lea.hbm %s6782_s12, 16  ;;  %p5782_p5 = scmp.lt.u32.totalorder %s6782_s12, %s7735_s25 }
 0x1b7   : > { %p5778_p9 = scmp.ne.s32.totalorder %s6782_s12, %s5777_s26  ;;  %p5783_p4 = scmp.lt.u32.totalorder %s5781_s8, %s5777_s26 }
 0x1b8   : > { %p5785_p1 = scmp.lt.u32.totalorder %s5777_s26, %s6782_s12 }
 0x1b9   : > { %p5779_p8 = pnand %p5778_p9, %p7722_p11  ;;  %p5784_p10 = por %p5783_p4, %p5782_p5 }
 0x1bb   : > { %p5780_p12 = pneg %p5779_p8  ;;  %p5786_p13 = por %p5785_p1, %p5784_p10 }
 0x1bd   : > { %p5787_p0 = pnand %p5786_p13, %p5780_p12 }
 0x1bf   : > { %5790 = shalt.err (!%p5787_p0)
}
 0x1c0   : > { %s5791_s0 = scalar_lea.vmem %s991_s13, 16  ;;  %s6153_s5 = smov [#allocation11]  }
 0x1c1   : > { %p5792_p6 = scmp.ne.s32.totalorder %s991_s13, %s5791_s0  ;;  %s5795_s9 = sshll.u32 %s6153_s5, 4  ;;  %s5796_s9 = int_to_ptr.vmem [resolvable:$false] %s5795_s9 }
 0x1c2   : > { %s5797_s30 = scalar_lea.vmem %s5796_s9, 32  ;;  %p5798_p3 = scmp.lt.s32.totalorder %s991_s13, %s5796_s9 }
 0x1c3   : > { %p5793_p2 = pnand %p5792_p6, %p7722_p11  ;;  %p5799_p9 = scmp.lt.s32.totalorder %s5797_s30, %s5791_s0 }
 0x1c5   : > { %p5794_p7 = pneg %p5793_p2  ;;  %p5800_p8 = por %p5799_p9, %p5798_p3 }
 0x1c7   : > { %p5801_p4 = pnand %p5800_p8, %p5794_p7 }
 0x1c9   : > { %5804 = shalt.err (!%p5801_p4)
}
 0x1ca   : > { %s7736_s26 = scalar_lea.sflag [#allocation10], %s6497_s10  ;;  %s7737_s1 = sld [smem:[#allocation78_spill]] }
 0x1cb   : > { %5113 = dma.hbm_to_vmem [thread:$0]  (%p7722_p11), %s6782_s12, 16, %s991_s13, %s7736_s26  }
 0x1cc   : > { %s1021_s0 = scalar_lea.vmem [#allocation14], %s6494_s4 }
 0x1cd   : > { %s1028_s5 = sshll.u32 %s1021_s0, 4  ;;  %s1029_s5 = int_to_ptr.vmem [resolvable:$true] %s1028_s5 }
 0x1d0   : > { %s6808_s27 = scalar_lea.hbm %s7737_s1, %s6515_s18  ;;  %s5809_s12 = scalar_lea.hbm %s7737_s1, 32 }
 0x1d1   : > { %s5805_s9 = scalar_lea.hbm %s6808_s27, 16  ;;  %p5810_p1 = scmp.lt.u32.totalorder %s6808_s27, %s7737_s1 }
 0x1d2   : > { %p5806_p12 = scmp.ne.s32.totalorder %s6808_s27, %s5805_s9  ;;  %p5811_p13 = scmp.lt.u32.totalorder %s5809_s12, %s5805_s9 }
 0x1d3   : > { %p5813_p6 = scmp.lt.u32.totalorder %s5805_s9, %s6808_s27 }
 0x1d4   : > { %p5807_p5 = pnand %p5806_p12, %p7722_p11  ;;  %p5812_p0 = por %p5811_p13, %p5810_p1 }
 0x1d6   : > { %p5808_p10 = pneg %p5807_p5  ;;  %p5814_p2 = por %p5813_p6, %p5812_p0 }
 0x1d8   : > { %p5815_p7 = pnand %p5814_p2, %p5808_p10 }
 0x1da   : > { %5818 = shalt.err (!%p5815_p7)
}
 0x1db   : > { %s5819_s3 = scalar_lea.vmem %s1029_s5, 16  ;;  %s6154_s8 = smov [#allocation14]  }
 0x1dc   : > { %p5820_p3 = scmp.ne.s32.totalorder %s1029_s5, %s5819_s3  ;;  %s5823_s0 = sshll.u32 %s6154_s8, 4  ;;  %s5824_s0 = int_to_ptr.vmem [resolvable:$false] %s5823_s0 }
 0x1dd   : > { %s5825_s7 = scalar_lea.vmem %s5824_s0, 32  ;;  %p5826_p4 = scmp.lt.s32.totalorder %s1029_s5, %s5824_s0 }
 0x1de   : > { %p5821_p9 = pnand %p5820_p3, %p7722_p11  ;;  %p5827_p12 = scmp.lt.s32.totalorder %s5825_s7, %s5819_s3 }
 0x1e0   : > { %p5822_p8 = pneg %p5821_p9  ;;  %p5828_p5 = por %p5827_p12, %p5826_p4 }
 0x1e2   : > { %p5829_p1 = pnand %p5828_p5, %p5822_p8 }
 0x1e4   : > { %5832 = shalt.err (!%p5829_p1)
}
 0x1e5   : > { %s7738_s9 = scalar_lea.sflag [#allocation13], %s6497_s10  ;;  %s7739_s14 = sld [smem:[#allocation81_spill]] }
 0x1e6   : > { %5115 = dma.hbm_to_vmem [thread:$0]  (%p7722_p11), %s6808_s27, 16, %s1029_s5, %s7738_s9  }
 0x1e7   : > { %s1066_s26 = scalar_lea.vmem [#allocation17], %s6500_s24 }
 0x1e8   : > { %s1073_s3 = sshll.u32 %s1066_s26, 4  ;;  %s6837_s3 = int_to_ptr.vmem [resolvable:$true] %s1073_s3 }
 0x1eb   : > { %s6834_s13 = scalar_lea.hbm %s7739_s14, %s6503_s29  ;;  %s5837_s5 = scalar_lea.hbm %s7739_s14, 2048 }
 0x1ec   : > { %s5833_s8 = scalar_lea.hbm %s6834_s13, 1024  ;;  %p5838_p6 = scmp.lt.u32.totalorder %s6834_s13, %s7739_s14 }
 0x1ed   : > { %p5834_p10 = scmp.ne.s32.totalorder %s6834_s13, %s5833_s8  ;;  %p5839_p2 = scmp.lt.u32.totalorder %s5837_s5, %s5833_s8 }
 0x1ee   : > { %p5841_p3 = scmp.lt.u32.totalorder %s5833_s8, %s6834_s13 }
 0x1ef   : > { %p5835_p13 = pnand %p5834_p10, %p7722_p11  ;;  %p5840_p7 = por %p5839_p2, %p5838_p6 }
 0x1f1   : > { %p5836_p0 = pneg %p5835_p13  ;;  %p5842_p9 = por %p5841_p3, %p5840_p7 }
 0x1f3   : > { %p5843_p8 = pnand %p5842_p9, %p5836_p0 }
 0x1f5   : > { %5846 = shalt.err (!%p5843_p8)
}
 0x1f6   : > { %s5847_s24 = scalar_lea.vmem %s6837_s3, 1024  ;;  %s6155_s9 = smov [#allocation17]  }
 0x1f7   : > { %p5848_p4 = scmp.ne.s32.totalorder %s6837_s3, %s5847_s24  ;;  %s5851_s30 = sshll.u32 %s6155_s9, 4  ;;  %s5852_s30 = int_to_ptr.vmem [resolvable:$false] %s5851_s30 }
 0x1f8   : > { %s5853_s12 = scalar_lea.vmem %s5852_s30, 2048  ;;  %p5854_p1 = scmp.lt.s32.totalorder %s6837_s3, %s5852_s30 }
 0x1f9   : > { %p5849_p12 = pnand %p5848_p4, %p7722_p11  ;;  %p5855_p10 = scmp.lt.s32.totalorder %s5853_s12, %s5847_s24 }
 0x1fb   : > { %p5850_p5 = pneg %p5849_p12  ;;  %p5856_p13 = por %p5855_p10, %p5854_p1 }
 0x1fd   : > { %p5857_p6 = pnand %p5856_p13, %p5850_p5 }
 0x1ff   : > { %5860 = shalt.err (!%p5857_p6)
}
 0x200   : > { %s7740_s26 = smov 4   ;;  %s7741_s8 = scalar_lea.sflag [#allocation16], %s6497_s10 }
 0x201   : > { %5117 = dma.hbm_to_vmem [thread:$0]  (%p7722_p11), %s6834_s13, 1024, %s6837_s3, %s7741_s8, %s7725_s6, %s7725_s6, %s7740_s26  }
 0x202   : > { %s7742_s16 = sld [smem:[#allocation83_spill]]  ;;  %s1103_s7 = scalar_lea.vmem [#allocation20], %s6494_s4 }
 0x203   : > { %s1110_s29 = sshll.u32 %s1103_s7, 4  ;;  %s1111_s29 = int_to_ptr.vmem [resolvable:$true] %s1110_s29 }
 0x208   : > { %s6869_s5 = scalar_lea.hbm %s7742_s16, %s6515_s18  ;;  %s5865_s6 = scalar_lea.hbm %s7742_s16, 32 }
 0x209   : > { %s5861_s24 = scalar_lea.hbm %s6869_s5, 16  ;;  %p5866_p3 = scmp.lt.u32.totalorder %s6869_s5, %s7742_s16 }
 0x20a   : > { %p5862_p0 = scmp.ne.s32.totalorder %s6869_s5, %s5861_s24  ;;  %p5867_p9 = scmp.lt.u32.totalorder %s5865_s6, %s5861_s24 }
 0x20b   : > { %p5869_p4 = scmp.lt.u32.totalorder %s5861_s24, %s6869_s5 }
 0x20c   : > { %p5863_p2 = pnand %p5862_p0, %p7722_p11  ;;  %p5868_p8 = por %p5867_p9, %p5866_p3 }
 0x20e   : > { %p5864_p7 = pneg %p5863_p2  ;;  %p5870_p12 = por %p5869_p4, %p5868_p8 }
 0x210   : > { %p5871_p5 = pnand %p5870_p12, %p5864_p7 }
 0x212   : > { %5874 = shalt.err (!%p5871_p5)
}
 0x213   : > { %s5875_s12 = scalar_lea.vmem %s1111_s29, 16  ;;  %s6156_s26 = smov [#allocation20]  }
 0x214   : > { %p5876_p1 = scmp.ne.s32.totalorder %s1111_s29, %s5875_s12  ;;  %s5879_s8 = sshll.u32 %s6156_s26, 4  ;;  %s5880_s8 = int_to_ptr.vmem [resolvable:$false] %s5879_s8 }
 0x215   : > { %s5881_s0 = scalar_lea.vmem %s5880_s8, 32  ;;  %p5882_p6 = scmp.lt.s32.totalorder %s1111_s29, %s5880_s8 }
 0x216   : > { %p5877_p10 = pnand %p5876_p1, %p7722_p11  ;;  %p5883_p0 = scmp.lt.s32.totalorder %s5881_s0, %s5875_s12 }
 0x218   : > { %p5878_p13 = pneg %p5877_p10  ;;  %p5884_p2 = por %p5883_p0, %p5882_p6 }
 0x21a   : > { %p5885_p3 = pnand %p5884_p2, %p5878_p13 }
 0x21c   : > { %5888 = shalt.err (!%p5885_p3)
}
 0x21d   : > { %s7743_s27 = scalar_lea.sflag [#allocation19], %s6497_s10  ;;  %s7744_s7 = sshll.u32 %s6127_s11, 5 }
 0x21e   : > { %5119 = dma.hbm_to_vmem [thread:$0]  (%p7722_p11), %s6869_s5, 16, %s1111_s29, %s7743_s27  }
 0x21f   : > { %s7745_s19 = sld [smem:[#allocation86_spill]]  ;;  %s7746_s6 = sshll.u32 %s6494_s4, 1 }
 0x220   : > { %s1146_s13 = scalar_lea.vmem [#allocation23], %s7746_s6 }
 0x221   : > { %s1154_s3 = sshll.u32 %s1146_s13, 4  ;;  %s1155_s3 = int_to_ptr.vmem [resolvable:$true] %s1154_s3 }
 0x225   : > { %s6896_s30 = scalar_lea.hbm %s7745_s19, %s7744_s7  ;;  %s5893_s26 = scalar_lea.hbm %s7745_s19, 64 }
 0x226   : > { %s5889_s12 = scalar_lea.hbm %s6896_s30, 32  ;;  %p5894_p4 = scmp.lt.u32.totalorder %s6896_s30, %s7745_s19 }
 0x227   : > { %p5890_p7 = scmp.ne.s32.totalorder %s6896_s30, %s5889_s12  ;;  %p5895_p12 = scmp.lt.u32.totalorder %s5893_s26, %s5889_s12 }
 0x228   : > { %p5897_p1 = scmp.lt.u32.totalorder %s5889_s12, %s6896_s30 }
 0x229   : > { %p5891_p9 = pnand %p5890_p7, %p7722_p11  ;;  %p5896_p5 = por %p5895_p12, %p5894_p4 }
 0x22b   : > { %p5892_p8 = pneg %p5891_p9  ;;  %p5898_p10 = por %p5897_p1, %p5896_p5 }
 0x22d   : > { %p5899_p13 = pnand %p5898_p10, %p5892_p8 }
 0x22f   : > { %5902 = shalt.err (!%p5899_p13)
}
 0x230   : > { %s5903_s27 = scalar_lea.vmem %s1155_s3, 32  ;;  %s6157_s7 = smov [#allocation23]  }
 0x231   : > { %p5904_p6 = scmp.ne.s32.totalorder %s1155_s3, %s5903_s27  ;;  %s5907_s24 = sshll.u32 %s6157_s7, 4  ;;  %s5908_s24 = int_to_ptr.vmem [resolvable:$false] %s5907_s24 }
 0x232   : > { %s5909_s9 = scalar_lea.vmem %s5908_s24, 64  ;;  %p5910_p3 = scmp.lt.s32.totalorder %s1155_s3, %s5908_s24 }
 0x233   : > { %p5905_p0 = pnand %p5904_p6, %p7722_p11  ;;  %p5911_p7 = scmp.lt.s32.totalorder %s5909_s9, %s5903_s27 }
 0x235   : > { %p5906_p2 = pneg %p5905_p0  ;;  %p5912_p9 = por %p5911_p7, %p5910_p3 }
 0x237   : > { %p5913_p4 = pnand %p5912_p9, %p5906_p2 }
 0x239   : > { %5916 = shalt.err (!%p5913_p4)
}
 0x23a   : > { %s7747_s6 = scalar_lea.sflag [#allocation22], %s6497_s10  ;;  %s7748_s22 = sld [smem:[#allocation89_spill]] }
 0x23b   : > { %5121 = dma.hbm_to_vmem [thread:$0]  (%p7722_p11), %s6896_s30, 32, %s1155_s3, %s7747_s6  }
 0x23c   : > { %s1189_s29 = scalar_lea.vmem [#allocation26], %s6494_s4 }
 0x23d   : > { %s1196_s26 = sshll.u32 %s1189_s29, 4  ;;  %s1197_s26 = int_to_ptr.vmem [resolvable:$true] %s1196_s26 }
 0x240   : > { %s6923_s5 = scalar_lea.hbm %s7748_s22, %s6515_s18  ;;  %s5921_s30 = scalar_lea.hbm %s7748_s22, 32 }
 0x241   : > { %s5917_s8 = scalar_lea.hbm %s6923_s5, 16  ;;  %p5922_p1 = scmp.lt.u32.totalorder %s6923_s5, %s7748_s22 }
 0x242   : > { %p5918_p8 = scmp.ne.s32.totalorder %s6923_s5, %s5917_s8  ;;  %p5923_p10 = scmp.lt.u32.totalorder %s5921_s30, %s5917_s8 }
 0x243   : > { %p5925_p6 = scmp.lt.u32.totalorder %s5917_s8, %s6923_s5 }
 0x244   : > { %p5919_p12 = pnand %p5918_p8, %p7722_p11  ;;  %p5924_p13 = por %p5923_p10, %p5922_p1 }
 0x246   : > { %p5920_p5 = pneg %p5919_p12  ;;  %p5926_p0 = por %p5925_p6, %p5924_p13 }
 0x248   : > { %p5927_p2 = pnand %p5926_p0, %p5920_p5 }
 0x24a   : > { %5930 = shalt.err (!%p5927_p2)
}
 0x24b   : > { %s5931_s24 = scalar_lea.vmem %s1197_s26, 16  ;;  %s6158_s9 = smov [#allocation26]  }
 0x24c   : > { %p5932_p3 = scmp.ne.s32.totalorder %s1197_s26, %s5931_s24  ;;  %s5935_s6 = sshll.u32 %s6158_s9, 4  ;;  %s5936_s6 = int_to_ptr.vmem [resolvable:$false] %s5935_s6 }
 0x24d   : > { %s5937_s13 = scalar_lea.vmem %s5936_s6, 32  ;;  %p5938_p4 = scmp.lt.s32.totalorder %s1197_s26, %s5936_s6 }
 0x24e   : > { %p5933_p7 = pnand %p5932_p3, %p7722_p11  ;;  %p5939_p8 = scmp.lt.s32.totalorder %s5937_s13, %s5931_s24 }
 0x250   : > { %p5934_p9 = pneg %p5933_p7  ;;  %p5940_p12 = por %p5939_p8, %p5938_p4 }
 0x252   : > { %p5941_p1 = pnand %p5940_p12, %p5934_p9 }
 0x254   : > { %5944 = shalt.err (!%p5941_p1)
}
 0x255   : > { %s7749_s12 = scalar_lea.sflag [#allocation25], %s6497_s10  ;;  %s7750_s23 = sld [smem:[#allocation90_spill]] }
 0x256   : > { %5123 = dma.hbm_to_vmem [thread:$0]  (%p7722_p11), %s6923_s5, 16, %s1197_s26, %s7749_s12  }
 0x257   : > { %s1206_s27 = scalar_lea.vmem [#allocation27], %s6494_s4  ;;  %s1204_s3 = scalar_lea.sflag [#allocation28], %s6497_s10 }
 0x258   : > { %s1213_s30 = sshll.u32 %s1206_s27, 4  ;;  %s1214_s30 = int_to_ptr.vmem [resolvable:$true] %s1213_s30 }
 0x25b   : > { %s6949_s0 = scalar_lea.hbm %s7750_s23, %s6515_s18  ;;  %s5949_s26 = scalar_lea.hbm %s7750_s23, 32 }
 0x25c   : > { %s5945_s7 = scalar_lea.hbm %s6949_s0, 16  ;;  %p5950_p6 = scmp.lt.u32.totalorder %s6949_s0, %s7750_s23 }
 0x25d   : > { %p5946_p5 = scmp.ne.s32.totalorder %s6949_s0, %s5945_s7  ;;  %p5951_p0 = scmp.lt.u32.totalorder %s5949_s26, %s5945_s7 }
 0x25e   : > { %p5953_p3 = scmp.lt.u32.totalorder %s5945_s7, %s6949_s0 }
 0x25f   : > { %p5947_p10 = pnand %p5946_p5, %p7722_p11  ;;  %p5952_p2 = por %p5951_p0, %p5950_p6 }
 0x261   : > { %p5948_p13 = pneg %p5947_p10  ;;  %p5954_p7 = por %p5953_p3, %p5952_p2 }
 0x263   : > { %p5955_p9 = pnand %p5954_p7, %p5948_p13 }
 0x265   : > { %5958 = shalt.err (!%p5955_p9)
}
 0x266   : > { %s5959_s4 = scalar_lea.vmem %s1214_s30, 16  ;;  %s6159_s10 = smov [#allocation27]  }
 0x267   : > { %p5960_p4 = scmp.ne.s32.totalorder %s1214_s30, %s5959_s4  ;;  %s5963_s6 = sshll.u32 %s6159_s10, 4  ;;  %s5964_s6 = int_to_ptr.vmem [resolvable:$false] %s5963_s6 }
 0x268   : > { %s5965_s13 = scalar_lea.vmem %s5964_s6, 32  ;;  %p5966_p1 = scmp.lt.s32.totalorder %s1214_s30, %s5964_s6 }
 0x269   : > { %p5961_p8 = pnand %p5960_p4, %p7722_p11  ;;  %p5967_p5 = scmp.lt.s32.totalorder %s5965_s13, %s5959_s4 }
 0x26b   : > { %p5962_p12 = pneg %p5961_p8  ;;  %p5968_p10 = por %p5967_p5, %p5966_p1 }
 0x26d   : > { %p5969_p0 = pnand %p5968_p10, %p5962_p12 }
 0x26f   : > { %5972 = shalt.err (!%p5969_p0)
}
 0x270   : > { %5124 = dma.hbm_to_vmem [thread:$0]  (%p7722_p11), %s6949_s0, 16, %s1214_s30, %s1204_s3  }
 0x271 PF: > { %s7751_s12 = sld [smem:[#allocation64_spill]] }
 0x277   : > { %p7752_p13 = scmp.ne.s32.totalorder %s7751_s12, 0 }
 0x279   : > { %1222 = sbr.rel (%p7752_p13) target bundleno = 7850 (0x1eaa), region = 132 }
 0x280   : > { %s7753_s29 = sld [smem:[#allocation49_spill]]  ;;  %s7754_s8 = sld [smem:[#allocation60_spill]] }
 0x286   : > { %s6973_s27 = sand.u32 1, %s7753_s29   ;;  %p7755_p6 = scmp.ne.s32.totalorder %s7754_s8, 0 }
 0x287   : > { %s5101_s7 = smul.u32 3, %s6973_s27  ;;  %s1225_s24 = scalar_lea.sflag [#allocation4], %s6973_s27 }
 0x289   : > { %s6977_s5 = scalar_lea.vmem [#allocation3], %s5101_s7 }
 0x28a   : > { %6046 = dma.done.wait (%p7755_p6), %s1225_s24, 48  }
 0x28b   : > { %6048 = vsyncadd (%p7755_p6), %s1225_s24, 4294967248  ;;  %s7756_s20 = sld [smem:[#allocation56_spill]]  ;;  %s4599_s30 = sshll.u32 %s6973_s27, 6 }
 0x28c   : > { %s6988_s26 = scalar_lea.vmem [#allocation6], %s4599_s30 }
 0x291   : > { %s6984_s0 = sand.u32 1, %s7756_s20  }
 0x292   : > { %s1234_s3 = scalar_lea.sflag [#allocation7], %s6984_s0 }
 0x293   : > { %6050 = dma.done.wait (%p7755_p6), %s1234_s3, 1040  }
 0x294   : > { %6052 = vsyncadd (%p7755_p6), %s1234_s3, 4294966256  ;;  %s1251_s18 = scalar_lea.sflag [#allocation10], %s6984_s0 }
 0x295   : > { %6054 = dma.done.wait (%p7755_p6), %s1251_s18, 32  }
 0x296   : > { %6056 = vsyncadd (%p7755_p6), %s1251_s18, 4294967264  ;;  %s1267_s6 = scalar_lea.sflag [#allocation13], %s6984_s0  ;;  %s7003_s13 = scalar_lea.vmem [#allocation12], %s4599_s30 }
 0x297   : > { %6058 = dma.done.wait (%p7755_p6), %s1267_s6, 1040  }
 0x298   : > { %6060 = vsyncadd (%p7755_p6), %s1267_s6, 4294966256  ;;  %s4601_s12 = sshll.u32 %s6973_s27, 1  ;;  %s1284_s7 = scalar_lea.sflag [#allocation16], %s6984_s0 }
 0x299   : > { %s7012_s24 = scalar_lea.vmem [#allocation15], %s4601_s12 }
 0x29a   : > { %6062 = dma.done.wait (%p7755_p6), %s1284_s7, 1056  }
 0x29b   : > { %6064 = vsyncadd (%p7755_p6), %s1284_s7, 4294966240  ;;  %s7018_s3 = scalar_lea.vmem [#allocation17], %s4599_s30  ;;  %s1302_s18 = scalar_lea.sflag [#allocation19], %s6984_s0 }
 0x29c   : > { %7757 = sst [smem:[#allocation65_spill]] %s7018_s3 }
 0x29d   : > { %6066 = dma.done.wait (%p7755_p6), %s1302_s18, 32  }
 0x29e   : > { %6068 = vsyncadd (%p7755_p6), %s1302_s18, 4294967264  ;;  %s1318_s10 = scalar_lea.sflag [#allocation22], %s6984_s0 }
 0x29f   : > { %6070 = dma.done.wait (%p7755_p6), %s1318_s10, 48  }
 0x2a0   : > { %6072 = vsyncadd (%p7755_p6), %s1318_s10, 4294967248  ;;  %s7033_s30 = scalar_lea.vmem [#allocation23], %s4601_s12  ;;  %s1335_s7 = scalar_lea.sflag [#allocation25], %s6984_s0 }
 0x2a1   : > { %7758 = sst [smem:[#allocation66_spill]] %s7033_s30 }
 0x2a2   : > { %6074 = dma.done.wait (%p7755_p6), %s1335_s7, 32  }
 0x2a3   : > { %6076 = vsyncadd (%p7755_p6), %s1335_s7, 4294967264  ;;  %s1351_s4 = scalar_lea.sflag [#allocation28], %s6984_s0 }
 0x2a4   : > { %6078 = dma.done.wait (%p7755_p6), %s1351_s4, 16  }
 0x2a5   : > { %6080 = vsyncadd (%p7755_p6), %s1351_s4, 4294967280  ;;  %p7759_p11 = scmp.eq.s32.totalorder %s7756_s20, 0 }
 0x2a7   : > { %6082 = dma.done.wait (%p7759_p11), [#allocation28], 16   ;;  %p7760_p2 = pmov %p7759_p11 }
 0x2a9   : > { %6084 = vsyncadd (%p7760_p2), [#allocation28], 4294967280  ;;  %p7761_p3 = pmov %p7760_p2 }
 0x2aa   : > { %p7762_p7 = pmov %p7760_p2 }
 0x2ab   : > { %6086 = dma.done.wait (%p7761_p3), [#allocation31], 1040  }
 0x2ac   : > { %6088 = vsyncadd (%p7762_p7), [#allocation31], 4294966256  ;;  %s7763_s10 = sld [smem:[#allocation47_spill]]  ;;  %s7764_s0 = sld [smem:[#allocation52_spill]] }
 0x2ad   : > { %s7765_s12 = sld [smem:[#allocation51_spill]]  ;;  %s7768_s17 = sld [smem:[#allocation68_spill]] }
 0x2ae   : > { %s7769_s23 = sld [smem:[#allocation69_spill]]  ;;  %s7770_s18 = sld [smem:[#allocation71_spill]] }
 0x2af   : > { %s7771_s3 = sld [smem:[#allocation79_spill]]  ;;  %s7772_s15 = sld [smem:[#allocation85_spill]] }
 0x2b0   : > { %s7773_s22 = sld [smem:[#allocation87_spill]] }
 0x2b2   : > { %s7655_s8 = sand.u32 1, %s7763_s10   ;;  %p1538_p9 = scmp.lt.s32.totalorder %s7764_s0, 1 }
 0x2b3   : > { %s7060_s4 = sshll.u32 %s7655_s8, 3  ;;  %p1553_p4 = scmp.lt.s32.totalorder %s7765_s12, 1 }
 0x2b4   : > { %s7820_s0 = smov (!%p1538_p9, %s7764_s0), 1  ;;  %s7767_s8 = sld [smem:[#allocation67_spill]] }
 0x2b5   : > { %s1554_s7 = scalar_select %p1553_p4, %s7765_s12, 1 }
 0x2b6   : > { %s7068_s20 = sshll.u32 %s7820_s0, 3  ;;  %p4618_p8 = scmp.ne.s32.totalorder %s7765_s12, 0 }
 0x2b7   : > { %s1545_s19 = scalar_lea.vmem %s7768_s17, %s7068_s20  ;;  %s1549_s25 = scalar_lea.vmem %s7769_s23, %s7068_s20 }
 0x2b8   : > { %s5102_s28 = smul.u32 192, %s1554_s7  ;;  %s4771_s11 = sshll.u32 %s1554_s7, 7 }
 0x2b9   : > { %s7094_s1 = scalar_lea.vmem %s7771_s3, %s4771_s11  ;;  %s7099_s16 = scalar_lea.vmem %s7772_s15, %s4771_s11 }
 0x2ba   : > { %s1541_s14 = scalar_lea.vmem %s7767_s8, %s7068_s20  ;;  %s7089_s30 = scalar_lea.vmem %s7770_s18, %s5102_s28 }
 0x2bb   : > { %s7104_s23 = scalar_lea.vmem %s7773_s22, %s4771_s11  ;;  %s1537_s7 = scalar_lea.vmem [#allocation33], %s7060_s4  ;;  %v1578_v0 = vld [vmem:[%s1541_s14] sm:$0xff] (!%p4618_p8) }
 0x2bc   : > { %1577 = sbr.rel (%p4618_p8) target bundleno = 707 (0x2c3), region = 212  ;;  %1579 = vst [vmem:[#allocation2] sm:$0xff] (!%p4618_p8), %v1578_v0 }
 0x2c3 PF: > { %v5273_v1 = vld [vmem:[%s7089_s30 + $0x4] ss:$12 sps:$4 sm:$0xff]   ;;  %v5275_v2 = vld [vmem:[%s7089_s30] ss:$12 sps:$4 sm:$0xff]   ;;  %v6160_v3 = vmov 0   ;;  %v6161_v20 = vmov 0.0   ;;  %v1635_v21 = vlaneseq }
 0x2c4   : > { %1810 = vmatprep.mubr.bf16.mxu0 %v6160_v3  ;;  %1778 = vmatprep.subr.bf16.mxu0 %v5273_v1  ;;  %v5276_v4 = vld [vmem:[%s7089_s30 + $0x1c] ss:$12 sps:$4 sm:$0xff]   ;;  %v5278_v5 = vld [vmem:[%s7089_s30 + $0x18] ss:$12 sps:$4 sm:$0xff]   ;;  %v5279_v6 = vld [vmem:[%s7089_s30 + $0x34] ss:$12 sps:$4 sm:$0xff]  }
 0x2c5   : > { %1779 = vmatpush1.bf16.msra.mxu0 %v5275_v2  ;;  %v5281_v7 = vld [vmem:[%s7089_s30 + $0x30] ss:$12 sps:$4 sm:$0xff]   ;;  %v5282_v8 = vld [vmem:[%s7089_s30 + $0x4c] ss:$12 sps:$4 sm:$0xff]   ;;  %v5284_v9 = vld [vmem:[%s7089_s30 + $0x48] ss:$12 sps:$4 sm:$0xff]   ;;  %4879 = vmatprep.subr.bf16.mxu1 %v6161_v20 }
 0x2c6   : > { %1780 = vmatprep.subr.bf16.mxu0 %v5276_v4  ;;  %v5285_v10 = vld [vmem:[%s7089_s30 + $0x64] ss:$12 sps:$4 sm:$0xff]   ;;  %v5287_v11 = vld [vmem:[%s7089_s30 + $0x60] ss:$12 sps:$4 sm:$0xff]   ;;  %v5288_v12 = vld [vmem:[%s7089_s30 + $0x7c] ss:$12 sps:$4 sm:$0xff]  }
 0x2c7   : > { %v5290_v13 = vld [vmem:[%s7089_s30 + $0x78] ss:$12 sps:$4 sm:$0xff]   ;;  %v5291_v14 = vld [vmem:[%s7089_s30 + $0x94] ss:$12 sps:$4 sm:$0xff]   ;;  %v5293_v15 = vld [vmem:[%s7089_s30 + $0x90] ss:$12 sps:$4 sm:$0xff]  }
 0x2c8   : > { %v5294_v16 = vld [vmem:[%s7089_s30 + $0xac] ss:$12 sps:$4 sm:$0xff]   ;;  %v5296_v17 = vld [vmem:[%s7089_s30 + $0xa8] ss:$12 sps:$4 sm:$0xff]   ;;  %v7125_v18 = vld [vmem:[#allocation2] sm:$0xff]  ;;  %vm6162_vm0 = vmmov 0  }
 0x2c9   : > { %1781 = vmatpush1.bf16.msra.mxu0 %v5278_v5  ;;  %v7129_v19 = vpack.c.bf16 %v7125_v18, %v7125_v18  ;;  %4895 = vmatprep.mubr.msk.bf16.mxu1 %vm6162_vm0, %v6161_v20  ;;  %v7138_v22 = vshrl.u32 %v1635_v21, 7  ;;  %v7144_v24 = vld [vmem:[%s6977_s5] sm:$0x7]  ;;  %vm1863_vm1 = vcmask 261120   ;;  %s6163_s14 = smov 96   ;;  %v7197_v49 = vld [vmem:[%s1549_s25] sm:$0xff] }
 0x2ca   : > { %1782 = vmatprep.subr.bf16.mxu0 %v5279_v6  ;;  %v5297_v38 = vld [vmem:[%s7089_s30 + $0x8] ss:$12 sps:$4 sm:$0xff]   ;;  %v5298_v39 = vld [vmem:[%s7089_s30 + $0x20] ss:$12 sps:$4 sm:$0xff]   ;;  %v5299_v40 = vld [vmem:[%s7089_s30 + $0x38] ss:$12 sps:$4 sm:$0xff]  }
 0x2cb   : > { %v7141_v23 = vsub.s32 0, %v7138_v22  ;;  %v7147_v25 = vsub.s32 1, %v7138_v22  ;;  %4880 = vmatpush3.bf16.msra.mxu1 %v5297_v38  ;;  %v5300_v41 = vld [vmem:[%s7089_s30 + $0x50] ss:$12 sps:$4 sm:$0xff]   ;;  %v5301_v42 = vld [vmem:[%s7089_s30 + $0x68] ss:$12 sps:$4 sm:$0xff]  }
 0x2cc   : > { %4881 = vmatprep.subr.bf16.mxu1 %v6161_v20  ;;  %v5302_v43 = vld [vmem:[%s7089_s30 + $0x80] ss:$12 sps:$4 sm:$0xff]   ;;  %v5303_v46 = vld [vmem:[%s7089_s30 + $0x98] ss:$12 sps:$4 sm:$0xff]   ;;  %v5304_v47 = vld [vmem:[%s7089_s30 + $0xb0] ss:$12 sps:$4 sm:$0xff]  }
 0x2cd   : > { %1783 = vmatpush1.bf16.msra.mxu0 %v5281_v7  ;;  %v1638_v26 = vrot.slane %v7144_v24, %v7141_v23  ;;  %v1642_v27 = vrot.slane %v7144_v24, %v7147_v25  ;;  %vm1910_vm2 = vcmask 64512   ;;  %s6164_s25 = smov 64   ;;  %vm1926_vm3 = vcmask 1043456   ;;  %s6165_s5 = smov 32  }
 0x2ce   : > { %1784 = vmatprep.subr.bf16.mxu0 %v5282_v8  ;;  %v1645_v8 = vsub.s32 2, %v7138_v22  ;;  %s7775_s9 = scalar_lea.vmem [#allocation8], %s6973_s27  ;;  %s7778_s12 = scalar_lea.vmem [#allocation11], %s6973_s27 }
 0x2cf   : > { %4882 = vmatpush3.bf16.msra.mxu1 %v5298_v39  ;;  %s7780_s29 = sld [smem:[#allocation70_spill]]  ;;  %s7783_s6 = scalar_lea.vmem [#allocation18], %s6973_s27 }
 0x2d0   : > { %4883 = vmatprep.subr.bf16.mxu1 %v6161_v20  ;;  %s7785_s8 = sld [smem:[#allocation66_spill]]  ;;  %s7786_s10 = scalar_lea.vmem [#allocation21], %s6973_s27 }
 0x2d1   : > { %1785 = vmatpush1.bf16.msra.mxu0 %v5284_v9  ;;  %v1646_v9 = vrot.slane %v7144_v24, %v1645_v8  ;;  %s7787_s15 = scalar_lea.vmem [#allocation24], %s6973_s27  ;;  %s7789_s17 = scalar_lea.vmem [#allocation27], %s6973_s27 }
 0x2d2   : > { %1786 = vmatprep.subr.bf16.mxu0 %v5285_v10  ;;  %s7790_s21 = sld [smem:[#allocation51_spill]] }
 0x2d3   : > { %4884 = vmatpush3.bf16.msra.mxu1 %v5299_v40 }
 0x2d4   : > { %4885 = vmatprep.subr.bf16.mxu1 %v6161_v20 }
 0x2d5   : > { %1787 = vmatpush1.bf16.msra.mxu0 %v5287_v11  ;;  %s7781_s18 = scalar_lea.vmem %s7780_s29, %s7820_s0  ;;  %s7782_s0 = sld [smem:[#allocation65_spill]] }
 0x2d6   : > { %1788 = vmatprep.subr.bf16.mxu0 %v5288_v12 }
 0x2d7   : > { %4886 = vmatpush3.bf16.msra.mxu1 %v5300_v41 }
 0x2d8   : > { %4887 = vmatprep.subr.bf16.mxu1 %v6161_v20  ;;  %p4750_p12 = scmp.ne.s32.totalorder %s7790_s21, 1 }
 0x2d9   : > { %1789 = vmatpush1.bf16.msra.mxu0 %v5290_v13  ;;  %vm6167_vm4 = vmmov (!%p4750_p12), 0  }
 0x2da   : > { %1790 = vmatprep.subr.bf16.mxu0 %v5291_v14 }
 0x2db   : > { %4888 = vmatpush3.bf16.msra.mxu1 %v5301_v42 }
 0x2dc   : > { %4889 = vmatprep.subr.bf16.mxu1 %v6161_v20 }
 0x2dd   : > { %1791 = vmatpush1.bf16.msra.mxu0 %v5293_v15 }
 0x2de   : > { %1792 = vmatprep.subr.bf16.mxu0 %v5294_v16 }
 0x2df   : > { %4890 = vmatpush3.bf16.msra.mxu1 %v5302_v43 }
 0x2e0   : > { %4891 = vmatprep.subr.bf16.mxu1 %v6161_v20 }
 0x2e1   : > { %1793 = vmatpush1.bf16.msra.mxu0 %v5296_v17 }
 0x2e2   : > { %4899 = vmatprep.subr.bf16.mxu0 %v6161_v20 }
 0x2e3   : > { %4892 = vmatpush3.bf16.msra.mxu1 %v5303_v46 }
 0x2e4   : > { %1811 = vmatmul.mubr.bf16.vlgmr.msra.gmra.mrb[0].mxu0 %v7129_v19  ;;  %4893 = vmatprep.subr.bf16.mxu1 %v6161_v20 }
 0x2e5   : > { %4901 = vmatprep.mubr.msk.bf16.mxu0 %vm6162_vm0, %v6161_v20 }
 0x2e7   : > { %4894 = vmatpush3.bf16.msra.mxu1 %v5304_v47 }
 0x2e8   : > { %4905 = vmatprep.subr.bf16.mxu1 %v6161_v20 }
 0x2ea   : > { %4896 = vmatmul.mubr.bf16.vlgmr.msra.gmra.mrb[0].mxu1 %v7129_v19 }
 0x2eb   : > { %4907 = vmatprep.mubr.msk.bf16.mxu1 %vm6162_vm0, %v6161_v20 }
 0x3b7   : > { %v1812_v28 = vpop.f32.mrb[0].mxu0 }
 0x3b8   : > { %v1813_v29 = vadd.f32 %v1812_v28, %v1638_v26  ;;  %v1814_v30 = vpop.f32.mrb[1].mxu0  ;;  %v5307_v26 = vld [vmem:[%s6988_s26 + $0x10] sm:$0xff]  }
 0x3b9   : > { %v1815_v31 = vadd.f32 %v1814_v30, %v1642_v27  ;;  %v1816_v32 = vpop.f32.mrb[2].mxu0  ;;  %v5308_v27 = vld [vmem:[%s6988_s26 + $0x18] sm:$0xff]  }
 0x3ba   : > { %v1817_v33 = vpop.f32.mrb[3].mxu0  ;;  %v1859_v34 = vmul.f32 0.17677669, %v1813_v29 }
 0x3bb   : > { %v7153_v35 = vpack.c.bf16 %v1815_v31, %v1815_v31  ;;  %v5305_v33 = vld [vmem:[%s6988_s26] sm:$0xff]  }
 0x3bc   : > { %v7159_v37 = vpack.c.bf16 %v1859_v34, %v1859_v34 }
 0x3bd   : > { %1975 = vrot.lane.b32.xlu0 %v7153_v35, %s6163_s14  ;;  %v1868_v36 = vsel %vm1863_vm1, %v7153_v35, 0  ;;  %v1853_v1 = vpop.f32.mrb[0].mxu1 }
 0x3be   : > { %4900 = vmatpush3.bf16.xpose.msra.mxu0 %v1868_v36  ;;  %v4897_v2 = vpop.f32.mrb[1].mxu1  ;;  %v1854_v10 = vadd.f32 %v1853_v1, %v1646_v9  ;;  %v5306_v36 = vld [vmem:[%s6988_s26 + $0x8] sm:$0xff]  }
 0x3bf   : > { %4911 = vmatprep.subr.bf16.mxu0 %v6161_v20  ;;  %v1856_v4 = vpop.f32.mrb[2].mxu1 }
 0x3c0   : > { %v4898_v5 = vpop.f32.mrb[3].mxu1  ;;  %v7206_v11 = vpack.c.bf16 %v1854_v10, %v1854_v10 }
 0x3c1   : > { %1972 = vrot.lane.b32.xlu0 %v7159_v37, %s6163_s14 }
 0x3c2   : > { %v1928_v12 = vsel %vm1926_vm3, %v7206_v11, 0 }
 0x3c3   : > { %4906 = vmatpush3.bf16.msra.mxu1 %v1928_v12  ;;  %v5309_v12 = vld [vmem:[%s6988_s26 + $0x20] sm:$0xff]  }
 0x3c4   : > { %4917 = vmatprep.subr.bf16.mxu1 %v6161_v20 }
 0x3c5   : > { %4902 = vmatmul.mubr.msk.bf16.vlgmr.msra.gmra.mrb[4].mxu0 %vm1863_vm1, %v7159_v37 }
 0x3c6   : > { %4913 = vmatprep.mubr.msk.bf16.mxu0 %vm6162_vm0, %v6161_v20 }
 0x42f   : > { %v1976_v44 = vpop.permute.xlu0 %1975 }
 0x430   : > { %v1981_v45 = vsel %vm1863_vm1, %v1976_v44, 0 }
 0x431   : > { %4912 = vmatpush3.bf16.xpose.msra.mxu0 %v1981_v45 }
 0x432   : > { %4923 = vmatprep.subr.bf16.mxu0 %v6161_v20 }
 0x433   : > { %v1973_v48 = vpop.permute.xlu0 %1972 }
 0x438   : > { %4914 = vmatmul.mubr.msk.bf16.vlgmr.msra.gmra.mrb[8].mxu0 %vm1863_vm1, %v1973_v48 }
 0x439   : > { %4927 = vmatprep.mubr.msk.bf16.mxu0 %vm6162_vm0, %v6161_v20  ;;  %4924 = vmatpush3.bf16.msra.mxu0 %v5307_v26 }
 0x43a   : > { %4925 = vmatprep.subr.bf16.mxu0 %v6161_v20 }
 0x43d   : > { %4926 = vmatpush3.bf16.msra.mxu0 %v5308_v27 }
 0x43e   : > { %4939 = vmatprep.subr.bf16.mxu0 %v6161_v20 }
 0x498   : > { %v1904_v50 = vpop.f32.mrb[4].mxu0 }
 0x499   : > { %v1905_v51 = vadd.f32 %v1904_v50, %v7197_v49  ;;  %v4903_v52 = vpop.f32.mrb[5].mxu0 }
 0x49a   : > { %v1907_v53 = vpop.f32.mrb[6].mxu0 }
 0x49b   : > { %v4904_v54 = vpop.f32.mrb[7].mxu0  ;;  %v1911_v55 = vsel %vm1910_vm2, %v1905_v51, -inf }
 0x49c   : > { %1912 = vmax.xlane.f32.xlu1 %v1911_v55 }
 0x50b   : > { %v2017_v56 = vpop.f32.mrb[8].mxu0 }
 0x50c   : > { %v2018_v57 = vadd.f32 %v2017_v56, %v7197_v49  ;;  %v4915_v58 = vpop.f32.mrb[9].mxu0 }
 0x50d   : > { %v2020_v59 = vpop.f32.mrb[10].mxu0 }
 0x50e   : > { %v4916_v60 = vpop.f32.mrb[11].mxu0  ;;  %v2023_v61 = vsel %vm1910_vm2, %v2018_v57, -inf }
 0x50f   : > { %2024 = vmax.xlane.f32.xlu1 %v2023_v61 }
 0x529   : > { %v1913_v62 = vpop.xlane.xlu1 %1912 }
 0x52a   : > { %v1914_v63 = vsub.f32 %v1905_v51, %v1913_v62 }
 0x52c   : > { %v1915_v0 = vmul.f32 1.442695, %v1914_v63 }
 0x52e   : > { %5393 = vpow2.f32 %v1915_v0 }
 0x538   : > { %v5394_v6 = vpop.eup %5393 }
 0x539   : > { %v1917_v7 = vsel %vm1910_vm2, %v5394_v6, 0.0 }
 0x53a   : > { %1918 = vadd.xlane.f32.xlu0 %v1917_v7 }
 0x550   : > { %2257 = vrot.lane.b32.xlu0 %v7206_v11, %s6164_s25 }
 0x59c   : > { %v2025_v13 = vpop.xlane.xlu1 %2024 }
 0x59d   : > { %v2026_v14 = vsub.f32 %v2018_v57, %v2025_v13 }
 0x59f   : > { %v2027_v15 = vmul.f32 1.442695, %v2026_v14 }
 0x5a1   : > { %5395 = vpow2.f32 %v2027_v15 }
 0x5ab   : > { %v5396_v16 = vpop.eup %5395 }
 0x5ac   : > { %v2029_v17 = vsel %vm1910_vm2, %v5396_v16, 0.0 }
 0x5ad   : > { %2030 = vadd.xlane.f32.xlu1 %v2029_v17 }
 0x5be   : > { %2036 = vrot.lane.b32.xlu1 %v7206_v11, %s6163_s14 }
 0x5c2   : > { %2197 = vrot.lane.b32.xlu1 %v7153_v35, %s6164_s25 }
 0x5c6   : > { %2195 = vrot.lane.b32.xlu1 %v7159_v37, %s6164_s25 }
 0x5c7   : > { %v1919_v19 = vpop.xlane.xlu0 %1918 }
 0x5c8   : > { %5397 = vrcp.f32 %v1919_v19 }
 0x5cb   : > { %v2258_v38 = vpop.permute.xlu0 %2257 }
 0x5cc   : > { %v2263_v43 = vsel %vm1926_vm3, %v2258_v38, 0 }
 0x5d2   : > { %v5398_v21 = vpop.eup %5397 }
 0x5d3   : > { %v1921_v22 = vmul.f32 %v5398_v21, %v5394_v6 }
 0x5d5   : > { %v1922_v24 = vpack.c.bf16 %v1921_v22, %v1921_v22 }
 0x5d7   : > { %4908 = vmatmul.mubr.msk.bf16.vlgmr.msra.gmra.mrb[4].mxu1 %vm1910_vm2, %v1922_v24 }
 0x5d8   : > { %4919 = vmatprep.mubr.msk.bf16.mxu1 %vm6162_vm0, %v6161_v20 }
 0x63a   : > { %v2031_v28 = vpop.xlane.xlu1 %2030 }
 0x63b   : > { %5399 = vrcp.f32 %v2031_v28 }
 0x63e   : > { %v2037_v29 = vpop.permute.xlu1 %2036 }
 0x63f   : > { %v2042_v30 = vsel %vm1926_vm3, %v2037_v29, 0 }
 0x640   : > { %4918 = vmatpush3.bf16.msra.mxu1 %v2042_v30 }
 0x641   : > { %4931 = vmatprep.subr.bf16.mxu1 %v6161_v20 }
 0x642   : > { %v2198_v45 = vpop.permute.xlu1 %2197 }
 0x643   : > { %v2203_v51 = vsel %vm1863_vm1, %v2198_v45, 0 }
 0x645   : > { %v5400_v31 = vpop.eup %5399 }
 0x646   : > { %v2033_v32 = vmul.f32 %v5400_v31, %v5396_v16  ;;  %v2196_v53 = vpop.permute.xlu1 %2195 }
 0x648   : > { %v2034_v34 = vpack.c.bf16 %v2033_v32, %v2033_v32 }
 0x64a   : > { %4920 = vmatmul.mubr.msk.bf16.vlgmr.msra.gmra.mrb[8].mxu1 %vm1910_vm2, %v2034_v34 }
 0x64b   : > { %4932 = vmatpush3.bf16.msra.mxu1 %v5305_v33  ;;  %4935 = vmatprep.mubr.msk.bf16.mxu1 %vm6162_vm0, %v6161_v20 }
 0x64c   : > { %4933 = vmatprep.subr.bf16.mxu1 %v6161_v20 }
 0x64f   : > { %4934 = vmatpush3.bf16.msra.mxu1 %v5306_v36 }
 0x650   : > { %4945 = vmatprep.subr.bf16.mxu1 %v6161_v20 }
 0x6aa   : > { %v1964_v39 = vpop.f32.mrb[4].mxu1 }
 0x6ab   : > { %v1970_v40 = vpack.c.bf16 %v1964_v39, %v1964_v39  ;;  %v4909_v41 = vpop.f32.mrb[5].mxu1 }
 0x6ac   : > { %v1967_v42 = vpop.f32.mrb[6].mxu1  ;;  %v5311_v41 = vld [vmem:[%s6988_s26 + $0x30] sm:$0xff]  }
 0x6ad   : > { %v4910_v44 = vpop.f32.mrb[7].mxu1  ;;  %4936 = vmatmul.mubr.msk.bf16.vlgmr.msra.gmra.mrb[12].mxu1 %vm1863_vm1, %v1970_v40 }
 0x6ae   : > { %4946 = vmatpush3.bf16.msra.mxu1 %v2263_v43  ;;  %4947 = vmatprep.mubr.msk.bf16.mxu1 %vm6162_vm0, %v6161_v20 }
 0x6af   : > { %4959 = vmatprep.subr.bf16.mxu1 %v6161_v20 }
 0x71d   : > { %v2078_v46 = vpop.f32.mrb[8].mxu1 }
 0x71e   : > { %v2084_v47 = vpack.c.bf16 %v2078_v46, %v2078_v46  ;;  %v4921_v48 = vpop.f32.mrb[9].mxu1 }
 0x71f   : > { %v2081_v50 = vpop.f32.mrb[10].mxu1 }
 0x720   : > { %v4922_v52 = vpop.f32.mrb[11].mxu1  ;;  %4928 = vmatmul.mubr.msk.bf16.vlgmr.msra.gmra.mrb[12].mxu0 %vm1863_vm1, %v2084_v47 }
 0x721   : > { %4940 = vmatpush3.bf16.xpose.msra.mxu0 %v2203_v51  ;;  %4941 = vmatprep.mubr.msk.bf16.mxu0 %vm6162_vm0, %v6161_v20  ;;  %v5312_v52 = vld [vmem:[%s6988_s26 + $0x38] sm:$0xff]  }
 0x722   : > { %4951 = vmatprep.subr.bf16.mxu0 %v6161_v20 }
 0x728   : > { %4942 = vmatmul.mubr.msk.bf16.vlgmr.msra.gmra.mrb[16].mxu0 %vm1863_vm1, %v2196_v53 }
 0x729   : > { %4955 = vmatprep.mubr.msk.bf16.mxu0 %vm6162_vm0, %v6161_v20  ;;  %4952 = vmatpush3.bf16.msra.mxu0 %v5309_v12  ;;  %v5323_v12 = vld [vmem:[%s7094_s1 + $0x30] ss:$8 sps:$4 sm:$0xff]  }
 0x72a   : > { %4953 = vmatprep.subr.bf16.mxu0 %v6161_v20 }
 0x780   : > { %v2189_v54 = vpop.f32.mrb[12].mxu1 }
 0x781   : > { %v4937_v55 = vpop.f32.mrb[13].mxu1 }
 0x782   : > { %v2192_v56 = vpop.f32.mrb[14].mxu1 }
 0x783   : > { %v4938_v57 = vpop.f32.mrb[15].mxu1 }
 0x7f3   : > { %v2134_v58 = vpop.f32.mrb[12].mxu0 }
 0x7f4   : > { %v7249_v59 = vadd.f32 %v2189_v54, %v2134_v58  ;;  %v4929_v60 = vpop.f32.mrb[13].mxu0  ;;  %v4663_v58 = vld [vmem:[%s7775_s9] ss:$0 sm:$0xff] }
 0x7f5   : > { %v2137_v61 = vpop.f32.mrb[14].mxu0 }
 0x7f6   : > { %v4930_v62 = vpop.f32.mrb[15].mxu0 }
 0x7fb   : > { %v2239_v63 = vpop.f32.mrb[16].mxu0 }
 0x7fc   : > { %v2240_v0 = vadd.f32 %v2239_v63, %v7197_v49  ;;  %v4943_v1 = vpop.f32.mrb[17].mxu0 }
 0x7fd   : > { %v2242_v2 = vpop.f32.mrb[18].mxu0 }
 0x7fe   : > { %v4944_v4 = vpop.f32.mrb[19].mxu0  ;;  %v2245_v5 = vsel %vm1910_vm2, %v2240_v0, -inf  ;;  %v5313_v2 = vld [vmem:[%s7094_s1] ss:$8 sps:$4 sm:$0xff]  }
 0x7ff   : > { %2246 = vmax.xlane.f32.xlu1 %v2245_v5  ;;  %v5315_v4 = vld [vmem:[%s7094_s1 + $0x4] ss:$8 sps:$4 sm:$0xff]   ;;  %v5318_v5 = vld [vmem:[%s7094_s1 + $0x14] ss:$8 sps:$4 sm:$0xff]  }
 0x88c   : > { %v2247_v6 = vpop.xlane.xlu1 %2246 }
 0x88d   : > { %v2248_v7 = vsub.f32 %v2240_v0, %v2247_v6  ;;  %v5322_v6 = vld [vmem:[%s7003_s13] sm:$0xff]  }
 0x88f   : > { %v2249_v8 = vmul.f32 1.442695, %v2248_v7  ;;  %v5316_v7 = vld [vmem:[%s7094_s1 + $0x10] ss:$8 sps:$4 sm:$0xff]  }
 0x891   : > { %5401 = vpow2.f32 %v2249_v8  ;;  %v5321_v8 = vld [vmem:[%s7094_s1 + $0x24] ss:$8 sps:$4 sm:$0xff]  }
 0x89b   : > { %v5402_v9 = vpop.eup %5401 }
 0x89c   : > { %v2251_v10 = vsel %vm1910_vm2, %v5402_v9, 0.0 }
 0x89d   : > { %2252 = vadd.xlane.f32.xlu0 %v2251_v10  ;;  %v5325_v10 = vld [vmem:[%s7094_s1 + $0x34] ss:$8 sps:$4 sm:$0xff]  }
 0x8b3   : > { %2364 = vrot.lane.b32.xlu0 %v7153_v35, %s6165_s5 }
 0x8b7   : > { %2362 = vrot.lane.b32.xlu0 %v7159_v37, %s6165_s5  ;;  %v5310_v37 = vld [vmem:[%s6988_s26 + $0x28] sm:$0xff]  }
 0x8b8   : > { %4954 = vmatpush3.bf16.msra.mxu0 %v5310_v37  ;;  %v5333_v37 = vld [vmem:[%s7094_s1 + $0x54] ss:$8 sps:$4 sm:$0xff]  }
 0x8b9   : > { %4965 = vmatprep.subr.bf16.mxu0 %v6161_v20 }
 0x92a   : > { %v2253_v13 = vpop.xlane.xlu0 %2252 }
 0x92b   : > { %5403 = vrcp.f32 %v2253_v13  ;;  %v5329_v13 = vld [vmem:[%s7094_s1 + $0x44] ss:$8 sps:$4 sm:$0xff]  }
 0x92e   : > { %v2365_v16 = vpop.permute.xlu0 %2364 }
 0x92f   : > { %v2370_v19 = vsel %vm1863_vm1, %v2365_v16, 0 }
 0x932   : > { %v2363_v35 = vpop.permute.xlu0 %2362 }
 0x935   : > { %v5404_v14 = vpop.eup %5403 }
 0x936   : > { %v2255_v15 = vmul.f32 %v5404_v14, %v5402_v9  ;;  %v5326_v9 = vld [vmem:[%s7003_s13 + $0x8] sm:$0xff]  }
 0x937   : > { %v5327_v14 = vld [vmem:[%s7094_s1 + $0x40] ss:$8 sps:$4 sm:$0xff]  }
 0x938   : > { %v2256_v17 = vpack.c.bf16 %v2255_v15, %v2255_v15 }
 0x93a   : > { %4948 = vmatmul.mubr.msk.bf16.vlgmr.msra.gmra.mrb[16].mxu1 %vm1910_vm2, %v2256_v17 }
 0x93b   : > { %4960 = vmatpush3.bf16.xpose.msra.mxu1 %v2370_v19  ;;  %4961 = vmatprep.mubr.msk.bf16.mxu1 %vm6162_vm0, %v6161_v20 }
 0x93c   : > { %4971 = vmatprep.subr.bf16.mxu1 %v6161_v20 }
 0x942   : > { %4962 = vmatmul.mubr.msk.bf16.vlgmr.msra.gmra.mrb[20].mxu1 %vm1863_vm1, %v2363_v35  ;;  %v5330_v35 = vld [vmem:[%s7003_s13 + $0x10] sm:$0xff]  }
 0x943   : > { %4975 = vmatprep.mubr.msk.bf16.mxu1 %vm6162_vm0, %v6161_v20  ;;  %4972 = vmatpush3.bf16.msra.mxu1 %v5311_v41 }
 0x944   : > { %4973 = vmatprep.subr.bf16.mxu1 %v6161_v20 }
 0x947   : > { %4974 = vmatpush3.bf16.msra.mxu1 %v5312_v52 }
 0x948   : > { %2806 = vmatprep.subr.bf16.mxu1 %v5315_v4 }
 0xa0d   : > { %v2299_v21 = vpop.f32.mrb[16].mxu1 }
 0xa0e   : > { %v2305_v22 = vpack.c.bf16 %v2299_v21, %v2299_v21  ;;  %v4949_v24 = vpop.f32.mrb[17].mxu1  ;;  %v5331_v21 = vld [vmem:[%s7094_s1 + $0x50] ss:$8 sps:$4 sm:$0xff]  }
 0xa0f   : > { %v2302_v26 = vpop.f32.mrb[18].mxu1  ;;  %v5337_v24 = vld [vmem:[%s7094_s1 + $0x64] ss:$8 sps:$4 sm:$0xff]  }
 0xa10   : > { %v4950_v27 = vpop.f32.mrb[19].mxu1  ;;  %4956 = vmatmul.mubr.msk.bf16.vlgmr.msra.gmra.mrb[20].mxu0 %vm1863_vm1, %v2305_v22  ;;  %v5334_v22 = vld [vmem:[%s7003_s13 + $0x18] sm:$0xff]   ;;  %v5335_v26 = vld [vmem:[%s7094_s1 + $0x60] ss:$8 sps:$4 sm:$0xff]  }
 0xa11   : > { %4967 = vmatprep.mubr.msk.bf16.mxu0 %vm6162_vm0, %v6161_v20  ;;  %v5338_v27 = vld [vmem:[%s7003_s13 + $0x20] sm:$0xff]  }
 0xa15   : > { %v2406_v28 = vpop.f32.mrb[20].mxu1 }
 0xa16   : > { %v2407_v29 = vadd.f32 %v2406_v28, %v7197_v49  ;;  %v4963_v30 = vpop.f32.mrb[21].mxu1  ;;  %v5341_v28 = vld [vmem:[%s7094_s1 + $0x74] ss:$8 sps:$4 sm:$0xff]  }
 0xa17   : > { %v2409_v31 = vpop.f32.mrb[22].mxu1  ;;  %v5342_v30 = vld [vmem:[%s7003_s13 + $0x28] sm:$0xff]  }
 0xa18   : > { %v4964_v32 = vpop.f32.mrb[23].mxu1  ;;  %v2412_v33 = vsel %vm1910_vm2, %v2407_v29, -inf  ;;  %v1581_v31 = vld [vmem:[%s1545_s19] sm:$0xff]  ;;  %s7777_s19 = scalar_lea.vmem [#allocation9], %s6973_s27 }
 0xa19   : > { %2413 = vmax.xlane.f32.xlu0 %v2412_v33  ;;  %v2714_v32 = vpack.c.bf16 %v1581_v31, %v1581_v31  ;;  %v5343_v33 = vld [vmem:[%s7003_s13 + $0x30] sm:$0xff]   ;;  %v4664_v41 = vld [vmem:[%s7777_s19] ss:$0 sm:$0xff] }
 0xaa6   : > { %v2414_v34 = vpop.xlane.xlu0 %2413 }
 0xaa7   : > { %v2415_v36 = vsub.f32 %v2407_v29, %v2414_v34  ;;  %v5339_v29 = vld [vmem:[%s7094_s1 + $0x70] ss:$8 sps:$4 sm:$0xff]  }
 0xaa8   : > { %v5344_v34 = vld [vmem:[%s7003_s13 + $0x38] sm:$0xff]   ;;  %s7779_s13 = scalar_lea.vmem [#allocation14], %s6973_s27 }
 0xaa9   : > { %v2416_v38 = vmul.f32 1.442695, %v2415_v36 }
 0xaab   : > { %5405 = vpow2.f32 %v2416_v38 }
 0xab5   : > { %v5406_v39 = vpop.eup %5405 }
 0xab6   : > { %v2418_v40 = vsel %vm1910_vm2, %v5406_v39, 0.0 }
 0xab7   : > { %2419 = vadd.xlane.f32.xlu1 %v2418_v40 }
 0xac8   : > { %2424 = vrot.lane.b32.xlu1 %v7206_v11, %s6165_s5 }
 0xae3   : > { %v2355_v49 = vpop.f32.mrb[20].mxu0 }
 0xae4   : > { %v2361_v42 = vadd.f32 %v2355_v49, %v7249_v59  ;;  %v4957_v43 = vpop.f32.mrb[21].mxu0 }
 0xae5   : > { %v2358_v44 = vpop.f32.mrb[22].mxu0 }
 0xae6   : > { %v4958_v45 = vpop.f32.mrb[23].mxu0 }
 0xb44   : > { %v2420_v46 = vpop.xlane.xlu1 %2419 }
 0xb45   : > { %5407 = vrcp.f32 %v2420_v46  ;;  %v2598_v46 = vld [vmem:[%s7012_s24] sm:$0x3] }
 0xb48   : > { %v2425_v47 = vpop.permute.xlu1 %2424 }
 0xb49   : > { %v2430_v48 = vsel %vm1926_vm3, %v2425_v47, 0  ;;  %v2719_v47 = vrot.slane %v2598_v46, %v7141_v23 }
 0xb4a   : > { %4966 = vmatpush3.bf16.msra.mxu0 %v2430_v48  ;;  %v2723_v48 = vrot.slane %v2598_v46, %v7147_v25 }
 0xb4b   : > { %4979 = vmatprep.subr.bf16.mxu0 %v6161_v20 }
 0xb4f   : > { %v5408_v11 = vpop.eup %5407 }
 0xb50   : > { %v2422_v50 = vmul.f32 %v5408_v11, %v5406_v39 }
 0xb52   : > { %v2423_v51 = vpack.c.bf16 %v2422_v50, %v2422_v50 }
 0xb54   : > { %4968 = vmatmul.mubr.msk.bf16.vlgmr.msra.gmra.mrb[24].mxu0 %vm1910_vm2, %v2423_v51 }
 0xb55   : > { %4995 = vmatprep.mubr.msk.bf16.mxu0 %vm6162_vm0, %v6161_v20  ;;  %4980 = vmatpush3.bf16.msra.mxu0 %v5322_v6 }
 0xb56   : > { %4981 = vmatprep.subr.bf16.mxu0 %v6161_v20 }
 0xb59   : > { %4982 = vmatpush3.bf16.msra.mxu0 %v5326_v9 }
 0xb5a   : > { %4983 = vmatprep.subr.bf16.mxu0 %v6161_v20 }
 0xb5d   : > { %4984 = vmatpush3.bf16.msra.mxu0 %v5330_v35 }
 0xb5e   : > { %4985 = vmatprep.subr.bf16.mxu0 %v6161_v20 }
 0xb61   : > { %4986 = vmatpush3.bf16.msra.mxu0 %v5334_v22 }
 0xb62   : > { %4987 = vmatprep.subr.bf16.mxu0 %v6161_v20 }
 0xb65   : > { %4988 = vmatpush3.bf16.msra.mxu0 %v5338_v27 }
 0xb66   : > { %4989 = vmatprep.subr.bf16.mxu0 %v6161_v20 }
 0xb69   : > { %4990 = vmatpush3.bf16.msra.mxu0 %v5342_v30 }
 0xb6a   : > { %4991 = vmatprep.subr.bf16.mxu0 %v6161_v20 }
 0xb6d   : > { %4992 = vmatpush3.bf16.msra.mxu0 %v5343_v33 }
 0xb6e   : > { %4993 = vmatprep.subr.bf16.mxu0 %v6161_v20 }
 0xb71   : > { %4994 = vmatpush3.bf16.msra.mxu0 %v5344_v34 }
 0xb72   : > { %4999 = vmatprep.subr.bf16.mxu0 %v6161_v20 }
 0xc27   : > { %v2466_v53 = vpop.f32.mrb[24].mxu0 }
 0xc28   : > { %v2472_v54 = vpack.c.bf16 %v2466_v53, %v2466_v53  ;;  %v4969_v55 = vpop.f32.mrb[25].mxu0 }
 0xc29   : > { %v2469_v56 = vpop.f32.mrb[26].mxu0 }
 0xc2a   : > { %v4970_v57 = vpop.f32.mrb[27].mxu0  ;;  %4976 = vmatmul.mubr.msk.bf16.vlgmr.msra.gmra.mrb[24].mxu1 %vm1863_vm1, %v2472_v54 }
 0xc2b   : > { %2838 = vmatprep.mubr.bf16.mxu1 %v6160_v3  ;;  %2807 = vmatpush1.bf16.msra.mxu1 %v5313_v2 }
 0xc2c   : > { %2808 = vmatprep.subr.bf16.mxu1 %v5318_v5 }
 0xc2f   : > { %2809 = vmatpush1.bf16.msra.mxu1 %v5316_v7  ;;  %v7377_v7 = vld [vmem:[%s7781_s18] ss:$0 sm:$0xff] }
 0xc30   : > { %2810 = vmatprep.subr.bf16.mxu1 %v5321_v8 }
 0xcfd   : > { %v2522_v59 = vpop.f32.mrb[24].mxu1 }
 0xcfe   : > { %v2528_v60 = vadd.f32 %v2522_v59, %v2361_v42  ;;  %v4977_v61 = vpop.f32.mrb[25].mxu1  ;;  %v4665_v42 = vld [vmem:[%s7778_s12] ss:$0 sm:$0xff] }
 0xcff   : > { %v2525_v62 = vpop.f32.mrb[26].mxu1  ;;  %v4666_v59 = vld [vmem:[%s7779_s13] ss:$0 sm:$0xff] }
 0xd00   : > { %v2535_v63 = vadd.f32 %v4663_v58, %v2528_v60  ;;  %v4978_v0 = vpop.f32.mrb[27].mxu1 }
 0xd02   : > { %v2536_v1 = vadd.f32 %v2535_v63, %v7125_v18  ;;  %v5319_v18 = vld [vmem:[%s7094_s1 + $0x20] ss:$8 sps:$4 sm:$0xff]   ;;  %s7784_s1 = scalar_lea.vmem [#allocation20], %s6973_s27 }
 0xd03   : > { %2811 = vmatpush1.bf16.msra.mxu1 %v5319_v18 }
 0xd04   : > { %2539 = vadd.xlane.f32.xlu1 %v2536_v1  ;;  %2812 = vmatprep.subr.bf16.mxu1 %v5325_v10 }
 0xd07   : > { %2813 = vmatpush1.bf16.msra.mxu1 %v5323_v12 }
 0xd08   : > { %2814 = vmatprep.subr.bf16.mxu1 %v5329_v13 }
 0xd0b   : > { %2815 = vmatpush1.bf16.msra.mxu1 %v5327_v14 }
 0xd0c   : > { %2816 = vmatprep.subr.bf16.mxu1 %v5333_v37 }
 0xd0f   : > { %2817 = vmatpush1.bf16.msra.mxu1 %v5331_v21 }
 0xd10   : > { %2818 = vmatprep.subr.bf16.mxu1 %v5337_v24 }
 0xd13   : > { %2819 = vmatpush1.bf16.msra.mxu1 %v5335_v26 }
 0xd14   : > { %2820 = vmatprep.subr.bf16.mxu1 %v5341_v28 }
 0xd17   : > { %2821 = vmatpush1.bf16.msra.mxu1 %v5339_v29 }
 0xd18   : > { %5005 = vmatprep.subr.bf16.mxu1 %v6161_v20 }
 0xd1a   : > { %2839 = vmatmul.mubr.bf16.vlgmr.msra.gmra.mrb[28].mxu1 %v2714_v32 }
 0xd1b   : > { %5007 = vmatprep.mubr.msk.bf16.mxu1 %vm6162_vm0, %v6161_v20 }
 0xd91   : > { %v2540_v15 = vpop.xlane.xlu1 %2539 }
 0xd92   : > { %v2542_v16 = vmul.f32 0.0078125, %v2540_v15 }
 0xd94   : > { %v2543_v17 = vsub.f32 %v2536_v1, %v2542_v16 }
 0xd96   : > { %v2544_v19 = vmul.f32 %v2543_v17, %v2543_v17 }
 0xd98   : > { %2545 = vadd.xlane.f32.xlu0 %v2544_v19 }
 0xded   : > { %v2840_v11 = vpop.f32.mrb[28].mxu1 }
 0xdee   : > { %v2841_v50 = vadd.f32 %v2840_v11, %v2719_v47  ;;  %v2842_v51 = vpop.f32.mrb[29].mxu1  ;;  %v5346_v47 = vld [vmem:[%s7782_s0 + $0x8] sm:$0xff]  }
 0xdef   : > { %v2843_v52 = vadd.f32 %v2842_v51, %v2723_v48  ;;  %v2844_v53 = vpop.f32.mrb[30].mxu1 }
 0xdf0   : > { %v7345_v54 = vpack.c.bf16 %v2841_v50, %v2841_v50  ;;  %v2845_v55 = vpop.f32.mrb[31].mxu1 }
 0xdf1   : > { %v7347_v56 = vpack.c.bf16 %v2843_v52, %v2843_v52 }
 0xdf2   : > { %2964 = vrot.lane.b32.xlu0 %v7345_v54, %s6163_s14  ;;  %v2859_v57 = vsel %vm1863_vm1, %v7345_v54, 0 }
 0xdf3   : > { %v2917_v58 = vsel %vm1926_vm3, %v7347_v56, 0 }
 0xdf4   : > { %5006 = vmatpush3.bf16.msra.mxu1 %v2917_v58 }
 0xdf5   : > { %5017 = vmatprep.subr.bf16.mxu1 %v6161_v20 }
 0xe25   : > { %v2546_v36 = vpop.xlane.xlu0 %2545 }
 0xe26   : > { %v2547_v38 = vmul.f32 0.0078125, %v2546_v36 }
 0xe28   : > { %v2548_v39 = vadd.f32 1e-05, %v2547_v38  ;;  %v5347_v38 = vld [vmem:[%s7782_s0 + $0x10] sm:$0xff]  }
 0xe2a   : > { %5409 = vrsqrt.f32 %v2548_v39  ;;  %v5348_v39 = vld [vmem:[%s7782_s0 + $0x18] sm:$0xff]  }
 0xe34   : > { %v5410_v40 = vpop.eup %5409 }
 0xe35   : > { %v2550_v49 = vmul.f32 %v5410_v40, %v2543_v17 }
 0xe37   : > { %v2557_v43 = vmul.f32 %v4664_v41, %v2550_v49 }
 0xe39   : > { %v7336_v44 = vadd.f32 %v4665_v42, %v2557_v43 }
 0xe3b   : > { %v2617_v45 = vpack.c.bf16 %v7336_v44, %v7336_v44 }
 0xe3d   : > { %4996 = vmatmul.mubr.bf16.vlgmr.msra.gmra.mrb[28].mxu0 %v2617_v45  ;;  %v5345_v45 = vld [vmem:[%s7782_s0] sm:$0xff]  }
 0xe3e   : > { %5001 = vmatprep.mubr.msk.bf16.mxu0 %vm6162_vm0, %v6161_v20  ;;  %5000 = vmatpush3.bf16.xpose.msra.mxu0 %v2859_v57 }
 0xe3f   : > { %5011 = vmatprep.subr.bf16.mxu0 %v6161_v20 }
 0xe64   : > { %v2965_v0 = vpop.permute.xlu0 %2964 }
 0xe65   : > { %v2970_v5 = vsel %vm1863_vm1, %v2965_v0, 0 }
 0xf10   : > { %v2706_v60 = vpop.f32.mrb[28].mxu0 }
 0xf11   : > { %v2707_v61 = vadd.f32 %v4666_v59, %v2706_v60  ;;  %v4997_v62 = vpop.f32.mrb[29].mxu0 }
 0xf12   : > { %v2709_v63 = vpop.f32.mrb[30].mxu0 }
 0xf13   : > { %v2712_v1 = vmul.f32 0.17677669, %v2707_v61  ;;  %v4998_v2 = vpop.f32.mrb[31].mxu0 }
 0xf15   : > { %v7359_v4 = vpack.c.bf16 %v2712_v1, %v2712_v1 }
 0xf17   : > { %2961 = vrot.lane.b32.xlu0 %v7359_v4, %s6163_s14  ;;  %5002 = vmatmul.mubr.msk.bf16.vlgmr.msra.gmra.mrb[32].mxu0 %vm1863_vm1, %v7359_v4 }
 0xf18   : > { %5012 = vmatpush3.bf16.xpose.msra.mxu0 %v2970_v5  ;;  %5013 = vmatprep.mubr.msk.bf16.mxu0 %vm6162_vm0, %v6161_v20 }
 0xf19   : > { %5023 = vmatprep.subr.bf16.mxu0 %v6161_v20 }
 0xf89   : > { %v2962_v6 = vpop.permute.xlu0 %2961 }
 0xf8a   : > { %5014 = vmatmul.mubr.msk.bf16.vlgmr.msra.gmra.mrb[36].mxu0 %vm1863_vm1, %v2962_v6 }
 0xf8b   : > { %5027 = vmatprep.mubr.msk.bf16.mxu0 %vm6162_vm0, %v6161_v20  ;;  %5024 = vmatpush3.bf16.msra.mxu0 %v5347_v38 }
 0xf8c   : > { %5025 = vmatprep.subr.bf16.mxu0 %v6161_v20 }
 0xf8f   : > { %5026 = vmatpush3.bf16.msra.mxu0 %v5348_v39 }
 0xf90   : > { %5039 = vmatprep.subr.bf16.mxu0 %v6161_v20 }
 0xfea   : > { %v2895_v8 = vpop.f32.mrb[32].mxu0 }
 0xfeb   : > { %v2896_v9 = vadd.f32 %v7377_v7, %v2895_v8  ;;  %v5003_v18 = vpop.f32.mrb[33].mxu0 }
 0xfec   : > { %v2898_v10 = vpop.f32.mrb[34].mxu0 }
 0xfed   : > { %v5004_v12 = vpop.f32.mrb[35].mxu0  ;;  %v2901_v13 = vsel %vm1910_vm2, %v2896_v9, -inf }
 0xfee   : > { %2902 = vmax.xlane.f32.xlu1 %v2901_v13 }
0x105d   : > { %v3006_v14 = vpop.f32.mrb[36].mxu0 }
0x105e   : > { %v3007_v15 = vadd.f32 %v7377_v7, %v3006_v14  ;;  %v5015_v16 = vpop.f32.mrb[37].mxu0 }
0x105f   : > { %v3009_v17 = vpop.f32.mrb[38].mxu0 }
0x1060   : > { %v5016_v19 = vpop.f32.mrb[39].mxu0  ;;  %v3012_v35 = vsel %vm1910_vm2, %v3007_v15, -inf }
0x1061   : > { %3013 = vmax.xlane.f32.xlu0 %v3012_v35 }
0x107b   : > { %v2903_v37 = vpop.xlane.xlu1 %2902 }
0x107c   : > { %v2904_v21 = vsub.f32 %v2896_v9, %v2903_v37 }
0x107e   : > { %v2905_v22 = vmul.f32 1.442695, %v2904_v21 }
0x1080   : > { %5411 = vpow2.f32 %v2905_v22 }
0x108a   : > { %v5412_v24 = vpop.eup %5411 }
0x108b   : > { %v2907_v26 = vsel %vm1910_vm2, %v5412_v24, 0.0 }
0x108c   : > { %2908 = vadd.xlane.f32.xlu1 %v2907_v26  ;;  %v5349_v26 = vld [vmem:[%s7782_s0 + $0x20] sm:$0xff]  }
0x10ee   : > { %v3014_v27 = vpop.xlane.xlu0 %3013 }
0x10ef   : > { %v3015_v28 = vsub.f32 %v3007_v15, %v3014_v27 }
0x10f1   : > { %v3016_v29 = vmul.f32 1.442695, %v3015_v28 }
0x10f3   : > { %5413 = vpow2.f32 %v3016_v29 }
0x10fd   : > { %v5414_v30 = vpop.eup %5413 }
0x10fe   : > { %v3018_v31 = vsel %vm1910_vm2, %v5414_v30, 0.0 }
0x10ff   : > { %3019 = vadd.xlane.f32.xlu1 %v3018_v31 }
0x1110   : > { %3025 = vrot.lane.b32.xlu1 %v7347_v56, %s6163_s14 }
0x1114   : > { %3186 = vrot.lane.b32.xlu1 %v7345_v54, %s6164_s25 }
0x1118   : > { %3184 = vrot.lane.b32.xlu1 %v7359_v4, %s6164_s25 }
0x1119   : > { %v2909_v32 = vpop.xlane.xlu1 %2908 }
0x111a   : > { %5415 = vrcp.f32 %v2909_v32  ;;  %v5350_v32 = vld [vmem:[%s7782_s0 + $0x28] sm:$0xff]  }
0x1124   : > { %v5416_v33 = vpop.eup %5415 }
0x1125   : > { %v2911_v34 = vmul.f32 %v5416_v33, %v5412_v24 }
0x1127   : > { %v2912_v36 = vpack.c.bf16 %v2911_v34, %v2911_v34 }
0x1129   : > { %5008 = vmatmul.mubr.msk.bf16.vlgmr.msra.gmra.mrb[32].mxu1 %vm1910_vm2, %v2912_v36 }
0x112a   : > { %5019 = vmatprep.mubr.msk.bf16.mxu1 %vm6162_vm0, %v6161_v20 }
0x118c   : > { %v3020_v40 = vpop.xlane.xlu1 %3019 }
0x118d   : > { %5417 = vrcp.f32 %v3020_v40 }
0x1190   : > { %v3026_v41 = vpop.permute.xlu1 %3025 }
0x1191   : > { %v3031_v49 = vsel %vm1926_vm3, %v3026_v41, 0 }
0x1192   : > { %5018 = vmatpush3.bf16.msra.mxu1 %v3031_v49 }
0x1193   : > { %5031 = vmatprep.subr.bf16.mxu1 %v6161_v20 }
0x1194   : > { %v3187_v53 = vpop.permute.xlu1 %3186 }
0x1195   : > { %v3192_v60 = vsel %vm1863_vm1, %v3187_v53, 0 }
0x1197   : > { %v5418_v42 = vpop.eup %5417 }
0x1198   : > { %v3022_v43 = vmul.f32 %v5418_v42, %v5414_v30  ;;  %v3185_v62 = vpop.permute.xlu1 %3184 }
0x119a   : > { %v3023_v46 = vpack.c.bf16 %v3022_v43, %v3022_v43 }
0x119c   : > { %5020 = vmatmul.mubr.msk.bf16.vlgmr.msra.gmra.mrb[36].mxu1 %vm1910_vm2, %v3023_v46 }
0x119d   : > { %5032 = vmatpush3.bf16.msra.mxu1 %v5345_v45  ;;  %5035 = vmatprep.mubr.msk.bf16.mxu1 %vm6162_vm0, %v6161_v20 }
0x119e   : > { %5033 = vmatprep.subr.bf16.mxu1 %v6161_v20 }
0x11a1   : > { %5034 = vmatpush3.bf16.msra.mxu1 %v5346_v47 }
0x11a2   : > { %5045 = vmatprep.subr.bf16.mxu1 %v6161_v20 }
0x11fc   : > { %v2953_v48 = vpop.f32.mrb[32].mxu1 }
0x11fd   : > { %v2959_v11 = vpack.c.bf16 %v2953_v48, %v2953_v48  ;;  %v5009_v50 = vpop.f32.mrb[33].mxu1 }
0x11fe   : > { %v2956_v51 = vpop.f32.mrb[34].mxu1 }
0x11ff   : > { %v5010_v52 = vpop.f32.mrb[35].mxu1  ;;  %5036 = vmatmul.mubr.msk.bf16.vlgmr.msra.gmra.mrb[40].mxu1 %vm1863_vm1, %v2959_v11  ;;  %v5351_v51 = vld [vmem:[%s7782_s0 + $0x30] sm:$0xff]  }
0x1200   : > { %5047 = vmatprep.mubr.msk.bf16.mxu1 %vm6162_vm0, %v6161_v20 }
0x126f   : > { %v3067_v55 = vpop.f32.mrb[36].mxu1 }
0x1270   : > { %v3073_v57 = vpack.c.bf16 %v3067_v55, %v3067_v55  ;;  %v5021_v58 = vpop.f32.mrb[37].mxu1 }
0x1271   : > { %v3070_v59 = vpop.f32.mrb[38].mxu1 }
0x1272   : > { %v5022_v61 = vpop.f32.mrb[39].mxu1  ;;  %5028 = vmatmul.mubr.msk.bf16.vlgmr.msra.gmra.mrb[40].mxu0 %vm1863_vm1, %v3073_v57 }
0x1273   : > { %5040 = vmatpush3.bf16.xpose.msra.mxu0 %v3192_v60  ;;  %5041 = vmatprep.mubr.msk.bf16.mxu0 %vm6162_vm0, %v6161_v20 }
0x1274   : > { %5051 = vmatprep.subr.bf16.mxu0 %v6161_v20 }
0x127a   : > { %5042 = vmatmul.mubr.msk.bf16.vlgmr.msra.gmra.mrb[44].mxu0 %vm1863_vm1, %v3185_v62 }
0x127b   : > { %5055 = vmatprep.mubr.msk.bf16.mxu0 %vm6162_vm0, %v6161_v20  ;;  %5052 = vmatpush3.bf16.msra.mxu0 %v5349_v26  ;;  %v5362_v26 = vld [vmem:[%s7099_s16 + $0x30] ss:$8 sps:$4 sm:$0xff]  }
0x127c   : > { %5053 = vmatprep.subr.bf16.mxu0 %v6161_v20 }
0x127f   : > { %5054 = vmatpush3.bf16.msra.mxu0 %v5350_v32  ;;  %v5374_v32 = vld [vmem:[%s7099_s16 + $0x70] ss:$8 sps:$4 sm:$0xff]  }
0x1280   : > { %5065 = vmatprep.subr.bf16.mxu0 %v6161_v20 }
0x12d2   : > { %v3178_v63 = vpop.f32.mrb[40].mxu1 }
0x12d3   : > { %v5037_v0 = vpop.f32.mrb[41].mxu1 }
0x12d4   : > { %v3181_v1 = vpop.f32.mrb[42].mxu1 }
0x12d5   : > { %v5038_v2 = vpop.f32.mrb[43].mxu1 }
0x1345   : > { %v3123_v5 = vpop.f32.mrb[40].mxu0 }
0x1346   : > { %v7418_v6 = vadd.f32 %v3178_v63, %v3123_v5  ;;  %v5029_v8 = vpop.f32.mrb[41].mxu0 }
0x1347   : > { %v3126_v9 = vpop.f32.mrb[42].mxu0 }
0x1348   : > { %v5030_v18 = vpop.f32.mrb[43].mxu0 }
0x134d   : > { %v3228_v10 = vpop.f32.mrb[44].mxu0 }
0x134e   : > { %v3229_v12 = vadd.f32 %v7377_v7, %v3228_v10  ;;  %v5043_v13 = vpop.f32.mrb[45].mxu0 }
0x134f   : > { %v3231_v14 = vpop.f32.mrb[46].mxu0 }
0x1350   : > { %v5044_v15 = vpop.f32.mrb[47].mxu0  ;;  %v3234_v16 = vsel %vm1910_vm2, %v3229_v12, -inf  ;;  %v5353_v14 = vld [vmem:[%s7099_s16] ss:$8 sps:$4 sm:$0xff]  }
0x1351   : > { %3235 = vmax.xlane.f32.xlu0 %v3234_v16  ;;  %v5355_v15 = vld [vmem:[%s7099_s16 + $0x4] ss:$8 sps:$4 sm:$0xff]   ;;  %v5358_v16 = vld [vmem:[%s7099_s16 + $0x14] ss:$8 sps:$4 sm:$0xff]  }
0x1367   : > { %3246 = vrot.lane.b32.xlu0 %v7347_v56, %s6164_s25 }
0x136b   : > { %3353 = vrot.lane.b32.xlu0 %v7345_v54, %s6165_s5 }
0x136f   : > { %3351 = vrot.lane.b32.xlu0 %v7359_v4, %s6165_s5 }
0x13de   : > { %v3236_v17 = vpop.xlane.xlu0 %3235 }
0x13df   : > { %v3237_v19 = vsub.f32 %v3229_v12, %v3236_v17  ;;  %v5356_v17 = vld [vmem:[%s7099_s16 + $0x10] ss:$8 sps:$4 sm:$0xff]  }
0x13e1   : > { %v3238_v35 = vmul.f32 1.442695, %v3237_v19  ;;  %v5361_v19 = vld [vmem:[%s7099_s16 + $0x24] ss:$8 sps:$4 sm:$0xff]  }
0x13e2   : > { %v3247_v37 = vpop.permute.xlu0 %3246 }
0x13e3   : > { %5419 = vpow2.f32 %v3238_v35  ;;  %v3252_v21 = vsel %vm1926_vm3, %v3247_v37, 0  ;;  %v5359_v35 = vld [vmem:[%s7099_s16 + $0x20] ss:$8 sps:$4 sm:$0xff]  }
0x13e4   : > { %5046 = vmatpush3.bf16.msra.mxu1 %v3252_v21 }
0x13e5   : > { %5059 = vmatprep.subr.bf16.mxu1 %v6161_v20 }
0x13e6   : > { %v3354_v28 = vpop.permute.xlu0 %3353 }
0x13e7   : > { %v3359_v30 = vsel %vm1863_vm1, %v3354_v28, 0  ;;  %v5368_v28 = vld [vmem:[%s7099_s16 + $0x50] ss:$8 sps:$4 sm:$0xff]  }
0x13ea   : > { %v3352_v31 = vpop.permute.xlu0 %3351 }
0x13ed   : > { %v5420_v22 = vpop.eup %5419 }
0x13ee   : > { %v3240_v24 = vsel %vm1910_vm2, %v5420_v22, 0.0 }
0x13ef   : > { %3241 = vadd.xlane.f32.xlu1 %v3240_v24  ;;  %v5364_v24 = vld [vmem:[%s7099_s16 + $0x34] ss:$8 sps:$4 sm:$0xff]  }
0x147c   : > { %v3242_v54 = vpop.xlane.xlu1 %3241 }
0x147d   : > { %5421 = vrcp.f32 %v3242_v54  ;;  %v5367_v54 = vld [vmem:[%s7099_s16 + $0x44] ss:$8 sps:$4 sm:$0xff]  }
0x1487   : > { %v5422_v4 = vpop.eup %5421 }
0x1488   : > { %v3244_v27 = vmul.f32 %v5422_v4, %v5420_v22  ;;  %v5365_v4 = vld [vmem:[%s7099_s16 + $0x40] ss:$8 sps:$4 sm:$0xff]  }
0x148a   : > { %v3245_v29 = vpack.c.bf16 %v3244_v27, %v3244_v27  ;;  %v5370_v27 = vld [vmem:[%s7099_s16 + $0x54] ss:$8 sps:$4 sm:$0xff]  }
0x148c   : > { %5048 = vmatmul.mubr.msk.bf16.vlgmr.msra.gmra.mrb[44].mxu1 %vm1910_vm2, %v3245_v29  ;;  %v5373_v29 = vld [vmem:[%s7099_s16 + $0x64] ss:$8 sps:$4 sm:$0xff]  }
0x148d   : > { %5060 = vmatpush3.bf16.xpose.msra.mxu1 %v3359_v30  ;;  %5061 = vmatprep.mubr.msk.bf16.mxu1 %vm6162_vm0, %v6161_v20  ;;  %v5371_v30 = vld [vmem:[%s7099_s16 + $0x60] ss:$8 sps:$4 sm:$0xff]  }
0x148e   : > { %5071 = vmatprep.subr.bf16.mxu1 %v6161_v20 }
0x1494   : > { %5062 = vmatmul.mubr.msk.bf16.vlgmr.msra.gmra.mrb[48].mxu1 %vm1863_vm1, %v3352_v31  ;;  %v5376_v31 = vld [vmem:[%s7099_s16 + $0x74] ss:$8 sps:$4 sm:$0xff]   ;;  %s7788_s16 = scalar_lea.vmem [#allocation26], %s6973_s27 }
0x1495   : > { %5075 = vmatprep.mubr.msk.bf16.mxu1 %vm6162_vm0, %v6161_v20  ;;  %5072 = vmatpush3.bf16.msra.mxu1 %v5351_v51  ;;  %v4713_v51 = vld [vmem:[%s7784_s1] ss:$0 sm:$0xff] }
0x1496   : > { %5073 = vmatprep.subr.bf16.mxu1 %v6161_v20 }
0x155f   : > { %v3288_v33 = vpop.f32.mrb[44].mxu1 }
0x1560   : > { %v3294_v34 = vpack.c.bf16 %v3288_v33, %v3288_v33  ;;  %v5049_v36 = vpop.f32.mrb[45].mxu1  ;;  %v5377_v33 = vld [vmem:[%s7104_s23 + $0x40] sm:$0xff]  }
0x1561   : > { %v3291_v38 = vpop.f32.mrb[46].mxu1  ;;  %v5379_v36 = vld [vmem:[%s7104_s23 + $0x48] sm:$0xff]  }
0x1562   : > { %v5050_v39 = vpop.f32.mrb[47].mxu1  ;;  %5056 = vmatmul.mubr.msk.bf16.vlgmr.msra.gmra.mrb[48].mxu0 %vm1863_vm1, %v3294_v34  ;;  %v5378_v34 = vld [vmem:[%s7104_s23] sm:$0xff]   ;;  %v5380_v38 = vld [vmem:[%s7104_s23 + $0x8] sm:$0xff]  }
0x1563   : > { %5067 = vmatprep.mubr.msk.bf16.mxu0 %vm6162_vm0, %v6161_v20  ;;  %v5352_v20 = vld [vmem:[%s7782_s0 + $0x38] sm:$0xff]   ;;  %v5381_v39 = vld [vmem:[%s7104_s23 + $0x50] sm:$0xff]  }
0x1564   : > { %5074 = vmatpush3.bf16.msra.mxu1 %v5352_v20 }
0x1565   : > { %4848 = vmatprep.subr.bf16.mxu1 %v5377_v33 }
0x1567   : > { %v3395_v40 = vpop.f32.mrb[48].mxu1 }
0x1568   : > { %v3396_v41 = vadd.f32 %v7377_v7, %v3395_v40  ;;  %v5063_v49 = vpop.f32.mrb[49].mxu1  ;;  %v5382_v40 = vld [vmem:[%s7104_s23 + $0x10] sm:$0xff]  }
0x1569   : > { %v3398_v42 = vpop.f32.mrb[50].mxu1  ;;  %v5384_v49 = vld [vmem:[%s7104_s23 + $0x18] sm:$0xff]  }
0x156a   : > { %v5064_v43 = vpop.f32.mrb[51].mxu1  ;;  %v3401_v45 = vsel %vm1910_vm2, %v3396_v41, -inf  ;;  %v5385_v42 = vld [vmem:[%s7104_s23 + $0x60] sm:$0xff]  }
0x156b   : > { %3402 = vmax.xlane.f32.xlu0 %v3401_v45  ;;  %v5386_v43 = vld [vmem:[%s7104_s23 + $0x20] sm:$0xff]   ;;  %v5387_v45 = vld [vmem:[%s7104_s23 + $0x68] sm:$0xff]  }
0x15f8   : > { %v3403_v46 = vpop.xlane.xlu0 %3402 }
0x15f9   : > { %v3404_v47 = vsub.f32 %v3396_v41, %v3403_v46  ;;  %v5383_v41 = vld [vmem:[%s7104_s23 + $0x58] sm:$0xff]   ;;  %v5388_v46 = vld [vmem:[%s7104_s23 + $0x28] sm:$0xff]  }
0x15fb   : > { %v3405_v48 = vmul.f32 1.442695, %v3404_v47 }
0x15fd   : > { %5423 = vpow2.f32 %v3405_v48 }
0x1607   : > { %v5424_v11 = vpop.eup %5423 }
0x1608   : > { %v3407_v50 = vsel %vm1910_vm2, %v5424_v11, 0.0 }
0x1609   : > { %3408 = vadd.xlane.f32.xlu1 %v3407_v50 }
0x161a   : > { %3413 = vrot.lane.b32.xlu1 %v7347_v56, %s6165_s5 }
0x1635   : > { %v3344_v7 = vpop.f32.mrb[48].mxu0 }
0x1636   : > { %v3350_v52 = vadd.f32 %v3344_v7, %v7418_v6  ;;  %v5057_v53 = vpop.f32.mrb[49].mxu0  ;;  %v4712_v6 = vld [vmem:[%s7783_s6] ss:$0 sm:$0xff] }
0x1637   : > { %v3347_v55 = vpop.f32.mrb[50].mxu0 }
0x1638   : > { %v5058_v57 = vpop.f32.mrb[51].mxu0 }
0x1696   : > { %v3409_v58 = vpop.xlane.xlu1 %3408 }
0x1697   : > { %5425 = vrcp.f32 %v3409_v58  ;;  %v5389_v58 = vld [vmem:[%s7104_s23 + $0x70] sm:$0xff]  }
0x169a   : > { %v3414_v59 = vpop.permute.xlu1 %3413 }
0x169b   : > { %v3419_v60 = vsel %vm1926_vm3, %v3414_v59, 0  ;;  %v5390_v59 = vld [vmem:[%s7104_s23 + $0x30] sm:$0xff]  }
0x169c   : > { %5066 = vmatpush3.bf16.msra.mxu0 %v3419_v60  ;;  %v5391_v60 = vld [vmem:[%s7104_s23 + $0x78] sm:$0xff]  }
0x169d   : > { %3695 = vmatprep.subr.bf16.mxu0 %v5355_v15 }
0x16a1   : > { %v5426_v61 = vpop.eup %5425 }
0x16a2   : > { %v3411_v56 = vmul.f32 %v5426_v61, %v5424_v11  ;;  %v5392_v61 = vld [vmem:[%s7104_s23 + $0x38] sm:$0xff]   ;;  %s7791_s23 = sld [smem:[#allocation91_spill]] (!%p4750_p12) }
0x16a4   : > { %v3412_v62 = vpack.c.bf16 %v3411_v56, %v3411_v56  ;;  %v3569_v56 = vld [vmem:[%s7785_s8] sm:$0x3] }
0x16a5   : > { %v3612_v20 = vrot.slane %v3569_v56, %v7147_v25 }
0x16a6   : > { %5068 = vmatmul.mubr.msk.bf16.vlgmr.msra.gmra.mrb[52].mxu0 %vm1910_vm2, %v3412_v62  ;;  %v3608_v62 = vrot.slane %v3569_v56, %v7141_v23 }
0x16a7   : > { %3727 = vmatprep.mubr.bf16.mxu0 %v6160_v3  ;;  %3696 = vmatpush1.bf16.msra.mxu0 %v5353_v14 }
0x16a8   : > { %3697 = vmatprep.subr.bf16.mxu0 %v5358_v16 }
0x16ab   : > { %3698 = vmatpush1.bf16.msra.mxu0 %v5356_v17 }
0x16ac   : > { %3699 = vmatprep.subr.bf16.mxu0 %v5361_v19 }
0x16af   : > { %3700 = vmatpush1.bf16.msra.mxu0 %v5359_v35 }
0x16b0   : > { %3701 = vmatprep.subr.bf16.mxu0 %v5364_v24 }
0x16b3   : > { %3702 = vmatpush1.bf16.msra.mxu0 %v5362_v26  ;;  %v4748_v26 = vld [vmem:[%s7788_s16] ss:$0 sm:$0xff] }
0x16b4   : > { %3703 = vmatprep.subr.bf16.mxu0 %v5367_v54 }
0x16b7   : > { %3704 = vmatpush1.bf16.msra.mxu0 %v5365_v4  ;;  %v4749_v4 = vld [vmem:[%s7789_s17] ss:$0 sm:$0xff] }
0x16b8   : > { %3705 = vmatprep.subr.bf16.mxu0 %v5370_v27 }
0x16bb   : > { %3706 = vmatpush1.bf16.msra.mxu0 %v5368_v28 }
0x16bc   : > { %3707 = vmatprep.subr.bf16.mxu0 %v5373_v29  ;;  %v5431_v29 = vld [vmem:[#allocation30] sm:$0xff] (!%p4750_p12)  }
0x16bf   : > { %3708 = vmatpush1.bf16.msra.mxu0 %v5371_v30  ;;  %v6166_v30 = vmov (!%p4750_p12), 0.0  }
0x16c0   : > { %3709 = vmatprep.subr.bf16.mxu0 %v5376_v31  ;;  %v5432_v31 = vld [vmem:[#allocation30 + $0x8] sm:$0xff] (!%p4750_p12)  }
0x16c3   : > { %3710 = vmatpush1.bf16.msra.mxu0 %v5374_v32 }
0x16c4   : > { %5079 = vmatprep.subr.bf16.mxu0 (!%p4750_p12), %v6166_v30 }
0x1779   : > { %v3455_v63 = vpop.f32.mrb[52].mxu0 }
0x177a   : > { %v3461_v0 = vpack.c.bf16 %v3455_v63, %v3455_v63  ;;  %v5069_v1 = vpop.f32.mrb[53].mxu0 }
0x177b   : > { %v3458_v2 = vpop.f32.mrb[54].mxu0 }
0x177c   : > { %v5070_v5 = vpop.f32.mrb[55].mxu0  ;;  %5076 = vmatmul.mubr.msk.bf16.vlgmr.msra.gmra.mrb[52].mxu1 %vm1863_vm1, %v3461_v0 }
0x177d   : > { %4849 = vmatpush3.bf16.msra.mxu1 %v5378_v34 }
0x177e   : > { %4850 = vmatprep.subr.bf16.mxu1 %v5379_v36 }
0x1781   : > { %4851 = vmatpush3.bf16.msra.mxu1 %v5380_v38  ;;  %v5433_v38 = vld [vmem:[#allocation30 + $0x10] sm:$0xff] (!%p4750_p12)  }
0x1782   : > { %4852 = vmatprep.subr.bf16.mxu1 %v5381_v39  ;;  %v5434_v39 = vld [vmem:[#allocation30 + $0x18] sm:$0xff] (!%p4750_p12)  }
0x1785   : > { %4853 = vmatpush3.bf16.msra.mxu1 %v5382_v40  ;;  %v5435_v40 = vld [vmem:[#allocation30 + $0x20] sm:$0xff] (!%p4750_p12)  }
0x1786   : > { %4854 = vmatprep.subr.bf16.mxu1 %v5383_v41  ;;  %v5436_v41 = vld [vmem:[#allocation30 + $0x28] sm:$0xff] (!%p4750_p12)  }
0x1789   : > { %4855 = vmatpush3.bf16.msra.mxu1 %v5384_v49  ;;  %v5437_v49 = vld [vmem:[#allocation30 + $0x30] sm:$0xff] (!%p4750_p12)  }
0x178a   : > { %4856 = vmatprep.subr.bf16.mxu1 %v5385_v42  ;;  %v5438_v42 = vld [vmem:[#allocation30 + $0x38] sm:$0xff] (!%p4750_p12)  }
0x178d   : > { %4857 = vmatpush3.bf16.msra.mxu1 %v5386_v43 }
0x178e   : > { %4858 = vmatprep.subr.bf16.mxu1 %v5387_v45 }
0x1791   : > { %4859 = vmatpush3.bf16.msra.mxu1 %v5388_v46 }
0x1792   : > { %4860 = vmatprep.subr.bf16.mxu1 %v5389_v58 }
0x1795   : > { %4861 = vmatpush3.bf16.msra.mxu1 %v5390_v59 }
0x1796   : > { %4862 = vmatprep.subr.bf16.mxu1 %v5391_v60 }
0x1799   : > { %4863 = vmatpush3.bf16.msra.mxu1 %v5392_v61 }
0x184f   : > { %v3511_v8 = vpop.f32.mrb[52].mxu1 }
0x1850   : > { %v3517_v9 = vadd.f32 %v3511_v8, %v3350_v52  ;;  %v5077_v3 = vpop.f32.mrb[53].mxu1  ;;  %v4714_v52 = vld [vmem:[%s7786_s10] ss:$0 sm:$0xff] }
0x1851   : > { %v3514_v18 = vpop.f32.mrb[54].mxu1 }
0x1852   : > { %v3524_v10 = vadd.f32 %v4712_v6, %v3517_v9  ;;  %v5078_v12 = vpop.f32.mrb[55].mxu1 }
0x1853   : > { %v4731_v12 = vld [vmem:[%s7787_s15] ss:$0 sm:$0xff] }
0x1854   : > { %v3525_v13 = vadd.f32 %v3524_v10, %v7336_v44 }
0x1856   : > { %3528 = vadd.xlane.f32.xlu1 %v3525_v13 }
0x18e3   : > { %v3529_v44 = vpop.xlane.xlu1 %3528 }
0x18e4   : > { %v3530_v37 = vmul.f32 0.0078125, %v3529_v44 }
0x18e6   : > { %v3531_v21 = vsub.f32 %v3525_v13, %v3530_v37 }
0x18e8   : > { %v3532_v22 = vmul.f32 %v3531_v21, %v3531_v21 }
0x18ea   : > { %3533 = vadd.xlane.f32.xlu0 %v3532_v22 }
0x1977   : > { %v3534_v47 = vpop.xlane.xlu0 %3533 }
0x1978   : > { %v3535_v48 = vmul.f32 0.0078125, %v3534_v47 }
0x197a   : > { %v3536_v11 = vadd.f32 1e-05, %v3535_v48  ;;  %v4751_v48 = vld [vmem:[%s7791_s23] ss:$0 sm:$0xff] (!%p4750_p12) }
0x197c   : > { %5427 = vrsqrt.f32 %v3536_v11 }
0x1986   : > { %v5428_v50 = vpop.eup %5427 }
0x1987   : > { %v3538_v7 = vmul.f32 %v5428_v50, %v3531_v21  ;;  %v4752_v50 = vld [vmem:[#allocation29] ss:$0 sm:$0xff] (!%p4750_p12) }
0x1989   : > { %v3545_v53 = vmul.f32 %v4713_v51, %v3538_v7 }
0x198b   : > { %v3552_v55 = vadd.f32 %v4714_v52, %v3545_v53  ;;  %v4753_v53 = vld [vmem:[#allocation32] ss:$0 sm:$0xff] (!%p4750_p12) }
0x198d   : > { %v3603_v57 = vpack.c.bf16 %v3552_v55, %v3552_v55 }
0x198f   : > { %3728 = vmatmul.mubr.bf16.vlgmr.msra.gmra.mrb[56].mxu0 %v3603_v57 }
0x1990   : > { %5080 = vmatpush3.bf16.msra.mxu0 (!%p4750_p12), %v5431_v29  ;;  %5095 = vmatprep.mubr.msk.bf16.mxu0 (!%p4750_p12), %vm6167_vm4, %v6166_v30 }
0x1991   : > { %5081 = vmatprep.subr.bf16.mxu0 (!%p4750_p12), %v6166_v30 }
0x1994   : > { %5082 = vmatpush3.bf16.msra.mxu0 (!%p4750_p12), %v5432_v31 }
0x1995   : > { %5083 = vmatprep.subr.bf16.mxu0 (!%p4750_p12), %v6166_v30 }
0x1998   : > { %5084 = vmatpush3.bf16.msra.mxu0 (!%p4750_p12), %v5433_v38 }
0x1999   : > { %5085 = vmatprep.subr.bf16.mxu0 (!%p4750_p12), %v6166_v30 }
0x199c   : > { %5086 = vmatpush3.bf16.msra.mxu0 (!%p4750_p12), %v5434_v39 }
0x199d   : > { %5087 = vmatprep.subr.bf16.mxu0 (!%p4750_p12), %v6166_v30 }
0x19a0   : > { %5088 = vmatpush3.bf16.msra.mxu0 (!%p4750_p12), %v5435_v40 }
0x19a1   : > { %5089 = vmatprep.subr.bf16.mxu0 (!%p4750_p12), %v6166_v30 }
0x19a4   : > { %5090 = vmatpush3.bf16.msra.mxu0 (!%p4750_p12), %v5436_v41 }
0x19a5   : > { %5091 = vmatprep.subr.bf16.mxu0 (!%p4750_p12), %v6166_v30 }
0x19a8   : > { %5092 = vmatpush3.bf16.msra.mxu0 (!%p4750_p12), %v5437_v49 }
0x19a9   : > { %5093 = vmatprep.subr.bf16.mxu0 (!%p4750_p12), %v6166_v30 }
0x19ac   : > { %5094 = vmatpush3.bf16.msra.mxu0 (!%p4750_p12), %v5438_v42 }
0x1a62   : > { %v3729_v63 = vpop.f32.mrb[56].mxu0 }
0x1a63   : > { %v3730_v0 = vadd.f32 %v3729_v63, %v3608_v62  ;;  %v3731_v1 = vpop.f32.mrb[57].mxu0 }
0x1a64   : > { %v3732_v2 = vadd.f32 %v3731_v1, %v3612_v20  ;;  %v3733_v5 = vpop.f32.mrb[58].mxu0 }
0x1a65   : > { %v3736_v6 = vmax.f32 %v3730_v0, 0.0  ;;  %v3734_v8 = vpop.f32.mrb[59].mxu0 }
0x1a66   : > { %v3737_v9 = vmax.f32 %v3732_v2, 0.0 }
0x1a67   : > { %v3738_v18 = vpack.c.bf16 %v3736_v6, %v3736_v6 }
0x1a68   : > { %v3739_v3 = vpack.c.bf16 %v3737_v9, %v3737_v9 }
0x1a6a   : > { %3874 = vmatprep.mubr.bf16.mxu1 %v3739_v3 }
0x1a6b   : > { %3875 = vmatmul.mubr.bf16.vlgmr.msra.gmra.mrb[56].mxu1 %v3738_v18 }
0x1b3e   : > { %v4864_v10 = vpop.f32.mrb[56].mxu1 }
0x1b3f   : > { %v4865_v13 = vpop.f32.mrb[57].mxu1 }
0x1b40   : > { %v4866_v14 = vadd.f32 %v4865_v13, %v4864_v10  ;;  %v4867_v23 = vpop.f32.mrb[58].mxu1 }
0x1b41   : > { %v4868_v25 = vpop.f32.mrb[59].mxu1 }
0x1b42   : > { %v3877_v15 = vadd.f32 %v4866_v14, %v4731_v12 }
0x1b44   : > { %v3882_v16 = vadd.f32 %v3877_v15, %v3552_v55 }
0x1b46   : > { %3885 = vadd.xlane.f32.xlu0 %v3882_v16 }
0x1bd3   : > { %v3886_v17 = vpop.xlane.xlu0 %3885 }
0x1bd4   : > { %v3887_v19 = vmul.f32 0.0078125, %v3886_v17 }
0x1bd6   : > { %v3888_v35 = vsub.f32 %v3882_v16, %v3887_v19 }
0x1bd8   : > { %v3889_v44 = vmul.f32 %v3888_v35, %v3888_v35 }
0x1bda   : > { %3890 = vadd.xlane.f32.xlu0 %v3889_v44 }
0x1c67   : > { %v3891_v37 = vpop.xlane.xlu0 %3890 }
0x1c68   : > { %v3892_v21 = vmul.f32 0.0078125, %v3891_v37 }
0x1c6a   : > { %v3893_v22 = vadd.f32 1e-05, %v3892_v21 }
0x1c6c   : > { %5429 = vrsqrt.f32 %v3893_v22 }
0x1c76   : > { %v5430_v24 = vpop.eup %5429 }
0x1c77   : > { %v3895_v54 = vmul.f32 %v5430_v24, %v3888_v35  ;;  %3914 = sbr.rel (%p4750_p12) target bundleno = 7821 (0x1e8d), region = 216 }
0x1c79   : > { %v3902_v27 = vmul.f32 %v4748_v26, %v3895_v54 }
0x1c7b   : > { %v3909_v28 = vadd.f32 %v4749_v4, %v3902_v27 }
0x1c7d   : > { %3910 = vst [vmem:[#allocation2] sm:$0xff] %v3909_v28  ;;  %3917 = vadd.xlane.f32.xlu0 (!%p4750_p12), %v3909_v28 }
0x1d0a   : > { %v3918_v32 = vpop.xlane.xlu0 %3917 }
0x1d0b   : > { %v3919_v33 = vmul.f32 0.0078125, %v3918_v32 }
0x1d0d   : > { %v3920_v34 = vsub.f32 %v3909_v28, %v3919_v33 }
0x1d0f   : > { %v3921_v36 = vmul.f32 %v3920_v34, %v3920_v34 }
0x1d11   : > { %3922 = vadd.xlane.f32.xlu0 %v3921_v36 }
0x1d9e   : > { %v3923_v43 = vpop.xlane.xlu0 %3922 }
0x1d9f   : > { %v3924_v45 = vmul.f32 0.0078125, %v3923_v43 }
0x1da1   : > { %v3925_v46 = vadd.f32 1e-05, %v3924_v45 }
0x1da3   : > { %5439 = vrsqrt.f32 %v3925_v46 }
0x1dad   : > { %v5440_v47 = vpop.eup %5439 }
0x1dae   : > { %v3927_v11 = vmul.f32 %v5440_v47, %v3920_v34 }
0x1db0   : > { %v3934_v51 = vmul.f32 %v4751_v48, %v3927_v11 }
0x1db2   : > { %v3941_v7 = vadd.f32 %v4752_v50, %v3934_v51 }
0x1db4   : > { %v3942_v52 = vpack.c.bf16 %v3941_v7, %v3941_v7 }
0x1db6   : > { %5096 = vmatmul.mubr.bf16.vlgmr.msra.gmra.mrb[0].mxu0 %v3942_v52 }
0x1e89   : > { %v4048_v55 = vpop.f32.mrb[0].mxu0 }
0x1e8a   : > { %v4049_v57 = vadd.f32 %v4753_v53, %v4048_v55  ;;  %v5097_v58 = vpop.f32.mrb[1].mxu0 }
0x1e8b   : > { %v4051_v59 = vpop.f32.mrb[2].mxu0 }
0x1e8c   : > { %4054 = vst [vmem:[%s1537_s7] sm:$0xff] %v4049_v57  ;;  %v5098_v60 = vpop.f32.mrb[3].mxu0 }
0x1e8d PF: > { %s7792_s14 = sld [smem:[#allocation52_spill]]  ;;  %s7793_s11 = sld [smem:[#allocation47_spill]] }
0x1e8e   : > { %s7794_s2 = sld [smem:[#allocation62_spill]]  ;;  %s7795_s9 = sld [smem:[#allocation95_spill]] }
0x1e8f   : > { %s4069_s30 = sshll.u32 %s1537_s7, 4  ;;  %s6168_s24 = smov [#allocation33]   ;;  %s4070_s30 = int_to_ptr.vmem [resolvable:$true] %s4069_s30 }
0x1e90   : > { %s5973_s13 = scalar_lea.vmem %s4070_s30, 128  ;;  %s5977_s20 = sshll.u32 %s6168_s24, 4  ;;  %s5978_s20 = int_to_ptr.vmem [resolvable:$false] %s5977_s20 }
0x1e91   : > { %p5974_p1 = scmp.ne.s32.totalorder %s4070_s30, %s5973_s13  ;;  %s5979_s29 = scalar_lea.vmem %s5978_s20, 256 }
0x1e92   : > { %p5980_p13 = scmp.lt.s32.totalorder %s4070_s30, %s5978_s20  ;;  %p5981_p6 = scmp.lt.s32.totalorder %s5979_s29, %s5973_s13 }
0x1e93   : > { %s4763_s28 = sshll.u32 %s7792_s14, 7  ;;  %s7797_s19 = sand.u32 1, %s7793_s11  }
0x1e94   : > { %s7796_s26 = smov %s7795_s9  ;;  %s7517_s3 = scalar_lea.hbm %s7795_s9, %s4763_s28 }
0x1e95   : > { %s4056_s12 = scalar_lea.sflag [#allocation5], %s7797_s19  ;;  %p7798_p5 = scmp.ne.s32.totalorder %s7794_s2, 0 }
0x1e96   : > { %p5982_p11 = por %p5981_p6, %p5980_p13 }
0x1e97   : > { %p5975_p10 = pnand %p5974_p1, %p7798_p5 }
0x1e99   : > { %p5976_p0 = pneg %p5975_p10 }
0x1e9b   : > { %p5983_p2 = pnand %p5982_p11, %p5976_p0 }
0x1e9d   : > { %5986 = shalt.err (!%p5983_p2)
}
0x1e9e   : > { %s5987_s4 = scalar_lea.hbm %s7517_s3, 128  ;;  %s5991_s0 = scalar_lea.hbm %s7796_s26, 256 }
0x1e9f   : > { %p5988_p3 = scmp.ne.s32.totalorder %s7517_s3, %s5987_s4  ;;  %p5992_p4 = scmp.lt.u32.totalorder %s7517_s3, %s7796_s26 }
0x1ea0   : > { %p5993_p8 = scmp.lt.u32.totalorder %s5991_s0, %s5987_s4  ;;  %p5995_p1 = scmp.lt.u32.totalorder %s5987_s4, %s7517_s3 }
0x1ea1   : > { %p5989_p7 = pnand %p5988_p3, %p7798_p5 }
0x1ea2   : > { %p5994_p12 = por %p5993_p8, %p5992_p4 }
0x1ea3   : > { %p5990_p9 = pneg %p5989_p7 }
0x1ea4   : > { %p5996_p10 = por %p5995_p1, %p5994_p12 }
0x1ea6   : > { %p5997_p0 = pnand %p5996_p10, %p5990_p9 }
0x1ea8   : > { %6000 = shalt.err (!%p5997_p0)
}
0x1ea9   : > { %5147 = dma.vmem_to_hbm [thread:$0]  (%p7798_p5), %s4070_s30, 128, %s7517_s3, %s4056_s12  }
0x1eaa PF: > { %s7799_s8 = sld [smem:[#allocation55_spill]]  ;;  %s7800_s10 = sld [smem:[#allocation46_spill]] }
0x1eab   : > { %s7801_s15 = sld [smem:[#allocation63_spill]] }
0x1eb0   : > { %p5169_p13 = scmp.ge.s32.totalorder %s7799_s8, 2  ;;  %s4081_s16 = sand.u32 1, %s7800_s10  }
0x1eb1   : > { %p7802_p6 = scmp.ne.s32.totalorder %s7801_s15, 0  ;;  %s4082_s17 = scalar_lea.sflag [#allocation5], %s4081_s16 }
0x1eb3   : > { %p5160_p11 = pnand %p5169_p13, %p7802_p6 }
0x1eb5   : > { %6090 = dma.done.wait (!%p5160_p11), %s4082_s17, 128  }
0x1eb6   : > { %6092 = vsyncadd (!%p5160_p11), %s4082_s17, 4294967168  ;;  %s69_s2 = sadd.s32 1, %s7799_s8   ;;  %s7803_s8 = sld [smem:[#allocation47_spill]] }
0x1eb7   : > { %p66_p2 = scmp.ge.s32.totalorder %s69_s2, 6   ;;  %s7804_s5 = sld [smem:[#allocation48_spill]] }
0x1eb8   : > { %s7805_s9 = sld [smem:[#allocation61_spill]]  ;;  %s7806_s30 = sld [smem:[#allocation49_spill]] }
0x1eb9   : > { %s7807_s3 = sld [smem:[#allocation50_spill]]  ;;  %s7808_s6 = sld [smem:[#allocation59_spill]] }
0x1eba   : > { %s7809_s10 = sld [smem:[#allocation53_spill]]  ;;  %s7810_s0 = sld [smem:[#allocation54_spill]] }
0x1ebb   : > { %s7811_s11 = sld [smem:[#allocation57_spill]]  ;;  %s7812_s29 = sld [smem:[#allocation58_spill]] }
0x1ebc   :  { %68 = sbr.rel (!%p66_p2) target bundleno = 56 (0x38), region = 402 }
0x1ec3   :  { %4087 = vsyncpa [#allocation4], 1 }
0x1ec4   :  { %4089 = vsyncpa [#allocation4 + $0x1], 1 }
0x1ec5   :  { %4090 = vsyncpa [#allocation7], 1 }
0x1ec6   :  { %4092 = vsyncpa [#allocation7 + $0x1], 1 }
0x1ec7   :  { %4093 = vsyncpa [#allocation10], 1 }
0x1ec8   :  { %4095 = vsyncpa [#allocation10 + $0x1], 1 }
0x1ec9   :  { %4096 = vsyncpa [#allocation13], 1 }
0x1eca   :  { %4098 = vsyncpa [#allocation13 + $0x1], 1 }
0x1ecb   :  { %4099 = vsyncpa [#allocation16], 1 }
0x1ecc   :  { %4101 = vsyncpa [#allocation16 + $0x1], 1 }
0x1ecd   :  { %4102 = vsyncpa [#allocation19], 1 }
0x1ece   :  { %4104 = vsyncpa [#allocation19 + $0x1], 1 }
0x1ecf   :  { %4105 = vsyncpa [#allocation22], 1 }
0x1ed0   :  { %4107 = vsyncpa [#allocation22 + $0x1], 1 }
0x1ed1   :  { %4108 = vsyncpa [#allocation25], 1 }
0x1ed2   :  { %4110 = vsyncpa [#allocation25 + $0x1], 1 }
0x1ed3   :  { %4111 = vsyncpa [#allocation28], 1 }
0x1ed4   :  { %4113 = vsyncpa [#allocation28 + $0x1], 1 }
0x1ed5   :  { %4114 = vsyncpa [#allocation31], 1 }
0x1ed6   :  { %4115 = vsyncpa [#allocation5], 1 }
0x1ed7   :  { %4117 = vsyncpa [#allocation5 + $0x1], 1 }

</bundles_post_ra>
